<compile_context>
chip_gen: v7x
topology: tpu7x:2x2x1
jax: 0.10.0
libtpu: 0.0.40
codegen_flags: <defaults>
</compile_context>

<pallas_src>
import functools

import jax
import jax.numpy as jnp
import numpy as np
from jax import lax
from jax.experimental import pallas as pl
from jax.experimental.pallas import tpu as pltpu


def _pick_tile_rows(Hu, Wu, k2cin, bytes_in, requested=None):
    """Pick a row-tile size (rows of the *upsampled* plane): divides Hu and keeps
    (tile_rows * Wu) a multiple of 8 (sublane constraint of the flattened output)."""
    if requested is None:
        target = 2 << 20                          # ~2 MiB im2col slab per tile
        cap = max(1, target // max(1, Wu * k2cin * bytes_in))
    else:
        cap = max(1, int(requested))
    divisors = [d for d in range(1, Hu + 1) if Hu % d == 0 and (d * Wu) % 8 == 0]
    if not divisors:
        return Hu                                 # block == full dim is always legal
    fitting = [d for d in divisors if d <= cap]
    return max(fitting) if fitting else min(divisors)


def _make_conv_stats_kernel(*, K, pad, Wu, C_in, TR):
    """Pass 1: fused H-upsample/reflect row gather + W reflect pad + im2col KxK conv
    (+bias) per H-tile, plus per-channel sum / sum-of-squares accumulation."""
    n_halo = TR + 2 * pad

    def kernel(row_idx_ref, x_ref, w_ref, b_ref, y_ref, stats_ref, rows_scr):
        # row_idx_ref: SMEM (n_tiles, TR+2p) int32 -- source x row per padded tile row
        # x_ref:   (H, Wu, C_in)  original-H, W-upsampled sample (DMA'd once per b)
        # w_ref:   (K*K*C_in, C_out) im2col conv weight (tap-major)
        # b_ref:   (1, C_out)
        # y_ref:   (TR*Wu, C_out) raw conv output tile (f32)
        # stats_ref: (2, C_out)   [sum ; sum_sq] accumulated over the whole plane
        # rows_scr:  (TR+2p, Wu, C_in) gathered source rows for this tile
        t = pl.program_id(1)

        # --- row gather: fuses nearest H-upsample + H reflection (encoded in the SMEM
        #     table); x stays at original H resolution, fetched once per sample. ---
        @pl.loop(0, n_halo)
        def _(j):
            rows_scr[j] = x_ref[row_idx_ref[t, j]]

        rows = rows_scr[...]                                   # (n_halo, Wu, C_in)

        # --- reflection pad along W: 2*pad single-column pieces around the body ---
        if pad > 0:
            left = [rows[:, pad - c:pad - c + 1, :] for c in range(pad)]
            right = [rows[:, Wu - 2 - c:Wu - 1 - c, :] for c in range(pad)]
            xpad = jnp.concatenate(left + [rows] + right, axis=1)   # (n_halo, Wu+2p, C_in)
        else:
            xpad = rows

        # --- im2col-lite: fold the K*K taps into the contraction dim, one MXU matmul ---
        pieces = [xpad[di:di + TR, dj:dj + Wu, :]
                  for di in range(K) for dj in range(K)]
        slab = jnp.concatenate(pieces, axis=-1).reshape(TR * Wu, K * K * C_in)

        if slab.dtype == jnp.float32:        # exact-parity path
            y = jnp.dot(slab, w_ref[...], preferred_element_type=jnp.float32,
                        precision=jax.lax.Precision.HIGHEST)
        else:                                # bf16 operands, f32 accumulation (MXU-native)
            y = jnp.dot(slab, w_ref[...], preferred_element_type=jnp.float32)
        y = y + b_ref[...]
        y_ref[...] = y

        # --- per-channel sum / sum-of-squares, accumulated across H tiles (exact IN) ---
        @pl.when(t == 0)
        def _():
            stats_ref[...] = jnp.zeros_like(stats_ref)
        stats_ref[0:1, :] = stats_ref[0:1, :] + jnp.sum(y, axis=0, keepdims=True)
        stats_ref[1:2, :] = stats_ref[1:2, :] + jnp.sum(y * y, axis=0, keepdims=True)

    return kernel


def _make_norm_film_kernel(*, C_out, n_pixels, relu):
    """Pass 2: instance norm (from accumulated stats) + FiLM (style FC) + ReLU."""
    inv_n = 1.0 / float(n_pixels)

    def kernel(y_ref, stats_ref, style_ref, fcw_ref, fcb_ref, o_ref):
        mean = stats_ref[0:1, :] * inv_n                       # (1, C_out)
        var = stats_ref[1:2, :] * inv_n - mean * mean          # biased var (InstanceNorm2d)
        inv_std = lax.rsqrt(var + 1e-5)

        # fused [gamma | beta] style FC: one (1,S)@(S,2*C_out) matmul
        gb = jnp.dot(style_ref[...], fcw_ref[...],
                     preferred_element_type=jnp.float32,
                     precision=jax.lax.Precision.HIGHEST) + fcb_ref[...]
        gamma = gb[:, :C_out]
        beta = gb[:, C_out:]

        y = (y_ref[...] - mean) * (gamma * inv_std) + beta
        if relu:
            y = jnp.maximum(y, 0.0)
        o_ref[...] = y

    return kernel


@functools.partial(
    jax.jit,
    static_argnames=("kernel_size", "upsample", "stride", "relu",
                     "conv_in_bf16", "tile_rows"))
def upsample_conv_in_relu_forward(x, style, params, *, kernel_size=3, upsample=None,
                                  stride=1, relu=True, conv_in_bf16=True,
                                  tile_rows=None):
    """Fused forward of UpsampleConvInRelu.

    x:      (B, C_in, H, W) float32 (NCHW, PyTorch layout)
    style:  (B, 100)        float32
    params: conv_w (C_out, C_in, K, K), conv_b (C_out,),
            fc_gamma_w / fc_beta_w (C_out, 100), fc_gamma_b / fc_beta_b (C_out,)
    returns (B, C_out, H*up, W*up) float32
    """
    if stride != 1:
        # TODO(synk): strided conv output indexing not implemented (ghiasi uses stride=1).
        raise NotImplementedError("stride != 1 is not supported")

    B, C_in, H, W = x.shape
    S = style.shape[1]
    K = int(kernel_size)
    pad = K // 2
    up = int(upsample) if upsample else 1
    Hu, Wu = H * up, W * up
    assert Hu > pad and Wu > pad, "reflection pad must be smaller than the upsampled image"

    conv_w = params["conv_w"]
    C_out = conv_w.shape[0]
    assert conv_w.shape == (C_out, C_in, K, K)

    in_dtype = jnp.bfloat16 if conv_in_bf16 else jnp.float32
    bytes_in = 2 if conv_in_bf16 else 4

    # NHWC at original H resolution; only the cheap W-repeat runs outside the kernel
    # (on the small array), the H-upsample is fused via the row-gather table below.
    x_nhwc = jnp.transpose(x.astype(jnp.float32), (0, 2, 3, 1))
    if up > 1:
        x_nhwc = jnp.repeat(x_nhwc, up, axis=2)                # (B, H, Wu, C_in)
    x_nhwc = x_nhwc.astype(in_dtype)
    style3 = style.astype(jnp.float32)[:, None, :]             # (B, 1, S)

    # im2col conv weight, tap-major to match the in-kernel concat order
    w_im2col = jnp.transpose(conv_w.astype(jnp.float32), (2, 3, 1, 0)
                             ).reshape(K * K * C_in, C_out).astype(in_dtype)
    bconv = params["conv_b"].astype(jnp.float32)[None, :]      # (1, C_out)

    # fused [gamma | beta] FC params
    fcw = jnp.concatenate([params["fc_gamma_w"], params["fc_beta_w"]],
                          axis=0).astype(jnp.float32).T        # (S, 2*C_out)
    fcb = jnp.concatenate([params["fc_gamma_b"], params["fc_beta_b"]]
                          ).astype(jnp.float32)[None, :]       # (1, 2*C_out)

    # ---- H tiling of the upsampled plane ----
    TR = _pick_tile_rows(Hu, Wu, K * K * C_in, bytes_in, tile_rows)
    n_tiles = Hu // TR
    n_halo = TR + 2 * pad
    HWu = Hu * Wu

    # Per-tile source-row table (fuses nearest H-upsample + H reflection).  Static,
    # computed with numpy; lands in SMEM via scalar prefetch.
    jj = np.arange(n_halo)[None, :]
    tt = np.arange(n_tiles)[:, None]
    u = tt * TR + jj - pad                       # upsampled-plane row (may be out of range)
    u = np.where(u < 0, -u, u)                   # ReflectionPad2d top
    u = np.where(u >= Hu, 2 * Hu - 2 - u, u)     # ReflectionPad2d bottom
    row_idx = jnp.asarray((u // up).astype(np.int32))          # (n_tiles, n_halo)

    # per-step VMEM working set -> vmem limit (headroom, capped for v7x's 64 MiB)
    est = (2 * H * Wu * C_in * bytes_in                        # x (double-buffered)
           + n_halo * Wu * C_in * bytes_in                     # row-gather scratch
           + 2 * TR * Wu * K * K * C_in * bytes_in             # im2col pieces + slab
           + 4 * TR * Wu * C_out * 4                           # conv tile + out buffers
           + 2 * K * K * C_in * C_out * bytes_in
           + (2 << 20))
    vmem_limit = int(min(64 << 20, max(32 << 20, est)))

    # ---- pass 1: fused upsample/reflect + im2col conv + per-channel stats ----
    conv_kernel = _make_conv_stats_kernel(K=K, pad=pad, Wu=Wu, C_in=C_in, TR=TR)
    y_conv, stats = pl.pallas_call(
        conv_kernel,
        out_shape=(jax.ShapeDtypeStruct((B, HWu, C_out), jnp.float32),
                   jax.ShapeDtypeStruct((B, 2, C_out), jnp.float32)),
        grid_spec=pltpu.PrefetchScalarGridSpec(
            num_scalar_prefetch=1,
            grid=(B, n_tiles),
            in_specs=[
                pl.BlockSpec((pl.Squeezed(), H, Wu, C_in),
                             lambda b, t, ridx: (b, 0, 0, 0)),          # x: once per b
                pl.BlockSpec((K * K * C_in, C_out), lambda b, t, ridx: (0, 0)),
                pl.BlockSpec((1, C_out), lambda b, t, ridx: (0, 0)),
            ],
            out_specs=(
                pl.BlockSpec((pl.Squeezed(), TR * Wu, C_out),
                             lambda b, t, ridx: (b, t, 0)),             # conv tiles
                pl.BlockSpec((pl.Squeezed(), 2, C_out),
                             lambda b, t, ridx: (b, 0, 0)),             # stats accumulator
            ),
            scratch_shapes=[pltpu.VMEM((n_halo, Wu, C_in), in_dtype)],
        ),
        compiler_params=pltpu.CompilerParams(
            dimension_semantics=("parallel", "arbitrary"),
            vmem_limit_bytes=vmem_limit,
        ),
    )(row_idx, x_nhwc, w_im2col, bconv)

    # ---- pass 2: instance norm (exact) + FiLM + ReLU, fully parallel ----
    norm_kernel = _make_norm_film_kernel(C_out=C_out, n_pixels=HWu, relu=relu)
    out = pl.pallas_call(
        norm_kernel,
        out_shape=jax.ShapeDtypeStruct((B, HWu, C_out), jnp.float32),
        grid_spec=pltpu.PrefetchScalarGridSpec(
            num_scalar_prefetch=0,
            grid=(B, n_tiles),
            in_specs=[
                pl.BlockSpec((pl.Squeezed(), TR * Wu, C_out), lambda b, t: (b, t, 0)),
                pl.BlockSpec((pl.Squeezed(), 2, C_out), lambda b, t: (b, 0, 0)),
                pl.BlockSpec((pl.Squeezed(), 1, S), lambda b, t: (b, 0, 0)),
                pl.BlockSpec((S, 2 * C_out), lambda b, t: (0, 0)),
                pl.BlockSpec((1, 2 * C_out), lambda b, t: (0, 0)),
            ],
            out_specs=pl.BlockSpec((pl.Squeezed(), TR * Wu, C_out),
                                   lambda b, t: (b, t, 0)),
        ),
        compiler_params=pltpu.CompilerParams(
            dimension_semantics=("parallel", "parallel"),
            vmem_limit_bytes=vmem_limit,
        ),
    )(y_conv, stats, style3, fcw, fcb)

    # (B, Hu*Wu, C_out) -> (B, C_out, Hu, Wu)   (kept NCHW to match the module contract)
    return jnp.transpose(out.reshape(B, Hu, Wu, C_out), (0, 3, 1, 2))


def reference_forward(x, style, params, *, kernel_size=3, upsample=None,
                      stride=1, relu=True):
    """Pure-JAX f32 reference matching the PyTorch module semantics (NCHW)."""
    p = kernel_size // 2
    gamma = jnp.dot(style, params["fc_gamma_w"].T,
                    precision=jax.lax.Precision.HIGHEST) + params["fc_gamma_b"]
    beta = jnp.dot(style, params["fc_beta_w"].T,
                   precision=jax.lax.Precision.HIGHEST) + params["fc_beta_b"]
    if upsample:
        x = jnp.repeat(jnp.repeat(x, upsample, axis=2), upsample, axis=3)
    xpad = jnp.pad(x, ((0, 0), (0, 0), (p, p), (p, p)), mode="reflect")
    y = jax.lax.conv_general_dilated(
        xpad, params["conv_w"], (stride, stride), "VALID",
        dimension_numbers=("NCHW", "OIHW", "NCHW"),
        precision=jax.lax.Precision.HIGHEST)
    y = y + params["conv_b"][None, :, None, None]
    mu = y.mean(axis=(2, 3), keepdims=True)
    var = ((y - mu) ** 2).mean(axis=(2, 3), keepdims=True)
    y = (y - mu) / jnp.sqrt(var + 1e-5)
    y = gamma[:, :, None, None] * y + beta[:, :, None, None]
    if relu:
        y = jnp.maximum(y, 0.0)
    return y


if __name__ == "__main__":
    B, C_in, C_out, H, W, S = 2, 4, 8, 16, 16, 100
    K, UP = 3, 2

    key = jax.random.PRNGKey(0)
    ks = jax.random.split(key, 8)
    params = {
        "conv_w": 0.2 * jax.random.normal(ks[0], (C_out, C_in, K, K), jnp.float32),
        "conv_b": 0.1 * jax.random.normal(ks[1], (C_out,), jnp.float32),
        "fc_gamma_w": 0.1 * jax.random.normal(ks[2], (C_out, S), jnp.float32),
        "fc_gamma_b": 0.1 * jax.random.normal(ks[3], (C_out,), jnp.float32),
        "fc_beta_w": 0.1 * jax.random.normal(ks[4], (C_out, S), jnp.float32),
        "fc_beta_b": 0.1 * jax.random.normal(ks[5], (C_out,), jnp.float32),
    }
    x = jax.random.normal(ks[6], (B, C_in, H, W), jnp.float32)
    style = jax.random.normal(ks[7], (B, S), jnp.float32)

    ref_up = reference_forward(x, style, params, kernel_size=K, upsample=UP)

    # exact-parity f32 path, H-tiled (4 tiles of 8 upsampled rows -> exercises the
    # two-pass instance-norm accumulation)
    out32 = upsample_conv_in_relu_forward(x, style, params, kernel_size=K, upsample=UP,
                                          conv_in_bf16=False, tile_rows=8)
    out32 = jax.block_until_ready(out32)
    assert out32.shape == (B, C_out, H * UP, W * UP)
    np.testing.assert_allclose(np.asarray(out32), np.asarray(ref_up),
                               rtol=2e-3, atol=2e-3)

    # production default: bf16 conv operands (f32 accumulation), looser tolerance
    out_bf16 = upsample_conv_in_relu_forward(x, style, params, kernel_size=K,
                                             upsample=UP, tile_rows=8)
    out_bf16 = jax.block_until_ready(out_bf16)
    np.testing.assert_allclose(np.asarray(out_bf16), np.asarray(ref_up),
                               rtol=1e-1, atol=1e-1)

    # no-upsample configuration (auto tile size)
    ref_noup = reference_forward(x, style, params, kernel_size=K, upsample=None)
    out_noup = upsample_conv_in_relu_forward(x, style, params, kernel_size=K,
                                             upsample=None, conv_in_bf16=False)
    out_noup = jax.block_until_ready(out_noup)
    np.testing.assert_allclose(np.asarray(out_noup), np.asarray(ref_noup),
                               rtol=2e-3, atol=2e-3)

    print("KERNEL_OK")
</pallas_src>

<mosaic_0001>
module attributes {stable_mosaic.version = 11 : i64} {
  func.func @kernel(%arg0: i32, %arg1: i32, %arg2: memref<1x256x8xf32, #tpu.memory_space<vmem>>, %arg3: memref<1x2x8xf32, #tpu.memory_space<vmem>>, %arg4: memref<1x1x100xf32, #tpu.memory_space<vmem>>, %arg5: memref<100x16xf32, #tpu.memory_space<vmem>>, %arg6: memref<1x16xf32, #tpu.memory_space<vmem>>, %arg7: memref<1x256x8xf32, #tpu.memory_space<vmem>>) attributes {dimension_semantics = [#tpu.dimension_semantics<parallel>, #tpu.dimension_semantics<parallel>], iteration_bounds = array<i64: 2, 4>, scalar_prefetch = 0 : i64, scratch_operands = 0 : i64, tpu.core_type = #tpu.core_type<tc>, window_params = [{transform_indices = @transform_0, window_bounds = array<i64: 1, 256, 8>}, {transform_indices = @transform_1, window_bounds = array<i64: 1, 2, 8>}, {transform_indices = @transform_2, window_bounds = array<i64: 1, 1, 100>}, {pipeline_mode = #tpu.pipeline_mode<synchronous>, transform_indices = @transform_3, window_bounds = array<i64: 100, 16>}, {pipeline_mode = #tpu.pipeline_mode<synchronous>, transform_indices = @transform_4, window_bounds = array<i64: 1, 16>}, {transform_indices = @transform_5, window_bounds = array<i64: 1, 256, 8>}]} {
    %c0 = arith.constant 0 : index
    %c0_0 = arith.constant 0 : index
    %c0_1 = arith.constant 0 : index
    %0 = vector.load %arg3[%c0, %c0_0, %c0_1] : memref<1x2x8xf32, #tpu.memory_space<vmem>>, vector<1x1x8xf32>
    %1 = vector.shape_cast %0 : vector<1x1x8xf32> to vector<1x8xf32>
    %cst = arith.constant 9.765625E-4 : f32
    %2 = vector.broadcast %cst : f32 to vector<1x8xf32>
    %3 = arith.mulf %1, %2 : vector<1x8xf32>
    %c0_2 = arith.constant 0 : index
    %c1 = arith.constant 1 : index
    %c0_3 = arith.constant 0 : index
    %4 = vector.load %arg3[%c0_2, %c1, %c0_3] : memref<1x2x8xf32, #tpu.memory_space<vmem>>, vector<1x1x8xf32>
    %5 = vector.shape_cast %4 : vector<1x1x8xf32> to vector<1x8xf32>
    %cst_4 = arith.constant 9.765625E-4 : f32
    %6 = vector.broadcast %cst_4 : f32 to vector<1x8xf32>
    %7 = arith.mulf %5, %6 : vector<1x8xf32>
    %8 = arith.mulf %3, %3 : vector<1x8xf32>
    %9 = arith.subf %7, %8 : vector<1x8xf32>
    %cst_5 = arith.constant 9.99999974E-6 : f32
    %10 = vector.broadcast %cst_5 : f32 to vector<1x8xf32>
    %11 = arith.addf %9, %10 : vector<1x8xf32>
    %12 = math.rsqrt %11 : vector<1x8xf32>
    %c0_6 = arith.constant 0 : index
    %c0_7 = arith.constant 0 : index
    %c0_8 = arith.constant 0 : index
    %13 = vector.load %arg4[%c0_6, %c0_7, %c0_8] : memref<1x1x100xf32, #tpu.memory_space<vmem>>, vector<1x1x100xf32>
    %14 = vector.shape_cast %13 : vector<1x1x100xf32> to vector<1x100xf32>
    %c0_9 = arith.constant 0 : index
    %c0_10 = arith.constant 0 : index
    %15 = vector.load %arg5[%c0_9, %c0_10] : memref<100x16xf32, #tpu.memory_space<vmem>>, vector<100x16xf32>
    %cst_11 = arith.constant dense<0.000000e+00> : vector<1x16xf32>
    %16 = tpu.matmul %14, %15, %cst_11 {dimension_numbers = #tpu.dot_dimension_numbers<[1], [0], [0], [1], [0, 0, 1, 1], [], []>, precision = #tpu.contract_precision<fp32>} : vector<1x100xf32>, vector<100x16xf32>, vector<1x16xf32> -> vector<1x16xf32>
    %c0_12 = arith.constant 0 : index
    %c0_13 = arith.constant 0 : index
    %17 = vector.load %arg6[%c0_12, %c0_13] : memref<1x16xf32, #tpu.memory_space<vmem>>, vector<1x16xf32>
    %18 = arith.addf %16, %17 : vector<1x16xf32>
    %19 = vector.extract_strided_slice %18 {offsets = [0, 0], sizes = [1, 8], strides = [1, 1]} : vector<1x16xf32> to vector<1x8xf32>
    %20 = vector.extract_strided_slice %18 {offsets = [0, 8], sizes = [1, 8], strides = [1, 1]} : vector<1x16xf32> to vector<1x8xf32>
    %c0_14 = arith.constant 0 : index
    %c0_15 = arith.constant 0 : index
    %c0_16 = arith.constant 0 : index
    %21 = vector.load %arg2[%c0_14, %c0_15, %c0_16] : memref<1x256x8xf32, #tpu.memory_space<vmem>>, vector<1x256x8xf32>
    %22 = vector.shape_cast %21 : vector<1x256x8xf32> to vector<256x8xf32>
    %23 = vector.broadcast %3 : vector<1x8xf32> to vector<256x8xf32>
    %24 = arith.subf %22, %23 : vector<256x8xf32>
    %25 = arith.mulf %19, %12 : vector<1x8xf32>
    %26 = vector.broadcast %25 : vector<1x8xf32> to vector<256x8xf32>
    %27 = arith.mulf %24, %26 : vector<256x8xf32>
    %28 = vector.broadcast %20 : vector<1x8xf32> to vector<256x8xf32>
    %29 = arith.addf %27, %28 : vector<256x8xf32>
    %cst_17 = arith.constant 0.000000e+00 : f32
    %30 = vector.broadcast %cst_17 : f32 to vector<256x8xf32>
    %31 = arith.maximumf %29, %30 : vector<256x8xf32>
    %c0_18 = arith.constant 0 : index
    %c0_19 = arith.constant 0 : index
    %c0_20 = arith.constant 0 : index
    %32 = vector.load %arg7[%c0_18, %c0_19, %c0_20] : memref<1x256x8xf32, #tpu.memory_space<vmem>>, vector<1x256x8xf32>
    %33 = vector.shape_cast %32 : vector<1x256x8xf32> to vector<256x8xf32>
    %34 = vector.shape_cast %31 : vector<256x8xf32> to vector<1x256x8xf32>
    tpu.vector_store %arg7[%c0_18, %c0_19, %c0_20], %34 {strides = array<i32>} : memref<1x256x8xf32, #tpu.memory_space<vmem>>, vector<1x256x8xf32>,
    return
  }
  func.func @transform_0(%arg0: i32, %arg1: i32) -> (i32, i32, i32) {
    %c0_i32 = arith.constant 0 : i32
    %c0_i32_0 = arith.constant 0 : i32
    return %arg0, %arg1, %c0_i32 : i32, i32, i32
  }
  func.func @transform_1(%arg0: i32, %arg1: i32) -> (i32, i32, i32) {
    %c0_i32 = arith.constant 0 : i32
    %c0_i32_0 = arith.constant 0 : i32
    %c0_i32_1 = arith.constant 0 : i32
    return %arg0, %c0_i32, %c0_i32_0 : i32, i32, i32
  }
  func.func @transform_2(%arg0: i32, %arg1: i32) -> (i32, i32, i32) {
    %c0_i32 = arith.constant 0 : i32
    %c0_i32_0 = arith.constant 0 : i32
    %c0_i32_1 = arith.constant 0 : i32
    return %arg0, %c0_i32, %c0_i32_0 : i32, i32, i32
  }
  func.func @transform_3(%arg0: i32, %arg1: i32) -> (i32, i32) {
    %c0_i32 = arith.constant 0 : i32
    %c0_i32_0 = arith.constant 0 : i32
    %c0_i32_1 = arith.constant 0 : i32
    return %c0_i32, %c0_i32_0 : i32, i32
  }
  func.func @transform_4(%arg0: i32, %arg1: i32) -> (i32, i32) {
    %c0_i32 = arith.constant 0 : i32
    %c0_i32_0 = arith.constant 0 : i32
    %c0_i32_1 = arith.constant 0 : i32
    return %c0_i32, %c0_i32_0 : i32, i32
  }
  func.func @transform_5(%arg0: i32, %arg1: i32) -> (i32, i32, i32) {
    %c0_i32 = arith.constant 0 : i32
    %c0_i32_0 = arith.constant 0 : i32
    return %arg0, %arg1, %c0_i32 : i32, i32, i32
  }
}

module attributes {stable_mosaic.version = 11 : i64} {
  func.func @kernel(%arg0: i32, %arg1: i32, %arg2: memref<4x10xi32, #tpu.memory_space<smem>>, %arg3: memref<1x16x32x4xf32, #tpu.memory_space<vmem>>, %arg4: memref<36x8xf32, #tpu.memory_space<vmem>>, %arg5: memref<1x8xf32, #tpu.memory_space<vmem>>, %arg6: memref<1x256x8xf32, #tpu.memory_space<vmem>>, %arg7: memref<1x2x8xf32, #tpu.memory_space<vmem>>, %arg8: memref<10x32x4xf32, #tpu.memory_space<vmem>>) attributes {dimension_semantics = [#tpu.dimension_semantics<parallel>, #tpu.dimension_semantics<arbitrary>], iteration_bounds = array<i64: 2, 4>, scalar_prefetch = 1 : i64, scratch_operands = 1 : i64, tpu.core_type = #tpu.core_type<tc>, window_params = [{transform_indices = @transform_0, window_bounds = array<i64: 1, 16, 32, 4>}, {pipeline_mode = #tpu.pipeline_mode<synchronous>, transform_indices = @transform_1, window_bounds = array<i64: 36, 8>}, {pipeline_mode = #tpu.pipeline_mode<synchronous>, transform_indices = @transform_2, window_bounds = array<i64: 1, 8>}, {transform_indices = @transform_3, window_bounds = array<i64: 1, 256, 8>}, {transform_indices = @transform_4, window_bounds = array<i64: 1, 2, 8>}]} {
    %c0_i32 = arith.constant 0 : i32
    %c10_i32 = arith.constant 10 : i32
    %0 = arith.addi %c0_i32, %c10_i32 : i32
    %c1_i32 = arith.constant 1 : i32
    scf.for %arg9 = %c0_i32 to %0 step %c1_i32  : i32 {
      %c1_i32_25 = arith.constant 1 : i32
      %44 = arith.muli %arg9, %c1_i32_25 : i32
      %c0_i32_26 = arith.constant 0 : i32
      %45 = arith.addi %c0_i32_26, %44 : i32
      %46 = arith.index_cast %arg1 : i32 to index
      %47 = arith.index_cast %45 : i32 to index
      %48 = memref.load %arg2[%46, %47] : memref<4x10xi32, #tpu.memory_space<smem>>
      %c0_27 = arith.constant 0 : index
      %49 = arith.index_cast %48 : i32 to index
      %c0_28 = arith.constant 0 : index
      %c0_29 = arith.constant 0 : index
      %50 = vector.load %arg3[%c0_27, %49, %c0_28, %c0_29] : memref<1x16x32x4xf32, #tpu.memory_space<vmem>>, vector<1x1x32x4xf32>
      %51 = vector.shape_cast %50 : vector<1x1x32x4xf32> to vector<32x4xf32>
      %52 = arith.index_cast %45 : i32 to index
      %c0_30 = arith.constant 0 : index
      %c0_31 = arith.constant 0 : index
      %53 = vector.load %arg8[%52, %c0_30, %c0_31] : memref<10x32x4xf32, #tpu.memory_space<vmem>>, vector<1x32x4xf32>
      %54 = vector.shape_cast %53 : vector<1x32x4xf32> to vector<32x4xf32>
      %55 = vector.shape_cast %51 : vector<32x4xf32> to vector<1x32x4xf32>
      tpu.vector_store %arg8[%52, %c0_30, %c0_31], %55 {strides = array<i32>} : memref<10x32x4xf32, #tpu.memory_space<vmem>>, vector<1x32x4xf32>,
    }
    %c10_i32_0 = arith.constant 10 : i32
    %c0 = arith.constant 0 : index
    %c0_1 = arith.constant 0 : index
    %c0_2 = arith.constant 0 : index
    %1 = vector.load %arg8[%c0, %c0_1, %c0_2] : memref<10x32x4xf32, #tpu.memory_space<vmem>>, vector<10x32x4xf32>
    %2 = vector.extract_strided_slice %1 {offsets = [0, 1, 0], sizes = [10, 1, 4], strides = [1, 1, 1]} : vector<10x32x4xf32> to vector<10x1x4xf32>
    %3 = vector.extract_strided_slice %1 {offsets = [0, 30, 0], sizes = [10, 1, 4], strides = [1, 1, 1]} : vector<10x32x4xf32> to vector<10x1x4xf32>
    %4 = tpu.concatenate %2, %1, %3 in 1 : vector<10x1x4xf32>, vector<10x32x4xf32>, vector<10x1x4xf32> -> vector<10x34x4xf32>
    %5 = vector.extract_strided_slice %4 {offsets = [0, 0, 0], sizes = [8, 32, 4], strides = [1, 1, 1]} : vector<10x34x4xf32> to vector<8x32x4xf32>
    %6 = vector.extract_strided_slice %4 {offsets = [0, 1, 0], sizes = [8, 32, 4], strides = [1, 1, 1]} : vector<10x34x4xf32> to vector<8x32x4xf32>
    %7 = vector.extract_strided_slice %4 {offsets = [0, 2, 0], sizes = [8, 32, 4], strides = [1, 1, 1]} : vector<10x34x4xf32> to vector<8x32x4xf32>
    %8 = vector.extract_strided_slice %4 {offsets = [1, 0, 0], sizes = [8, 32, 4], strides = [1, 1, 1]} : vector<10x34x4xf32> to vector<8x32x4xf32>
    %9 = vector.extract_strided_slice %4 {offsets = [1, 1, 0], sizes = [8, 32, 4], strides = [1, 1, 1]} : vector<10x34x4xf32> to vector<8x32x4xf32>
    %10 = vector.extract_strided_slice %4 {offsets = [1, 2, 0], sizes = [8, 32, 4], strides = [1, 1, 1]} : vector<10x34x4xf32> to vector<8x32x4xf32>
    %11 = vector.extract_strided_slice %4 {offsets = [2, 0, 0], sizes = [8, 32, 4], strides = [1, 1, 1]} : vector<10x34x4xf32> to vector<8x32x4xf32>
    %12 = vector.extract_strided_slice %4 {offsets = [2, 1, 0], sizes = [8, 32, 4], strides = [1, 1, 1]} : vector<10x34x4xf32> to vector<8x32x4xf32>
    %13 = vector.extract_strided_slice %4 {offsets = [2, 2, 0], sizes = [8, 32, 4], strides = [1, 1, 1]} : vector<10x34x4xf32> to vector<8x32x4xf32>
    %14 = tpu.concatenate %5, %6, %7, %8, %9, %10, %11, %12, %13 in 2 : vector<8x32x4xf32>, vector<8x32x4xf32>, vector<8x32x4xf32>, vector<8x32x4xf32>, vector<8x32x4xf32>, vector<8x32x4xf32>, vector<8x32x4xf32>, vector<8x32x4xf32>, vector<8x32x4xf32> -> vector<8x32x36xf32>
    %15 = vector.shape_cast %14 : vector<8x32x36xf32> to vector<256x36xf32>
    %c0_3 = arith.constant 0 : index
    %c0_4 = arith.constant 0 : index
    %16 = vector.load %arg4[%c0_3, %c0_4] : memref<36x8xf32, #tpu.memory_space<vmem>>, vector<36x8xf32>
    %cst = arith.constant dense<0.000000e+00> : vector<256x8xf32>
    %17 = tpu.matmul %15, %16, %cst {dimension_numbers = #tpu.dot_dimension_numbers<[1], [0], [0], [1], [0, 0, 1, 1], [], []>, precision = #tpu.contract_precision<fp32>} : vector<256x36xf32>, vector<36x8xf32>, vector<256x8xf32> -> vector<256x8xf32>
    %c0_5 = arith.constant 0 : index
    %c0_6 = arith.constant 0 : index
    %18 = vector.load %arg5[%c0_5, %c0_6] : memref<1x8xf32, #tpu.memory_space<vmem>>, vector<1x8xf32>
    %19 = vector.broadcast %18 : vector<1x8xf32> to vector<256x8xf32>
    %20 = arith.addf %17, %19 : vector<256x8xf32>
    %c0_7 = arith.constant 0 : index
    %c0_8 = arith.constant 0 : index
    %c0_9 = arith.constant 0 : index
    %21 = vector.load %arg6[%c0_7, %c0_8, %c0_9] : memref<1x256x8xf32, #tpu.memory_space<vmem>>, vector<1x256x8xf32>
    %22 = vector.shape_cast %21 : vector<1x256x8xf32> to vector<256x8xf32>
    %23 = vector.shape_cast %20 : vector<256x8xf32> to vector<1x256x8xf32>
    tpu.vector_store %arg6[%c0_7, %c0_8, %c0_9], %23 {strides = array<i32>} : memref<1x256x8xf32, #tpu.memory_space<vmem>>, vector<1x256x8xf32>,
    %c0_i32_10 = arith.constant 0 : i32
    %24 = arith.cmpi eq, %arg1, %c0_i32_10 : i32
    %25 = arith.extui %24 : i1 to i32
    %c0_i32_11 = arith.constant 0 : i32
    %26 = arith.cmpi ne, %25, %c0_i32_11 : i32
    scf.if %26 {
      %cst_25 = arith.constant 0.000000e+00 : f32
      %44 = vector.broadcast %cst_25 : f32 to vector<2x8xf32>
      %c0_26 = arith.constant 0 : index
      %c0_27 = arith.constant 0 : index
      %c0_28 = arith.constant 0 : index
      %45 = vector.load %arg7[%c0_26, %c0_27, %c0_28] : memref<1x2x8xf32, #tpu.memory_space<vmem>>, vector<1x2x8xf32>
      %46 = vector.shape_cast %45 : vector<1x2x8xf32> to vector<2x8xf32>
      %47 = vector.shape_cast %44 : vector<2x8xf32> to vector<1x2x8xf32>
      tpu.vector_store %arg7[%c0_26, %c0_27, %c0_28], %47 {strides = array<i32>} : memref<1x2x8xf32, #tpu.memory_space<vmem>>, vector<1x2x8xf32>,
    } else {
    }
    %c0_12 = arith.constant 0 : index
    %c0_13 = arith.constant 0 : index
    %c0_14 = arith.constant 0 : index
    %27 = vector.load %arg7[%c0_12, %c0_13, %c0_14] : memref<1x2x8xf32, #tpu.memory_space<vmem>>, vector<1x1x8xf32>
    %28 = vector.shape_cast %27 : vector<1x1x8xf32> to vector<1x8xf32>
    %cst_15 = arith.constant dense<0.000000e+00> : vector<8xf32>
    %29 = vector.multi_reduction <add>, %20, %cst_15 [0] : vector<256x8xf32> to vector<8xf32>
    %30 = vector.shape_cast %29 : vector<8xf32> to vector<1x8xf32>
    %31 = arith.addf %28, %30 : vector<1x8xf32>
    %c0_16 = arith.constant 0 : index
    %c0_17 = arith.constant 0 : index
    %c0_18 = arith.constant 0 : index
    %32 = vector.load %arg7[%c0_16, %c0_17, %c0_18] : memref<1x2x8xf32, #tpu.memory_space<vmem>>, vector<1x1x8xf32>
    %33 = vector.shape_cast %32 : vector<1x1x8xf32> to vector<1x8xf32>
    %34 = vector.shape_cast %31 : vector<1x8xf32> to vector<1x1x8xf32>
    tpu.vector_store %arg7[%c0_16, %c0_17, %c0_18], %34 {strides = array<i32>} : memref<1x2x8xf32, #tpu.memory_space<vmem>>, vector<1x1x8xf32>,
    %c0_19 = arith.constant 0 : index
    %c1 = arith.constant 1 : index
    %c0_20 = arith.constant 0 : index
    %35 = vector.load %arg7[%c0_19, %c1, %c0_20] : memref<1x2x8xf32, #tpu.memory_space<vmem>>, vector<1x1x8xf32>
    %36 = vector.shape_cast %35 : vector<1x1x8xf32> to vector<1x8xf32>
    %37 = arith.mulf %20, %20 : vector<256x8xf32>
    %cst_21 = arith.constant dense<0.000000e+00> : vector<8xf32>
    %38 = vector.multi_reduction <add>, %37, %cst_21 [0] : vector<256x8xf32> to vector<8xf32>
    %39 = vector.shape_cast %38 : vector<8xf32> to vector<1x8xf32>
    %40 = arith.addf %36, %39 : vector<1x8xf32>
    %c0_22 = arith.constant 0 : index
    %c1_23 = arith.constant 1 : index
    %c0_24 = arith.constant 0 : index
    %41 = vector.load %arg7[%c0_22, %c1_23, %c0_24] : memref<1x2x8xf32, #tpu.memory_space<vmem>>, vector<1x1x8xf32>
    %42 = vector.shape_cast %41 : vector<1x1x8xf32> to vector<1x8xf32>
    %43 = vector.shape_cast %40 : vector<1x8xf32> to vector<1x1x8xf32>
    tpu.vector_store %arg7[%c0_22, %c1_23, %c0_24], %43 {strides = array<i32>} : memref<1x2x8xf32, #tpu.memory_space<vmem>>, vector<1x1x8xf32>,
    return
  }
  func.func @transform_0(%arg0: i32, %arg1: i32, %arg2: memref<4x10xi32, #tpu.memory_space<smem>>) -> (i32, i32, i32, i32) {
    %c0_i32 = arith.constant 0 : i32
    %c0_i32_0 = arith.constant 0 : i32
    %c0_i32_1 = arith.constant 0 : i32
    %c0_i32_2 = arith.constant 0 : i32
    return %arg0, %c0_i32, %c0_i32_0, %c0_i32_1 : i32, i32, i32, i32
  }
  func.func @transform_1(%arg0: i32, %arg1: i32, %arg2: memref<4x10xi32, #tpu.memory_space<smem>>) -> (i32, i32) {
    %c0_i32 = arith.constant 0 : i32
    %c0_i32_0 = arith.constant 0 : i32
    %c0_i32_1 = arith.constant 0 : i32
    return %c0_i32, %c0_i32_0 : i32, i32
  }
  func.func @transform_2(%arg0: i32, %arg1: i32, %arg2: memref<4x10xi32, #tpu.memory_space<smem>>) -> (i32, i32) {
    %c0_i32 = arith.constant 0 : i32
    %c0_i32_0 = arith.constant 0 : i32
    %c0_i32_1 = arith.constant 0 : i32
    return %c0_i32, %c0_i32_0 : i32, i32
  }
  func.func @transform_3(%arg0: i32, %arg1: i32, %arg2: memref<4x10xi32, #tpu.memory_space<smem>>) -> (i32, i32, i32) {
    %c0_i32 = arith.constant 0 : i32
    %c0_i32_0 = arith.constant 0 : i32
    return %arg0, %arg1, %c0_i32 : i32, i32, i32
  }
  func.func @transform_4(%arg0: i32, %arg1: i32, %arg2: memref<4x10xi32, #tpu.memory_space<smem>>) -> (i32, i32, i32) {
    %c0_i32 = arith.constant 0 : i32
    %c0_i32_0 = arith.constant 0 : i32
    %c0_i32_1 = arith.constant 0 : i32
    return %arg0, %c0_i32, %c0_i32_0 : i32, i32, i32
  }
}

</mosaic_0001>

<bundles_post_ra>
// kernel: upsample_conv_in_relu_forward.3
= control target key start
LH: loop header
LB: loop body
LE: loop exit
PB: predicated region body
PF: predicated region fallthrough
CT: control target
= control target key end

     0   :  { %s1759_s18 = smov 0   ;;  %s1761_s19 = smov 0   ;;  %s2278_s0 = inlined_call_operand.vmem [shape: f32[2,1024,8], index: 0, kind: input, shape index: {}]   ;;  %s2279_s1 = inlined_call_operand.vmem [shape: f32[2,2,8], index: 1, kind: input, shape index: {}]   ;;  %s2280_s2 = inlined_call_operand.vmem [shape: f32[2,1,100], index: 2, kind: input, shape index: {}]   ;;  %s2281_s3 = inlined_call_operand.vmem [shape: f32[100,16], index: 3, kind: input, shape index: {}]   ;;  %s2282_s4 = inlined_call_operand.vmem [shape: f32[1,16], index: 4, kind: input, shape index: {}]   ;;  %s2283_s5 = inlined_call_operand.vmem [shape: f32[2,1024,8], index: 5, kind: output, shape index: {}]  }
   0x1   :  { %s1763_s20 = smov 0   ;;  %s1765_s21 = smov 0  }
   0x2   :  { %s1767_s22 = smov 0  }
   0x3 LB: > { %s24_s23 = sadd.s32 1, %s1715_s20  ;;  %s27_s24 = sadd.s32 1, %s1719_s21  ;;  %s1723_s22 = sphi %s1767_s22, %s15_s22   ;;  %s1719_s21 = sphi %s1765_s21, %s2287_s21   ;;  %s1715_s20 = sphi %s1763_s20, %s2286_s20   ;;  %s1711_s19 = sphi %s1761_s19, %s2285_s19   ;;  %s1707_s18 = sphi %s1759_s18, %s2284_s18  }
   0x4   : > { %p25_p0 = scmp.ge.s32.totalorder %s24_s23, 4  ;;  %p1253_p1 = scmp.ge.s32.totalorder %s1723_s22, 1 }
   0x5   : > { %p225_p2 = scmp.lt.s32.totalorder %s1723_s22, 9 }
   0x6   : > { %s2289_s23 = smov (%p25_p0, %s24_s23), 0  ;;  %s2291_s24 = smov (!%p25_p0, %s27_s24), %s1719_s21 }
   0x7   : > { %p226_p3 = pnand %p1253_p1, %p225_p2  ;;  %p29_p4 = scmp.ge.s32.totalorder %s2291_s24, 2 }
   0x8   : > { %v304_v0 = vld [vmem:[%s2281_s3] sm:$0xff] (!%p226_p3)  ;;  %v305_v1 = vld [vmem:[%s2281_s3 + $0x8] sm:$0xff] (!%p226_p3)  ;;  %v306_v2 = vld [vmem:[%s2281_s3 + $0x10] sm:$0xff] (!%p226_p3)  ;;  %v1725_v3 = vmov (!%p226_p3), 0.0|0.0   ;;  %p269_p5 = scmp.lt.s32.totalorder (!%p226_p3), %s1711_s19, 1  ;;  %vm318_vm0 = vcmask (!%p226_p3), 818176  }
   0x9   : > { %s2293_s24 = smov (%p29_p4, %s2291_s24), 0  ;;  %229 = sbr.rel (%p226_p3) target bundleno = 452 (0x1c4), region = 40 }
   0xa   : > { %1521 = vmatprep.subr.bf16.mxu1 (!%p226_p3), %v1725_v3  ;;  %1575 = vmatprep.subr.bf16.mxu0 (!%p226_p3), %v1725_v3  ;;  %v327_v4 = vand.u32 (!%p226_p3), 4294901760, %v304_v0  ;;  %v330_v5 = vand.u32 (!%p226_p3), 4294901760, %v305_v1  ;;  %v307_v6 = vld [vmem:[%s2281_s3 + $0x18] sm:$0xff] (!%p226_p3)  ;;  %v333_v7 = vand.u32 (!%p226_p3), 4294901760, %v306_v2  ;;  %v308_v8 = vld [vmem:[%s2281_s3 + $0x20] sm:$0xff] (!%p226_p3)  ;;  %v309_v9 = vld [vmem:[%s2281_s3 + $0x28] sm:$0xff] (!%p226_p3) }
   0xb   : > { %v336_v10 = vand.u32 (!%p226_p3), 4294901760, %v307_v6  ;;  %v339_v12 = vand.u32 (!%p226_p3), 4294901760, %v308_v8  ;;  %v342_v13 = vand.u32 (!%p226_p3), 4294901760, %v309_v9  ;;  %v310_v15 = vld [vmem:[%s2281_s3 + $0x30] sm:$0xff] (!%p226_p3)  ;;  %v311_v16 = vld [vmem:[%s2281_s3 + $0x38] sm:$0xff] (!%p226_p3)  ;;  %v312_v21 = vld [vmem:[%s2281_s3 + $0x40] sm:$0xff] (!%p226_p3) }
   0xc   : > { %v1813_v11 = vpack.c.bf16 (!%p226_p3), %v330_v5, %v327_v4  ;;  %v345_v19 = vand.u32 (!%p226_p3), 4294901760, %v310_v15  ;;  %v348_v20 = vand.u32 (!%p226_p3), 4294901760, %v311_v16  ;;  %v313_v22 = vld [vmem:[%s2281_s3 + $0x48] sm:$0xff] (!%p226_p3)  ;;  %vm1726_vm1 = vmmov (!%p226_p3), 0   ;;  %v314_v31 = vld [vmem:[%s2281_s3 + $0x50] sm:$0xff] (!%p226_p3)  ;;  %v315_v32 = vld [vmem:[%s2281_s3 + $0x58] sm:$0xff] (!%p226_p3) }
   0xd   : > { %v1818_v14 = vpack.c.bf16 (!%p226_p3), %v336_v10, %v333_v7  ;;  %v1835_v17 = vpack.c.bf16 (!%p226_p3), %v342_v13, %v339_v12  ;;  %v1727_v24 = vmov (!%p226_p3), 0.0   ;;  %v1853_v26 = vsub.f32 (!%p226_p3), %v304_v0, %v327_v4  ;;  %v316_v43 = vld [vmem:[%s2281_s3 + $0x60] sm:$0xf] (!%p226_p3)  ;;  %s1728_s13 = smov (!%p226_p3), 120  }
   0xe   : > { %1523 = vmatpush3.bf16.msra.mxu1 (!%p226_p3), %v1813_v11  ;;  %1577 = vmatpush3.bf16.msra.mxu0 (!%p226_p3), %v1813_v11  ;;  %v1855_v27 = vsub.f32 (!%p226_p3), %v305_v1, %v330_v5  ;;  %v1859_v28 = vpack.c.bf16 (!%p226_p3), %v348_v20, %v345_v19  ;;  %v351_v29 = vand.u32 (!%p226_p3), 4294901760, %v312_v21  ;;  %v354_v30 = vand.u32 (!%p226_p3), 4294901760, %v313_v22 }
   0xf   : > { %1524 = vmatprep.subr.bf16.mxu1 (!%p226_p3), %v1725_v3  ;;  %1578 = vmatprep.subr.bf16.mxu0 (!%p226_p3), %v1725_v3  ;;  %v1869_v33 = vsub.f32 (!%p226_p3), %v306_v2, %v333_v7  ;;  %v1874_v35 = vsub.f32 (!%p226_p3), %v307_v6, %v336_v10  ;;  %v417_v36 = vand.u32 (!%p226_p3), 4294901760, %v1853_v26  ;;  %v357_v39 = vand.u32 (!%p226_p3), 4294901760, %v314_v31 }
  0x10   : > { %s2295_s19 = smov (!%p269_p5, %s1711_s19), 1  ;;  %1373 = vmatprep.mubr.msk.f32.mxu1 %vm1726_vm1, %v1727_v24  ;;  %1460 = vmatprep.mubr.msk.f32.mxu0 %vm1726_vm1, %v1727_v24  ;;  %v424_v37 = vand.u32 4294901760, %v1855_v27  ;;  %v1880_v38 = vpack.c.bf16 %v354_v30, %v351_v29  ;;  %v360_v40 = vand.u32 4294901760, %v315_v32  ;;  %vm322_vm2 = vcmask 1043456  }
  0x11   : > { %s284_s25 = scalar_lea.vmem %s2280_s2, %s2295_s19  ;;  %v1884_v41 = vsub.f32 %v308_v8, %v339_v12  ;;  %v1886_v42 = vsub.f32 %v309_v9, %v342_v13  ;;  %v431_v45 = vand.u32 4294901760, %v1869_v33  ;;  %v418_v46 = vsub.f32 %v1853_v26, %v417_v36  ;;  %s1257_s14 = sshll.u32 %s2295_s19, 1 }
  0x12   : > { %v303_v18 = vld [vmem:[%s284_s25] sm:$0x1]  ;;  %1526 = vmatpush3.bf16.msra.mxu1 %v1818_v14  ;;  %1580 = vmatpush3.bf16.msra.mxu0 %v1818_v14  ;;  %v425_v47 = vsub.f32 %v1855_v27, %v424_v37  ;;  %v438_v48 = vand.u32 4294901760, %v1874_v35  ;;  %v1898_v49 = vpack.c.bf16 %v360_v40, %v357_v39  ;;  %v1900_v50 = vsub.f32 %v310_v15, %v345_v19  ;;  %s281_s17 = scalar_lea.vmem %s2279_s1, %s1257_s14  ;;  %s1254_s25 = sshll.u32 %s1707_s18, 5 }
  0x13   : > { %1527 = vmatprep.subr.bf16.mxu1 %v1725_v3  ;;  %1581 = vmatprep.subr.bf16.mxu0 %v1725_v3  ;;  %v320_v23 = vsel %vm318_vm0, %v303_v18, 0  ;;  %v324_v51 = vsel %vm322_vm2, %v316_v43, 0  ;;  %v432_v53 = vsub.f32 %v1869_v33, %v431_v45  ;;  %v445_v54 = vand.u32 4294901760, %v1884_v41  ;;  %p271_p6 = scmp.lt.s32.totalorder %s1254_s25, 127  ;;  %s1255_s26 = sshll.u32 %s2295_s19, 7 }
  0x14   : > { %v1851_v25 = vand.u32 4294901760, %v320_v23  ;;  %v452_v55 = vand.u32 4294901760, %v1886_v42  ;;  %v1908_v56 = vsub.f32 %v311_v16, %v348_v20  ;;  %v419_v57 = vand.u32 4294901760, %v418_v46 }
  0x15   : > { %v426_v58 = vand.u32 4294901760, %v425_v47  ;;  %v439_v59 = vsub.f32 %v1874_v35, %v438_v48  ;;  %v1913_v60 = vand.u32 4294901760, %v324_v51  ;;  %v1915_v61 = vsub.f32 %v312_v21, %v351_v29  ;;  %s2297_s25 = smov (!%p271_p6, %s1254_s25), 127 }
  0x16   : > { %1529 = vmatpush3.bf16.msra.mxu1 %v1835_v17  ;;  %1583 = vmatpush3.bf16.msra.mxu0 %v1835_v17  ;;  %v1872_v34 = vsub.f32 %v320_v23, %v1851_v25  ;;  %v1917_v62 = vsub.f32 %v313_v22, %v354_v30  ;;  %v1594_v63 = vpack.c.bf16 %v424_v37, %v417_v36  ;;  %v433_v1 = vand.u32 4294901760, %v432_v53  ;;  %s2018_s27 = sadd.s32 %s1255_s26, %s2297_s25 }
  0x17   : > { %1530 = vmatprep.subr.bf16.mxu1 %v1725_v3  ;;  %1584 = vmatprep.subr.bf16.mxu0 %v1725_v3  ;;  %v446_v2 = vsub.f32 %v1884_v41, %v445_v54  ;;  %v453_v4 = vsub.f32 %v1886_v42, %v452_v55  ;;  %v1540_v5 = vpack.c.bf16 %v426_v58, %v419_v57  ;;  %v440_v6 = vand.u32 4294901760, %v439_v59  ;;  %s1256_s28 = sshll.u32 %s2018_s27, 3 }
  0x18   : > { %v406_v44 = vand.u32 4294901760, %v1872_v34  ;;  %v459_v7 = vand.u32 4294901760, %v1900_v50  ;;  %v466_v8 = vand.u32 4294901760, %v1908_v56  ;;  %v1927_v9 = vsub.f32 %v314_v31, %v357_v39  ;;  %s2026_s6 = scalar_lea.vmem %s2278_s0, %s1256_s28  ;;  %s2177_s7 = scalar_lea.vmem %s2283_s5, %s1256_s28 }
  0x19   : > { %v1929_v10 = vsub.f32 %v315_v32, %v360_v40  ;;  %v1597_v12 = vpack.c.bf16 %v438_v48, %v431_v45  ;;  %v447_v13 = vand.u32 4294901760, %v446_v2  ;;  %v454_v15 = vand.u32 4294901760, %v453_v4  ;;  %v2029_v2 = vld [vmem:[%s2026_s6] sm:$0xff]  ;;  %v2032_v4 = vld [vmem:[%s2026_s6 + $0x8] sm:$0xff] }
  0x1a   : > { %1532 = vmatpush3.bf16.msra.mxu1 %v1859_v28  ;;  %1586 = vmatpush3.bf16.msra.mxu0 %v1859_v28  ;;  %v407_v52 = vsub.f32 %v1872_v34, %v406_v44  ;;  %v473_v16 = vand.u32 4294901760, %v1915_v61  ;;  %v1543_v18 = vpack.c.bf16 %v440_v6, %v433_v1  ;;  %v460_v19 = vsub.f32 %v1900_v50, %v459_v7  ;;  %v2038_v6 = vld [vmem:[%s2026_s6 + $0x10] sm:$0xff] }
  0x1b   : > { %1533 = vmatprep.subr.bf16.mxu1 %v1725_v3  ;;  %1587 = vmatprep.subr.bf16.mxu0 %v1725_v3  ;;  %v467_v20 = vsub.f32 %v1908_v56, %v466_v8  ;;  %v480_v21 = vand.u32 4294901760, %v1917_v62  ;;  %v1546_v22 = vpack.c.bf16 %v454_v15, %v447_v13  ;;  %v1600_v23 = vpack.c.bf16 %v452_v55, %v445_v54  ;;  %v2053_v13 = vld [vmem:[%s2026_s6 + $0x38] sm:$0xff]  ;;  %v2056_v15 = vld [vmem:[%s2026_s6 + $0x40] sm:$0xff] }
  0x1c   : > { %v408_v0 = vand.u32 4294901760, %v407_v52  ;;  %v474_v29 = vsub.f32 %v1915_v61, %v473_v16  ;;  %v487_v30 = vand.u32 4294901760, %v1927_v9  ;;  %v461_v31 = vand.u32 4294901760, %v460_v19  ;;  %v2065_v19 = vld [vmem:[%s2026_s6 + $0x58] sm:$0xff] }
  0x1d   : > { %v468_v32 = vand.u32 4294901760, %v467_v20  ;;  %v481_v36 = vsub.f32 %v1917_v62, %v480_v21  ;;  %v494_v37 = vand.u32 4294901760, %v1929_v10  ;;  %v1950_v39 = vsub.f32 %v324_v51, %v1913_v60  ;;  %v2068_v20 = vld [vmem:[%s2026_s6 + $0x60] sm:$0xff] }
  0x1e   : > { %1535 = vmatpush3.bf16.msra.mxu1 %v1880_v38  ;;  %1589 = vmatpush3.bf16.msra.mxu0 %v1880_v38  ;;  %v1603_v40 = vpack.c.bf16 %v466_v8, %v459_v7  ;;  %v475_v43 = vand.u32 4294901760, %v474_v29  ;;  %v488_v46 = vsub.f32 %v1927_v9, %v487_v30  ;;  %v1606_v48 = vpack.c.bf16 %v480_v21, %v473_v16  ;;  %v2041_v7 = vld [vmem:[%s2026_s6 + $0x18] sm:$0xff]  ;;  %v2044_v8 = vld [vmem:[%s2026_s6 + $0x20] sm:$0xff]  ;;  %v2059_v16 = vld [vmem:[%s2026_s6 + $0x48] sm:$0xff] }
  0x1f   : > { %1536 = vmatprep.subr.bf16.mxu1 %v1725_v3  ;;  %1590 = vmatprep.subr.bf16.mxu0 %v1725_v3  ;;  %v482_v45 = vand.u32 4294901760, %v481_v36  ;;  %v495_v47 = vsub.f32 %v1929_v10, %v494_v37  ;;  %v501_v54 = vand.u32 4294901760, %v1950_v39  ;;  %v1609_v57 = vpack.c.bf16 %v494_v37, %v487_v30  ;;  %v2071_v21 = vld [vmem:[%s2026_s6 + $0x68] sm:$0xff]  ;;  %v2077_v29 = vld [vmem:[%s2026_s6 + $0x78] sm:$0xff]  ;;  %v2080_v30 = vld [vmem:[%s2026_s6 + $0x80] sm:$0xff] }
  0x20   : > { %v489_v51 = vand.u32 4294901760, %v488_v46  ;;  %v2087_v36 = vld [vmem:[%s2026_s6 + $0x88] sm:$0xff]  ;;  %v2090_v37 = vld [vmem:[%s2026_s6 + $0x90] sm:$0xff]  ;;  %v948_v46 = vld [vmem:[%s2026_s6 + $0xa0] sm:$0xff]  ;;  %vm1105_vm3 = vcmask 64512  }
  0x21   : > { %v1552_v52 = vpack.c.bf16 %v482_v45, %v475_v43  ;;  %v496_v53 = vand.u32 4294901760, %v495_v47  ;;  %v502_v58 = vsub.f32 %v1950_v39, %v501_v54  ;;  %v949_v47 = vld [vmem:[%s2026_s6 + $0xa8] sm:$0xff] }
  0x22   : > { %1538 = vmatpush3.bf16.msra.mxu1 %v1898_v49  ;;  %1592 = vmatpush3.bf16.msra.mxu0 %v1898_v49 }
  0x23   : > { %1371 = vmatprep.subr.mxu1 %v1727_v24  ;;  %1458 = vmatprep.subr.mxu0 %v1727_v24  ;;  %v1555_v55 = vpack.c.bf16 %v496_v53, %v489_v51  ;;  %v503_v59 = vand.u32 4294901760, %v502_v58  ;;  %v953_v58 = vld [vmem:[%s2026_s6 + $0xc8] sm:$0xff] }
  0x26   : > { %1372 = vmatpush3.msra.mxu1 %v1913_v60  ;;  %1459 = vmatpush3.msra.mxu0 %v1913_v60 }
  0x27   : > { %1539 = vmatprep.subr.bf16.mxu1 %v1725_v3  ;;  %1593 = vmatprep.subr.bf16.mxu0 %v1725_v3 }
  0x28   : > { %1374 = vmatmul.mubr.f32.vlgmr.msra.gmra.mrb[0].mxu1 %v408_v0  ;;  %1461 = vmatmul.mubr.f32.vlgmr.msra.gmra.mrb[0].mxu0 %v406_v44  ;;  %v1549_v44 = vpack.c.bf16 %v468_v32, %v461_v31  ;;  %v1561_v0 = vpack.c.bf16 %v1874_v35, %v1869_v33 }
  0x29   : > { %1541 = vmatpush3.bf16.msra.mxu1 %v1540_v5  ;;  %1595 = vmatpush3.bf16.msra.mxu0 %v1594_v63  ;;  %v1558_v63 = vpack.c.bf16 %v1855_v27, %v1853_v26  ;;  %v1564_v26 = vpack.c.bf16 %v1886_v42, %v1884_v41  ;;  %v960_v27 = vlaneseq }
  0x2a   : > { %1542 = vmatprep.subr.bf16.mxu1 %v1725_v3  ;;  %1596 = vmatprep.subr.bf16.mxu0 %v1725_v3 }
  0x2b   : > { %1402 = vmatprep.mubr.msk.f32.mxu1 %vm1726_vm1, %v1727_v24  ;;  %1489 = vmatprep.mubr.msk.f32.mxu0 %vm1726_vm1, %v1727_v24 }
  0x2d   : > { %1544 = vmatpush3.bf16.msra.mxu1 %v1543_v18  ;;  %1598 = vmatpush3.bf16.msra.mxu0 %v1597_v12  ;;  %v2050_v12 = vld [vmem:[%s2026_s6 + $0x30] sm:$0xff] }
  0x2e   : > { %1545 = vmatprep.subr.bf16.mxu1 %v1725_v3  ;;  %1599 = vmatprep.subr.bf16.mxu0 %v1725_v3  ;;  %v2062_v18 = vld [vmem:[%s2026_s6 + $0x50] sm:$0xff] }
  0x31   : > { %1547 = vmatpush3.bf16.msra.mxu1 %v1546_v22  ;;  %1601 = vmatpush3.bf16.msra.mxu0 %v1600_v23  ;;  %v2074_v23 = vld [vmem:[%s2026_s6 + $0x70] sm:$0xff] }
  0x32   : > { %1548 = vmatprep.subr.bf16.mxu1 %v1725_v3  ;;  %1602 = vmatprep.subr.bf16.mxu0 %v1725_v3 }
  0x35   : > { %1550 = vmatpush3.bf16.msra.mxu1 %v1549_v44  ;;  %1604 = vmatpush3.bf16.msra.mxu0 %v1603_v40 }
  0x36   : > { %1551 = vmatprep.subr.bf16.mxu1 %v1725_v3  ;;  %1605 = vmatprep.subr.bf16.mxu0 %v1725_v3 }
  0x39   : > { %1553 = vmatpush3.bf16.msra.mxu1 %v1552_v52  ;;  %1607 = vmatpush3.bf16.msra.mxu0 %v1606_v48  ;;  %v950_v48 = vld [vmem:[%s2026_s6 + $0xb0] sm:$0xff] }
  0x3a   : > { %1554 = vmatprep.subr.bf16.mxu1 %v1725_v3  ;;  %1608 = vmatprep.subr.bf16.mxu0 %v1725_v3 }
  0x3d   : > { %1556 = vmatpush3.bf16.msra.mxu1 %v1555_v55  ;;  %1610 = vmatpush3.bf16.msra.mxu0 %v1609_v57  ;;  %v951_v55 = vld [vmem:[%s2026_s6 + $0xb8] sm:$0xff]  ;;  %v952_v57 = vld [vmem:[%s2026_s6 + $0xc0] sm:$0xff] }
  0x3e   : > { %1400 = vmatprep.subr.mxu1 %v1727_v24  ;;  %1487 = vmatprep.subr.mxu0 %v1727_v24 }
  0x41   : > { %1401 = vmatpush3.msra.mxu1 %v503_v59  ;;  %1488 = vmatpush3.msra.mxu0 %v501_v54 }
  0x42   : > { %1557 = vmatprep.subr.bf16.mxu1 %v1725_v3  ;;  %1611 = vmatprep.subr.bf16.mxu0 %v1725_v3 }
  0x43   : > { %1403 = vmatmul.mubr.f32.vlgmr.msra.gmra.mrb[0].mxu1 %v1851_v25  ;;  %1490 = vmatmul.mubr.f32.vlgmr.msra.gmra.mrb[0].mxu0 %v1851_v25 }
  0x44   : > { %1559 = vmatpush3.bf16.msra.mxu1 %v1558_v63  ;;  %1613 = vmatpush3.bf16.msra.mxu0 %v1813_v11  ;;  %v1567_v11 = vpack.c.bf16 %v1908_v56, %v1900_v50  ;;  %v297_v56 = vld [vmem:[%s281_s17 + $0x1] sm:$0x1] }
  0x45   : > { %1560 = vmatprep.subr.bf16.mxu1 %v1725_v3  ;;  %1614 = vmatprep.subr.bf16.mxu0 %v1725_v3 }
  0x46   : > { %1431 = vmatprep.mubr.msk.f32.mxu1 %vm1726_vm1, %v1727_v24  ;;  %1518 = vmatprep.mubr.msk.f32.mxu0 %vm1726_vm1, %v1727_v24 }
  0x48   : > { %1562 = vmatpush3.bf16.msra.mxu1 %v1561_v0  ;;  %1616 = vmatpush3.bf16.msra.mxu0 %v1818_v14  ;;  %v1570_v14 = vpack.c.bf16 %v1917_v62, %v1915_v61 }
  0x49   : > { %1563 = vmatprep.subr.bf16.mxu1 %v1725_v3  ;;  %1617 = vmatprep.subr.bf16.mxu0 %v1725_v3 }
  0x4c   : > { %1565 = vmatpush3.bf16.msra.mxu1 %v1564_v26  ;;  %1619 = vmatpush3.bf16.msra.mxu0 %v1835_v17  ;;  %v1573_v17 = vpack.c.bf16 %v1929_v10, %v1927_v9  ;;  %v2047_v10 = vld [vmem:[%s2026_s6 + $0x28] sm:$0xff] }
  0x4d   : > { %1566 = vmatprep.subr.bf16.mxu1 %v1725_v3  ;;  %1620 = vmatprep.subr.bf16.mxu0 %v1725_v3 }
  0x50   : > { %1568 = vmatpush3.bf16.msra.mxu1 %v1567_v11  ;;  %1622 = vmatpush3.bf16.msra.mxu0 %v1859_v28  ;;  %v961_v28 = vshrl.u32 %v960_v27, 7  ;;  %v956_v27 = vld [vmem:[%s2026_s6 + $0xe0] sm:$0xff] }
  0x51   : > { %1569 = vmatprep.subr.bf16.mxu1 %v1725_v3  ;;  %1623 = vmatprep.subr.bf16.mxu0 %v1725_v3 }
  0x54   : > { %1571 = vmatpush3.bf16.msra.mxu1 %v1570_v14  ;;  %1625 = vmatpush3.bf16.msra.mxu0 %v1880_v38  ;;  %v954_v14 = vld [vmem:[%s2026_s6 + $0xd0] sm:$0xff] }
  0x55   : > { %1572 = vmatprep.subr.bf16.mxu1 %v1725_v3  ;;  %1626 = vmatprep.subr.bf16.mxu0 %v1725_v3  ;;  %v317_v3 = vld [vmem:[%s2282_s4] sm:$0x1] }
  0x58   : > { %1574 = vmatpush3.bf16.msra.mxu1 %v1573_v17  ;;  %1628 = vmatpush3.bf16.msra.mxu0 %v1898_v49  ;;  %v955_v17 = vld [vmem:[%s2026_s6 + $0xd8] sm:$0xff] }
  0x59   : > { %1429 = vmatprep.subr.mxu1 %v1727_v24  ;;  %1516 = vmatprep.subr.mxu0 %v1727_v24  ;;  %v2009_v24 = vsub.s32 0, %v961_v28 }
  0x5c   : > { %1430 = vmatpush3.msra.mxu1 %v1950_v39  ;;  %1517 = vmatpush3.msra.mxu0 %v1913_v60  ;;  %v298_v60 = vmul.f32 0.0009765625, %v297_v56  ;;  %v2093_v39 = vld [vmem:[%s2026_s6 + $0x98] sm:$0xff] }
  0x5d   : > { %1432 = vmatmul.mubr.f32.vlgmr.msra.gmra.mrb[0].mxu1 %v1872_v34  ;;  %1519 = vmatmul.mubr.f32.vlgmr.msra.gmra.mrb[0].mxu0 %v1851_v25  ;;  %v295_v25 = vld [vmem:[%s281_s17] sm:$0x1] }
  0x5e   : > { %v296_v50 = vmul.f32 0.0009765625, %v295_v25 }
  0x60   : > { %v299_v61 = vmul.f32 %v296_v50, %v296_v50  ;;  %v2035_v5 = vrot.slane %v296_v50, %v2009_v24 }
  0x62   : > { %v300_v62 = vsub.f32 %v298_v60, %v299_v61  ;;  %v964_v31 = vsub.f32 %v2029_v2, %v2035_v5  ;;  %v965_v32 = vsub.f32 %v2032_v4, %v2035_v5  ;;  %v966_v40 = vsub.f32 %v2038_v6, %v2035_v5 }
  0x63   : > { %v967_v43 = vsub.f32 %v2041_v7, %v2035_v5  ;;  %v968_v44 = vsub.f32 %v2044_v8, %v2035_v5  ;;  %v969_v45 = vsub.f32 %v2047_v10, %v2035_v5  ;;  %v970_v52 = vsub.f32 %v2050_v12, %v2035_v5 }
  0x64   : > { %v301_v1 = vadd.f32 1e-05, %v300_v62  ;;  %v971_v51 = vsub.f32 %v2053_v13, %v2035_v5  ;;  %v972_v53 = vsub.f32 %v2056_v15, %v2035_v5  ;;  %v973_v54 = vsub.f32 %v2059_v16, %v2035_v5 }
  0x65   : > { %v974_v59 = vsub.f32 %v2062_v18, %v2035_v5  ;;  %v975_v63 = vsub.f32 %v2065_v19, %v2035_v5  ;;  %v976_v0 = vsub.f32 %v2068_v20, %v2035_v5  ;;  %v977_v26 = vsub.f32 %v2071_v21, %v2035_v5 }
  0x66   : > { %1683 = vrsqrt.f32 %v301_v1  ;;  %v978_v28 = vsub.f32 %v2074_v23, %v2035_v5  ;;  %v985_v25 = vsub.f32 %v949_v47, %v2035_v5  ;;  %v986_v50 = vsub.f32 %v950_v48, %v2035_v5 }
  0x67   : > { %v987_v56 = vsub.f32 %v951_v55, %v2035_v5  ;;  %v988_v60 = vsub.f32 %v952_v57, %v2035_v5  ;;  %v989_v61 = vsub.f32 %v953_v58, %v2035_v5  ;;  %v990_v62 = vsub.f32 %v954_v14, %v2035_v5 }
  0x68   : > { %v991_v1 = vsub.f32 %v955_v17, %v2035_v5  ;;  %v992_v2 = vsub.f32 %v956_v27, %v2035_v5 }
  0x70   : > { %v1684_v9 = vpop.eup %1683 }
 0x130   : > { %v644_v33 = vpop.f32.mrb[0].mxu1  ;;  %v924_v35 = vpop.f32.mrb[0].mxu0 }
 0x131   : > { %v1629_v38 = vadd.f32 %v644_v33, %v317_v3  ;;  %v1433_v41 = vpop.f32.mrb[1].mxu1  ;;  %v1520_v42 = vpop.f32.mrb[1].mxu0  ;;  %v979_v3 = vsub.f32 %v2077_v29, %v2035_v5  ;;  %v980_v33 = vsub.f32 %v2080_v30, %v2035_v5 }
 0x132   : > { %v959_v41 = vld [vmem:[%s2026_s6 + $0xf8] sm:$0xff]  ;;  %v981_v42 = vsub.f32 %v2087_v36, %v2035_v5 }
 0x133   : > { %v1630_v49 = vadd.f32 %v1629_v38, %v924_v35  ;;  %v957_v35 = vld [vmem:[%s2026_s6 + $0xe8] sm:$0xff]  ;;  %v958_v38 = vld [vmem:[%s2026_s6 + $0xf0] sm:$0xff]  ;;  %v995_v7 = vsub.f32 %v959_v41, %v2035_v5 }
 0x134   : > { %v993_v4 = vsub.f32 %v957_v35, %v2035_v5  ;;  %v994_v6 = vsub.f32 %v958_v38, %v2035_v5 }
 0x135   : > { %v1036_v34 = vrot.slane %v1630_v49, %v2009_v24  ;;  %v996_v22 = vmul.f32 %v1684_v9, %v1630_v49  ;;  %v983_v49 = vsub.f32 %v2093_v39, %v2035_v5 }
 0x137   : > { %1038 = vrot.lane.b32.xlu0 %v1036_v34, %s1728_s13  ;;  %v1000_v11 = vrot.slane %v996_v22, %v2009_v24  ;;  %v982_v24 = vsub.f32 %v2090_v37, %v2035_v5  ;;  %v984_v34 = vsub.f32 %v948_v46, %v2035_v5 }
 0x139   : > { %v1001_v8 = vmul.f32 %v1000_v11, %v964_v31  ;;  %v1002_v9 = vmul.f32 %v1000_v11, %v965_v32  ;;  %v1003_v10 = vmul.f32 %v1000_v11, %v966_v40  ;;  %v1004_v12 = vmul.f32 %v1000_v11, %v967_v43 }
 0x13a   : > { %v1005_v13 = vmul.f32 %v1000_v11, %v968_v44  ;;  %v1006_v15 = vmul.f32 %v1000_v11, %v969_v45  ;;  %v1007_v16 = vmul.f32 %v1000_v11, %v970_v52  ;;  %v1008_v18 = vmul.f32 %v1000_v11, %v971_v51 }
 0x13b   : > { %v1009_v19 = vmul.f32 %v1000_v11, %v972_v53  ;;  %v1010_v20 = vmul.f32 %v1000_v11, %v973_v54  ;;  %v1011_v21 = vmul.f32 %v1000_v11, %v974_v59  ;;  %v1012_v22 = vmul.f32 %v1000_v11, %v975_v63 }
 0x13c   : > { %v1013_v23 = vmul.f32 %v1000_v11, %v976_v0  ;;  %v1014_v29 = vmul.f32 %v1000_v11, %v977_v26  ;;  %v1015_v30 = vmul.f32 %v1000_v11, %v978_v28  ;;  %v1016_v36 = vmul.f32 %v1000_v11, %v979_v3 }
 0x13d   : > { %v1017_v37 = vmul.f32 %v1000_v11, %v980_v33  ;;  %v1018_v39 = vmul.f32 %v1000_v11, %v981_v42  ;;  %v1019_v46 = vmul.f32 %v1000_v11, %v982_v24  ;;  %v1020_v5 = vmul.f32 %v1000_v11, %v983_v49 }
 0x13e   : > { %v1021_v31 = vmul.f32 %v1000_v11, %v984_v34  ;;  %v1022_v32 = vmul.f32 %v1000_v11, %v985_v25  ;;  %v1023_v40 = vmul.f32 %v1000_v11, %v986_v50  ;;  %v1024_v43 = vmul.f32 %v1000_v11, %v987_v56 }
 0x13f   : > { %v1025_v44 = vmul.f32 %v1000_v11, %v988_v60  ;;  %v1026_v45 = vmul.f32 %v1000_v11, %v989_v61  ;;  %v1027_v47 = vmul.f32 %v1000_v11, %v990_v62  ;;  %v1028_v48 = vmul.f32 %v1000_v11, %v991_v1 }
 0x140   : > { %v1029_v52 = vmul.f32 %v1000_v11, %v992_v2  ;;  %v1030_v51 = vmul.f32 %v1000_v11, %v993_v4  ;;  %v1031_v53 = vmul.f32 %v1000_v11, %v994_v6  ;;  %v1032_v54 = vmul.f32 %v1000_v11, %v995_v7 }
 0x1a9   : > { %v1039_v55 = vpop.permute.xlu0 %1038 }
 0x1aa   : > { %v1041_v57 = vadd.f32 %v1039_v55, %v1001_v8  ;;  %v1042_v58 = vadd.f32 %v1039_v55, %v1002_v9  ;;  %v1043_v59 = vadd.f32 %v1039_v55, %v1003_v10  ;;  %v1044_v63 = vadd.f32 %v1039_v55, %v1004_v12 }
 0x1ab   : > { %v1045_v0 = vadd.f32 %v1039_v55, %v1005_v13  ;;  %v1046_v26 = vadd.f32 %v1039_v55, %v1006_v15  ;;  %v1047_v14 = vadd.f32 %v1039_v55, %v1007_v16  ;;  %v1048_v17 = vadd.f32 %v1039_v55, %v1008_v18 }
 0x1ac   : > { %v1049_v27 = vadd.f32 %v1039_v55, %v1009_v19  ;;  %v1050_v28 = vadd.f32 %v1039_v55, %v1010_v20  ;;  %v1051_v3 = vadd.f32 %v1039_v55, %v1011_v21  ;;  %v1052_v33 = vadd.f32 %v1039_v55, %v1012_v22 }
 0x1ad   : > { %v1053_v35 = vadd.f32 %v1039_v55, %v1013_v23  ;;  %v1054_v38 = vadd.f32 %v1039_v55, %v1014_v29  ;;  %v1055_v41 = vadd.f32 %v1039_v55, %v1015_v30  ;;  %v1056_v42 = vadd.f32 %v1039_v55, %v1016_v36 }
 0x1ae   : > { %v1057_v11 = vadd.f32 %v1039_v55, %v1017_v37  ;;  %v1058_v24 = vadd.f32 %v1039_v55, %v1018_v39  ;;  %v1059_v49 = vadd.f32 %v1039_v55, %v1019_v46  ;;  %v1060_v34 = vadd.f32 %v1039_v55, %v1020_v5 }
 0x1af   : > { %v2156_v25 = vadd.f32 %v1039_v55, %v1021_v31  ;;  %v2158_v50 = vadd.f32 %v1039_v55, %v1022_v32  ;;  %v2160_v56 = vadd.f32 %v1039_v55, %v1023_v40  ;;  %v2162_v60 = vadd.f32 %v1039_v55, %v1024_v43 }
 0x1b0   : > { %v2164_v61 = vadd.f32 %v1039_v55, %v1025_v44  ;;  %v2166_v62 = vadd.f32 %v1039_v55, %v1026_v45  ;;  %v2168_v1 = vadd.f32 %v1039_v55, %v1027_v47  ;;  %v2170_v2 = vadd.f32 %v1039_v55, %v1028_v48 }
 0x1b1   : > { %v2179_v4 = vadd.f32 %v1039_v55, %v1029_v52  ;;  %v2181_v6 = vadd.f32 %v1039_v55, %v1030_v51  ;;  %v2183_v7 = vadd.f32 %v1039_v55, %v1031_v53  ;;  %v2185_v8 = vadd.f32 %v1039_v55, %v1032_v54 }
 0x1b2   : > { %v1073_v9 = vmax.f32 %v1041_v57, 0.0  ;;  %v1074_v10 = vmax.f32 %v1042_v58, 0.0  ;;  %v1075_v12 = vmax.f32 %v1043_v59, 0.0  ;;  %v1076_v13 = vmax.f32 %v1044_v63, 0.0 }
 0x1b3   : > { %v1077_v15 = vmax.f32 %v1045_v0, 0.0  ;;  %v1078_v16 = vmax.f32 %v1046_v26, 0.0  ;;  %v1079_v18 = vmax.f32 %v1047_v14, 0.0  ;;  %v1080_v19 = vmax.f32 %v1048_v17, 0.0 }
 0x1b4   : > { %v1081_v20 = vmax.f32 %v1049_v27, 0.0  ;;  %v1082_v21 = vmax.f32 %v1050_v28, 0.0  ;;  %v1083_v22 = vmax.f32 %v1051_v3, 0.0  ;;  %v1084_v23 = vmax.f32 %v1052_v33, 0.0  ;;  %1106 = vst.msk [vmem:[%s2177_s7] sm:$0xff] %vm1105_vm3, %v1073_v9  ;;  %1107 = vst.msk [vmem:[%s2177_s7 + $0x8] sm:$0xff] %vm1105_vm3, %v1074_v10 }
 0x1b5   : > { %1108 = vst.msk [vmem:[%s2177_s7 + $0x10] sm:$0xff] %vm1105_vm3, %v1075_v12  ;;  %1109 = vst.msk [vmem:[%s2177_s7 + $0x18] sm:$0xff] %vm1105_vm3, %v1076_v13  ;;  %v1085_v29 = vmax.f32 %v1053_v35, 0.0  ;;  %v1086_v30 = vmax.f32 %v1054_v38, 0.0  ;;  %v1087_v36 = vmax.f32 %v1055_v41, 0.0  ;;  %v1088_v37 = vmax.f32 %v1056_v42, 0.0 }
 0x1b6   : > { %1110 = vst.msk [vmem:[%s2177_s7 + $0x20] sm:$0xff] %vm1105_vm3, %v1077_v15  ;;  %1111 = vst.msk [vmem:[%s2177_s7 + $0x28] sm:$0xff] %vm1105_vm3, %v1078_v16  ;;  %v1089_v39 = vmax.f32 %v1057_v11, 0.0  ;;  %v1090_v46 = vmax.f32 %v1058_v24, 0.0  ;;  %v1091_v5 = vmax.f32 %v1059_v49, 0.0  ;;  %v1092_v31 = vmax.f32 %v1060_v34, 0.0 }
 0x1b7   : > { %1112 = vst.msk [vmem:[%s2177_s7 + $0x30] sm:$0xff] %vm1105_vm3, %v1079_v18  ;;  %1113 = vst.msk [vmem:[%s2177_s7 + $0x38] sm:$0xff] %vm1105_vm3, %v1080_v19  ;;  %v1093_v32 = vmax.f32 %v2156_v25, 0.0  ;;  %v1094_v40 = vmax.f32 %v2158_v50, 0.0  ;;  %v1095_v43 = vmax.f32 %v2160_v56, 0.0  ;;  %v1096_v44 = vmax.f32 %v2162_v60, 0.0 }
 0x1b8   : > { %1114 = vst.msk [vmem:[%s2177_s7 + $0x40] sm:$0xff] %vm1105_vm3, %v1081_v20  ;;  %1115 = vst.msk [vmem:[%s2177_s7 + $0x48] sm:$0xff] %vm1105_vm3, %v1082_v21  ;;  %v1097_v45 = vmax.f32 %v2164_v61, 0.0  ;;  %v1098_v47 = vmax.f32 %v2166_v62, 0.0  ;;  %v1099_v48 = vmax.f32 %v2168_v1, 0.0  ;;  %v1100_v52 = vmax.f32 %v2170_v2, 0.0 }
 0x1b9   : > { %1116 = vst.msk [vmem:[%s2177_s7 + $0x50] sm:$0xff] %vm1105_vm3, %v1083_v22  ;;  %1117 = vst.msk [vmem:[%s2177_s7 + $0x58] sm:$0xff] %vm1105_vm3, %v1084_v23  ;;  %v1101_v51 = vmax.f32 %v2179_v4, 0.0  ;;  %v1102_v53 = vmax.f32 %v2181_v6, 0.0  ;;  %v1103_v54 = vmax.f32 %v2183_v7, 0.0  ;;  %v1104_v55 = vmax.f32 %v2185_v8, 0.0 }
 0x1ba   : > { %1118 = vst.msk [vmem:[%s2177_s7 + $0x60] sm:$0xff] %vm1105_vm3, %v1085_v29  ;;  %1119 = vst.msk [vmem:[%s2177_s7 + $0x68] sm:$0xff] %vm1105_vm3, %v1086_v30 }
 0x1bb   : > { %1120 = vst.msk [vmem:[%s2177_s7 + $0x70] sm:$0xff] %vm1105_vm3, %v1087_v36  ;;  %1121 = vst.msk [vmem:[%s2177_s7 + $0x78] sm:$0xff] %vm1105_vm3, %v1088_v37 }
 0x1bc   : > { %1122 = vst.msk [vmem:[%s2177_s7 + $0x80] sm:$0xff] %vm1105_vm3, %v1089_v39  ;;  %1123 = vst.msk [vmem:[%s2177_s7 + $0x88] sm:$0xff] %vm1105_vm3, %v1090_v46 }
 0x1bd   : > { %1124 = vst.msk [vmem:[%s2177_s7 + $0x90] sm:$0xff] %vm1105_vm3, %v1091_v5  ;;  %1125 = vst.msk [vmem:[%s2177_s7 + $0x98] sm:$0xff] %vm1105_vm3, %v1092_v31 }
 0x1be   : > { %1126 = vst.msk [vmem:[%s2177_s7 + $0xa0] sm:$0xff] %vm1105_vm3, %v1093_v32  ;;  %1127 = vst.msk [vmem:[%s2177_s7 + $0xa8] sm:$0xff] %vm1105_vm3, %v1094_v40 }
 0x1bf   : > { %1128 = vst.msk [vmem:[%s2177_s7 + $0xb0] sm:$0xff] %vm1105_vm3, %v1095_v43  ;;  %1129 = vst.msk [vmem:[%s2177_s7 + $0xb8] sm:$0xff] %vm1105_vm3, %v1096_v44 }
 0x1c0   : > { %1130 = vst.msk [vmem:[%s2177_s7 + $0xc0] sm:$0xff] %vm1105_vm3, %v1097_v45  ;;  %1131 = vst.msk [vmem:[%s2177_s7 + $0xc8] sm:$0xff] %vm1105_vm3, %v1098_v47 }
 0x1c1   : > { %1132 = vst.msk [vmem:[%s2177_s7 + $0xd0] sm:$0xff] %vm1105_vm3, %v1099_v48  ;;  %1133 = vst.msk [vmem:[%s2177_s7 + $0xd8] sm:$0xff] %vm1105_vm3, %v1100_v52 }
 0x1c2   : > { %1134 = vst.msk [vmem:[%s2177_s7 + $0xe0] sm:$0xff] %vm1105_vm3, %v1101_v51  ;;  %1135 = vst.msk [vmem:[%s2177_s7 + $0xe8] sm:$0xff] %vm1105_vm3, %v1102_v53 }
 0x1c3   : > { %1136 = vst.msk [vmem:[%s2177_s7 + $0xf0] sm:$0xff] %vm1105_vm3, %v1103_v54  ;;  %1137 = vst.msk [vmem:[%s2177_s7 + $0xf8] sm:$0xff] %vm1105_vm3, %v1104_v55 }
 0x1c4 PF: > { %s15_s22 = sadd.s32 1, %s1723_s22   ;;  %s2284_s18 = smov %s1715_s20 }
 0x1c5   : > { %p12_p7 = scmp.ge.s32.totalorder %s15_s22, 10   ;;  %s2285_s19 = smov %s1719_s21 }
 0x1c6   : > { %s2286_s20 = smov %s2289_s23  ;;  %s2287_s21 = smov %s2293_s24 }
 0x1c7   :  { %14 = sbr.rel (!%p12_p7) target bundleno = 3 (0x3), region = 76 }

// kernel: upsample_conv_in_relu_forward.2
= control target key start
LH: loop header
LB: loop body
LE: loop exit
PB: predicated region body
PF: predicated region fallthrough
CT: control target
= control target key end

     0   :  { %s7560_s0 = inlined_call_operand.vmem [shape: s32[4,10], index: 0, kind: input, shape index: {}]   ;;  %s7561_s1 = inlined_call_operand.vmem [shape: f32[2,16,32,4], index: 1, kind: input, shape index: {}]   ;;  %s7562_s2 = inlined_call_operand.vmem [shape: f32[36,8], index: 2, kind: input, shape index: {}]   ;;  %s7563_s3 = inlined_call_operand.vmem [shape: f32[1,8], index: 3, kind: input, shape index: {}]   ;;  %s7564_s4 = inlined_call_operand.vmem [shape: f32[2,1024,8], index: 4, kind: output, shape index: {0}]   ;;  %s7565_s5 = inlined_call_operand.vmem [shape: f32[2,2,8], index: 5, kind: output, shape index: {1}]  }
   0x1   :  { %s11_s20 = sshll.u32 %s7560_s0, 4  ;;  %s12_s20 = int_to_ptr.vmem [resolvable:$true] %s11_s20 }
   0x2   :  { %s4929_s21 = scalar_lea.vmem %s12_s20, 64  ;;  %p4934_p1 = scmp.lt.s32.totalorder %s12_s20, %s12_s20 }
   0x3   :  { %p4930_p0 = scmp.ne.s32.totalorder %s12_s20, %s4929_s21  ;;  %p4935_p2 = scmp.lt.s32.totalorder %s4929_s21, %s4929_s21 }
   0x5   :  { %p4936_p3 = por %p4935_p2, %p4934_p1 }
   0x7   :  { %p4937_p4 = pnand %p4936_p3, %p4930_p0 }
   0x9   :  { %4940 = shalt.err (!%p4937_p4)  }
   0xa   :  { %s4991_s22 = smov [#allocation4]  }
   0xb   :  { %14 = dma.vmem_to_smem %s12_s20, 64, %s4991_s22, [#allocation3] }
   0xc   :  { %4965 = dma.done.wait [#allocation3], 64 }
   0xd   :  { %4966 = vsyncadd [#allocation3], 4294967232 }
   0xe   :  { %16 = sfence }
   0xf   :  { %s5034_s23 = smov 0   ;;  %s5036_s24 = smov 0  }
  0x10   :  { %s5038_s25 = smov 0   ;;  %s5040_s0 = smov 0  }
  0x11   :  { %s5042_s26 = smov 0  }
  0x12 LB: > { %s31_s27 = sadd.s32 1, %s4977_s25  ;;  %s34_s28 = sadd.s32 1, %s4981_s0  ;;  %s4985_s26 = sphi %s5042_s26, %s22_s26   ;;  %s4981_s0 = sphi %s5040_s0, %s7748_s0   ;;  %s4977_s25 = sphi %s5038_s25, %s7747_s25   ;;  %s4973_s24 = sphi %s5036_s24, %s7746_s24   ;;  %s4969_s23 = sphi %s5034_s23, %s7745_s23  }
  0x13   : > { %p32_p5 = scmp.ge.s32.totalorder %s31_s27, 4  ;;  %p4042_p6 = scmp.ge.s32.totalorder %s4985_s26, 1 }
  0x14   : > { %p186_p7 = scmp.lt.s32.totalorder %s4985_s26, 9 }
  0x15   : > { %s7750_s27 = smov (%p32_p5, %s31_s27), 0  ;;  %s7752_s28 = smov (!%p32_p5, %s34_s28), %s4981_s0 }
  0x16   : > { %p187_p8 = pnand %p4042_p6, %p186_p7  ;;  %p36_p9 = scmp.ge.s32.totalorder %s7752_s28, 2 }
  0x18   : > { %s7754_s28 = smov (%p36_p9, %s7752_s28), 0  ;;  %190 = sbr.rel (%p187_p8) target bundleno = 1134 (0x46e), region = 32 }
  0x1f   : > { %p220_p10 = scmp.lt.s32.totalorder %s4973_s24, 1  ;;  %s4045_s29 = sshll.u32 %s4969_s23, 5 }
  0x20   : > { %p228_p11 = scmp.lt.s32.totalorder %s4045_s29, 127  ;;  %s4987_s19 = smov 0  }
  0x21   : > { %s7756_s24 = smov (!%p220_p10, %s4973_s24), 1 }
  0x22   : > { %s7758_s29 = smov (!%p228_p11, %s4045_s29), 127  ;;  %s4056_s30 = sshll.u32 %s7756_s24, 9 }
  0x23   : > { %s4046_s6 = sshll.u32 %s7756_s24, 7  ;;  %s5070_s9 = scalar_lea.vmem %s7561_s1, %s4056_s30 }
  0x24   : > { %s231_s10 = sadd.s32 %s4046_s6, %s7758_s29  ;;  %s4048_s12 = sshll.u32 %s7756_s24, 1 }
  0x25   : > { %s4047_s11 = sshll.u32 %s231_s10, 3  ;;  %s5080_s18 = scalar_lea.vmem %s7565_s5, %s4048_s12 }
  0x26   : > { %s5075_s15 = scalar_lea.vmem %s7564_s4, %s4047_s11 }
  0x27 LB: >> { %s245_s20 = sshra.s32 %s4989_s19, 7  ;;  %s250_s21 = sand.u32 127, %s4989_s19  ;;  %vm261_vm0 = vcmask 31744   ;;  %s4989_s19 = sphi %s4987_s19, %s244_s19  }
  0x28   : >> { %s247_s22 = sadd.s32 %s4969_s23, %s245_s20  ;;  %s4051_s6 = sshll.u32 %s4989_s19, 5 }
  0x29   : >> { %s4049_s24 = sshll.u32 %s247_s22, 7  ;;  %s260_s10 = scalar_lea.vmem [#allocation2], %s4051_s6 }
  0x2a   : >> { %s251_s29 = sadd.s32 %s4049_s24, %s250_s21  ;;  %s244_s19 = sadd.s32 1, %s4989_s19  }
  0x2b   : >> { %s252_s30 = sld [smem:[#allocation4 + %s251_s29]]  ;;  %p241_p12 = scmp.ge.s32.totalorder %s244_s19, 10  }
  0x2c   : > { %vm366_vm1 = vcmask (%p241_p12), 1040384   ;;  %vm537_vm2 = vcmask (%p241_p12), 1046528   ;;  %vm706_vm3 = vcmask (%p241_p12), 1045504   ;;  %s4993_s11 = smov (%p241_p12), 8   ;;  %s4994_s12 = smov (%p241_p12), 12   ;;  %vm1864_vm4 = vcmask (%p241_p12), 1043456  }
  0x2d   : > { %s4995_s13 = smov (%p241_p12), 16   ;;  %s4996_s14 = smov (%p241_p12), 20   ;;  %vm1524_vm5 = vcmask (%p241_p12), 64512   ;;  %vm1557_vm6 = vcmask (%p241_p12), 97280   ;;  %vm1590_vm7 = vcmask (%p241_p12), 130048   ;;  %vm1623_vm8 = vcmask (%p241_p12), 162816  }
  0x2e   : > { %s4997_s16 = smov (%p241_p12), 24   ;;  %s4998_s6 = smov (%p241_p12), 28   ;;  %vm1656_vm9 = vcmask (%p241_p12), 195584   ;;  %vm1689_vm10 = vcmask (%p241_p12), 228352   ;;  %vm1722_vm11 = vcmask (%p241_p12), 261120   ;;  %vm1767_vm12 = vcmask (%p241_p12), 293888  }
  0x2f   : > { %243 = sbr.rel (!%p241_p12) target bundleno = 39 (0x27), region = 87  ;;  %p4053_p13 = scmp.ne.s32.totalorder (%p241_p12), %s4969_s23, 0 }
  0x31   : >> { %s4050_s7 = sshll.u32 %s252_s30, 5 }
  0x32   : >> { %s254_s8 = scalar_lea.vmem %s5070_s9, %s4050_s7  ;;  %s4992_s9 = smov (%p241_p12), 4  }
  0x33   : >> { %v255_v0 = vld [vmem:[%s254_s8] sm:$0xff]  ;;  %v256_v1 = vld [vmem:[%s254_s8 + $0x8] sm:$0xff]  ;;  %v257_v2 = vld [vmem:[%s254_s8 + $0x10] sm:$0xff] }
  0x34   : >> { %262 = vst.msk [vmem:[%s260_s10] sm:$0xff] %vm261_vm0, %v255_v0  ;;  %263 = vst.msk [vmem:[%s260_s10 + $0x8] sm:$0xff] %vm261_vm0, %v256_v1  ;;  %v258_v3 = vld [vmem:[%s254_s8 + $0x18] sm:$0xff] }
  0x35   : >> { %264 = vst.msk [vmem:[%s260_s10 + $0x10] sm:$0xff] %vm261_vm0, %v257_v2  ;;  %265 = vst.msk [vmem:[%s260_s10 + $0x18] sm:$0xff] %vm261_vm0, %v258_v3  ;;  %s4999_s10 = smov (%p241_p12), 32  }
  0x36   : > { %vm3735_vm13 = vcmask (!%p4053_p13), 58368  }
  0x3c   : > { %v267_v4 = vld [vmem:[#allocation2 + $0x8] sm:$0xff]  ;;  %v268_v5 = vld [vmem:[#allocation2 + $0x10] sm:$0xff]  ;;  %v269_v6 = vld [vmem:[#allocation2 + $0x18] sm:$0xff] }
  0x3d   : > { %v368_v7 = vrot.slane %v267_v4, 7  ;;  %v370_v8 = vrot.slane %v268_v5, 7  ;;  %v372_v9 = vrot.slane %v269_v6, 7  ;;  %v266_v10 = vld [vmem:[#allocation2] sm:$0xff]  ;;  %v481_v11 = vrot.slane %v269_v6, 5  ;;  %v271_v15 = vld [vmem:[#allocation2 + $0x28] sm:$0xff] }
  0x3e   : > { %v270_v12 = vld [vmem:[#allocation2 + $0x20] sm:$0xff]  ;;  %v316_v13 = vrot.slane %v266_v10, 1  ;;  %v367_v14 = vrot.slane %v266_v10, 7  ;;  %v272_v21 = vld [vmem:[#allocation2 + $0x30] sm:$0xff]  ;;  %v375_v22 = vrot.slane %v271_v15, 7  ;;  %v273_v31 = vld [vmem:[#allocation2 + $0x38] sm:$0xff] }
  0x3f   : > { %v374_v16 = vrot.slane %v270_v12, 7  ;;  %v317_v17 = vrot.slane %v270_v12, 1  ;;  %v5089_v18 = vsel %vm366_vm1, %v368_v7, %v370_v8  ;;  %v5092_v19 = vsel %vm366_vm1, %v370_v8, %v372_v9  ;;  %v274_v32 = vld [vmem:[#allocation2 + $0x40] sm:$0xff]  ;;  %v275_v36 = vld [vmem:[#allocation2 + $0x48] sm:$0xff]  ;;  %v276_v37 = vld [vmem:[#allocation2 + $0x50] sm:$0xff] }
  0x40   : > { %v5095_v20 = vsel %vm366_vm1, %v372_v9, %v481_v11  ;;  %v541_v23 = vrot.slane %v5089_v18, 1  ;;  %v543_v24 = vrot.slane %v5092_v19, 1  ;;  %v5100_v25 = vsel %vm366_vm1, %v367_v14, %v368_v7  ;;  %v277_v46 = vld [vmem:[#allocation2 + $0x58] sm:$0xff]  ;;  %v278_v63 = vld [vmem:[#allocation2 + $0x60] sm:$0xff]  ;;  %v279_v0 = vld [vmem:[#allocation2 + $0x68] sm:$0xff] }
  0x41   : > { %v5103_v26 = vsel %vm366_vm1, %v316_v13, %v367_v14  ;;  %v539_v28 = vrot.slane %v5100_v25, 1  ;;  %v545_v29 = vrot.slane %v5095_v20, 1  ;;  %v5109_v30 = vsel %vm366_vm1, %v374_v16, %v375_v22  ;;  %v280_v1 = vld [vmem:[#allocation2 + $0x70] sm:$0xff]  ;;  %v281_v13 = vld [vmem:[#allocation2 + $0x78] sm:$0xff] }
  0x42   : > { %v538_v27 = vrot.slane %v5103_v26, 1  ;;  %v544_v33 = vsel %vm537_vm2, %v541_v23, %v543_v24  ;;  %v377_v34 = vrot.slane %v272_v21, 7  ;;  %v5113_v35 = vsel %vm366_vm1, %v317_v17, %v374_v16 }
  0x43   : > { %614 = vrot.lane.b32.xlu1 %v544_v33, %s4992_s9  ;;  %v546_v39 = vsel %vm537_vm2, %v543_v24, %v545_v29  ;;  %v542_v40 = vsel %vm537_vm2, %v539_v28, %v541_v23  ;;  %v548_v41 = vrot.slane %v5109_v30, 1  ;;  %v379_v43 = vrot.slane %v273_v31, 7 }
  0x44   : > { %v540_v38 = vsel %vm537_vm2, %v538_v27, %v539_v28  ;;  %v5122_v42 = vsel %vm366_vm1, %v375_v22, %v377_v34  ;;  %v482_v44 = vrot.slane %v273_v31, 5  ;;  %v381_v45 = vrot.slane %v274_v32, 7 }
  0x45   : > { %610 = vrot.lane.b32.xlu0 %v540_v38, %s4992_s9  ;;  %v550_v47 = vrot.slane %v5122_v42, 1  ;;  %v547_v48 = vrot.slane %v5113_v35, 1  ;;  %v382_v49 = vrot.slane %v275_v36, 7  ;;  %v384_v50 = vrot.slane %v276_v37, 7 }
  0x46   : > { %v5127_v51 = vsel %vm366_vm1, %v377_v34, %v379_v43  ;;  %v5130_v52 = vsel %vm366_vm1, %v379_v43, %v482_v44  ;;  %v318_v53 = vrot.slane %v274_v32, 1  ;;  %v386_v54 = vrot.slane %v277_v46, 7 }
  0x47   : > { %616 = vrot.lane.b32.xlu1 %v546_v39, %s4992_s9  ;;  %v5135_v55 = vsel %vm537_vm2, %v548_v41, %v550_v47  ;;  %v552_v56 = vrot.slane %v5127_v51, 1  ;;  %v554_v57 = vrot.slane %v5130_v52, 1  ;;  %v5140_v58 = vsel %vm366_vm1, %v381_v45, %v382_v49 }
  0x48   : > { %v5143_v59 = vsel %vm537_vm2, %v547_v48, %v548_v41  ;;  %v5146_v60 = vsel %vm366_vm1, %v382_v49, %v384_v50  ;;  %v5149_v61 = vsel %vm366_vm1, %v318_v53, %v381_v45  ;;  %v483_v62 = vrot.slane %v277_v46, 5 }
  0x49   : > { %612 = vrot.lane.b32.xlu0 %v542_v40, %s4992_s9  ;;  %v557_v2 = vrot.slane %v5140_v58, 1  ;;  %v5155_v3 = vsel %vm366_vm1, %v384_v50, %v386_v54  ;;  %v5160_v4 = vsel %vm537_vm2, %v552_v56, %v554_v57  ;;  %v5163_v5 = vsel %vm537_vm2, %v550_v47, %v552_v56 }
  0x4a   : > { %v559_v6 = vrot.slane %v5146_v60, 1  ;;  %v556_v7 = vrot.slane %v5149_v61, 1  ;;  %v5168_v8 = vsel %vm366_vm1, %v386_v54, %v483_v62  ;;  %v388_v9 = vrot.slane %v278_v63, 7 }
  0x4b   : > { %620 = vrot.lane.b32.xlu1 %v5135_v55, %s4992_s9  ;;  %v389_v10 = vrot.slane %v279_v0, 7  ;;  %v391_v11 = vrot.slane %v280_v1, 7  ;;  %v319_v12 = vrot.slane %v278_v63, 1  ;;  %v561_v15 = vrot.slane %v5155_v3, 1 }
  0x4c   : > { %v5175_v14 = vsel %vm537_vm2, %v557_v2, %v559_v6  ;;  %v563_v16 = vrot.slane %v5168_v8, 1  ;;  %v5180_v17 = vsel %vm537_vm2, %v556_v7, %v557_v2  ;;  %v393_v24 = vrot.slane %v281_v13, 7  ;;  %v5297_v7 = vld [vmem:[%s7562_s2 + $0x18] sm:$0xff] }
  0x4d   : > { %618 = vrot.lane.b32.xlu0 %v5143_v59, %s4992_s9  ;;  %v5183_v21 = vsel %vm366_vm1, %v388_v9, %v389_v10  ;;  %v5186_v22 = vsel %vm366_vm1, %v389_v10, %v391_v11  ;;  %v5189_v23 = vsel %vm366_vm1, %v319_v12, %v388_v9  ;;  %v5201_v31 = vsel %vm537_vm2, %v559_v6, %v561_v15  ;;  %v5292_v6 = vld [vmem:[%s7562_s2 + $0x10] sm:$0xff] }
  0x4e   : > { %7640 = vst [vmem:[#allocation6_spill] sm:$0xff] %v5186_v22  ;;  %v5196_v27 = vsel %vm537_vm2, %v561_v15, %v563_v16  ;;  %v566_v28 = vrot.slane %v5183_v21, 1  ;;  %v568_v29 = vrot.slane %v5186_v22, 1  ;;  %v565_v32 = vrot.slane %v5189_v23, 1  ;;  %7645 = vst [vmem:[#allocation11_spill] sm:$0xff] %v5292_v6 }
  0x4f   : > { %624 = vrot.lane.b32.xlu1 %v5160_v4, %s4992_s9  ;;  %v5205_v33 = vsel %vm366_vm1, %v391_v11, %v393_v24  ;;  %v707_v36 = vrot.slane %v5103_v26, 2  ;;  %v708_v37 = vrot.slane %v5100_v25, 2  ;;  %v484_v38 = vrot.slane %v281_v13, 5  ;;  %7646 = vst [vmem:[#allocation12_spill] sm:$0xff] %v5297_v7  ;;  %v1759_v15 = vld [vmem:[%s7562_s2 + $0x20] sm:$0xf] }
  0x50   : > { %7641 = vst [vmem:[#allocation7_spill] sm:$0xff] %v5205_v33  ;;  %v5212_v34 = vsel %vm537_vm2, %v566_v28, %v568_v29  ;;  %v5217_v39 = vsel %vm537_vm2, %v565_v32, %v566_v28  ;;  %v570_v40 = vrot.slane %v5205_v33, 1  ;;  %v710_v46 = vrot.slane %v5089_v18, 2 }
  0x51   : > { %622 = vrot.lane.b32.xlu0 %v5163_v5, %s4992_s9  ;;  %v5221_v41 = vsel %vm366_vm1, %v393_v24, %v484_v38  ;;  %v709_v44 = vsel %vm706_vm3, %v707_v36, %v708_v37  ;;  %v716_v49 = vrot.slane %v5113_v35, 2  ;;  %v717_v50 = vrot.slane %v5109_v30, 2 }
  0x52   : > { %v572_v43 = vrot.slane %v5221_v41, 1  ;;  %v5230_v45 = vsel %vm537_vm2, %v568_v29, %v570_v40  ;;  %v711_v48 = vsel %vm706_vm3, %v708_v37, %v710_v46  ;;  %v719_v54 = vrot.slane %v5122_v42, 2 }
  0x53   : > { %628 = vrot.lane.b32.xlu1 %v5175_v14, %s4992_s9  ;;  %v5250_v53 = vsel %vm706_vm3, %v716_v49, %v717_v50  ;;  %v712_v56 = vrot.slane %v5092_v19, 2  ;;  %v7567_v9 = vand.u32 4294901760, %v5292_v6  ;;  %v7566_v10 = vand.u32 4294901760, %v5297_v7 }
  0x54   : > { %v5234_v47 = vsel %vm537_vm2, %v570_v40, %v572_v43  ;;  %v720_v57 = vsel %vm706_vm3, %v717_v50, %v719_v54  ;;  %v725_v12 = vrot.slane %v5149_v61, 2  ;;  %v726_v13 = vrot.slane %v5140_v58, 2 }
  0x55   : > { %626 = vrot.lane.b32.xlu0 %v5180_v17, %s4992_s9  ;;  %v713_v62 = vsel %vm706_vm3, %v710_v46, %v712_v56  ;;  %v5311_v11 = vpack.c.bf16 %v7566_v10, %v7567_v9  ;;  %v5323_v16 = vsel %vm1864_vm4, %v1759_v15, 0  ;;  %v728_v28 = vrot.slane %v5146_v60, 2  ;;  %v5480_v9 = vld [vmem:[#allocation2 + $0x90] sm:$0xff] }
  0x56   : > { %7648 = vst [vmem:[#allocation14_spill] sm:$0xff] %v5323_v16  ;;  %v5329_v24 = vand.u32 4294901760, %v5323_v16  ;;  %v727_v29 = vsel %vm706_vm3, %v725_v12, %v726_v13  ;;  %v721_v32 = vrot.slane %v5127_v51, 2  ;;  %v723_v36 = vrot.slane %v5130_v52, 2 }
  0x57   : > { %632 = vrot.lane.b32.xlu1 %v5196_v27, %s4992_s9  ;;  %7647 = vst [vmem:[#allocation13_spill] sm:$0xff] %v5311_v11  ;;  %v730_v52 = vrot.slane %v5155_v3, 2  ;;  %v737_v46 = vrot.slane %v5186_v22, 2 }
  0x58   : > { %7649 = vst [vmem:[#allocation15_spill] sm:$0xff] %v5329_v24  ;;  %v722_v37 = vsel %vm706_vm3, %v719_v54, %v721_v32  ;;  %v724_v38 = vsel %vm706_vm3, %v721_v32, %v723_v36  ;;  %v741_v32 = vrot.slane %v5221_v41, 2 }
  0x59   : > { %630 = vrot.lane.b32.xlu0 %v5201_v31, %s4992_s9  ;;  %v5370_v40 = vsel %vm706_vm3, %v728_v28, %v730_v52 }
  0x5b   : > { %636 = vrot.lane.b32.xlu1 %v5212_v34, %s4992_s9 }
  0x5d   : > { %634 = vrot.lane.b32.xlu0 %v5217_v39, %s4992_s9 }
  0x5f   : > { %779 = vrot.lane.b32.xlu1 %v709_v44, %s4993_s11 }
  0x61   : > { %638 = vrot.lane.b32.xlu0 %v5230_v45, %s4992_s9 }
  0x63   : > { %876 = vrot.lane.b32.xlu1 %v5113_v35, %s4994_s12 }
  0x65   : > { %781 = vrot.lane.b32.xlu0 %v711_v48, %s4993_s11 }
  0x67   : > { %982 = vrot.lane.b32.xlu1 %v5143_v59, %s4995_s13  ;;  %v714_v59 = vrot.slane %v5095_v20, 2  ;;  %v5275_v20 = vld [vmem:[%s7562_s2 + $0x8] sm:$0xff] }
  0x68   : > { %7643 = vst [vmem:[#allocation9_spill] sm:$0xff] %v5275_v20  ;;  %v7568_v1 = vand.u32 4294901760, %v5275_v20 }
  0x69   : > { %878 = vrot.lane.b32.xlu0 %v5109_v30, %s4994_s12  ;;  %v715_v63 = vsel %vm706_vm3, %v712_v56, %v714_v59 }
  0x6b   : > { %1087 = vrot.lane.b32.xlu1 %v5250_v53, %s4996_s14 }
  0x6d   : > { %984 = vrot.lane.b32.xlu0 %v5135_v55, %s4995_s13  ;;  %v5270_v55 = vld [vmem:[%s7562_s2] sm:$0xff] }
  0x6e   : > { %7642 = vst [vmem:[#allocation8_spill] sm:$0xff] %v5270_v55  ;;  %v7569_v0 = vand.u32 4294901760, %v5270_v55 }
  0x6f   : > { %1089 = vrot.lane.b32.xlu1 %v720_v57, %s4996_s14 }
  0x70   : > { %v5285_v2 = vpack.c.bf16 %v7568_v1, %v7569_v0  ;;  %v7577_v1 = vrot.slane %v5480_v9, 7 }
  0x71   : > { %783 = vrot.lane.b32.xlu0 %v713_v62, %s4993_s11 }
  0x72   : > { %7644 = vst [vmem:[#allocation10_spill] sm:$0xff] %v5285_v2  ;;  %4652 = vmatprep.subr.bf16.mxu0 %v5285_v2  ;;  %4628 = vmatprep.subr.bf16.mxu1 %v5285_v2 }
  0x73   : > { %785 = vrot.lane.b32.xlu1 %v715_v63, %s4993_s11  ;;  %4654 = vmatpush3.bf16.msra.mxu0 %v5285_v2 }
  0x74   : > { %4630 = vmatpush3.bf16.msra.mxu1 %v5285_v2  ;;  %4656 = vmatprep.subr.bf16.mxu0 %v5311_v11 }
  0x75   : > { %1184 = vrot.lane.b32.xlu0 %v5149_v61, %s4997_s16  ;;  %4632 = vmatprep.subr.bf16.mxu1 %v5311_v11 }
  0x77   : > { %1186 = vrot.lane.b32.xlu1 %v5140_v58, %s4997_s16  ;;  %4658 = vmatpush3.bf16.msra.mxu0 %v5311_v11 }
  0x78   : > { %4634 = vmatpush3.bf16.msra.mxu1 %v5311_v11  ;;  %4461 = vmatprep.subr.mxu0 %v5329_v24 }
  0x79   : > { %880 = vrot.lane.b32.xlu0 %v5122_v42, %s4994_s12  ;;  %4287 = vmatprep.subr.mxu1 %v5329_v24 }
  0x7b   : > { %882 = vrot.lane.b32.xlu1 %v5127_v51, %s4994_s12  ;;  %4462 = vmatpush3.msra.mxu0 %v5329_v24 }
  0x7c   : > { %4288 = vmatpush3.msra.mxu1 %v5329_v24 }
  0x7d   : > { %1290 = vrot.lane.b32.xlu0 %v5180_v17, %s4998_s6 }
  0x7f   : > { %1292 = vrot.lane.b32.xlu1 %v5175_v14, %s4998_s6 }
  0x81   : > { %986 = vrot.lane.b32.xlu0 %v5163_v5, %s4995_s13  ;;  %v729_v5 = vsel %vm706_vm3, %v726_v13, %v728_v28  ;;  %v739_v28 = vrot.slane %v5205_v33, 2 }
  0x83   : > { %988 = vrot.lane.b32.xlu1 %v5160_v4, %s4995_s13  ;;  %v732_v4 = vrot.slane %v5168_v8, 2  ;;  %v5467_v36 = vsel %vm706_vm3, %v737_v46, %v739_v28 }
  0x85   : > { %1395 = vrot.lane.b32.xlu0 %v727_v29, %s4999_s10  ;;  %v5377_v43 = vsel %vm706_vm3, %v730_v52, %v732_v4 }
  0x87   : > { %1397 = vrot.lane.b32.xlu1 %v729_v5, %s4999_s10 }
  0x89   : > { %1091 = vrot.lane.b32.xlu0 %v722_v37, %s4996_s14 }
  0x8b   : > { %1093 = vrot.lane.b32.xlu1 %v724_v38, %s4996_s14 }
  0x8d   : > { %787 = vrot.lane.b32.xlu0 %v5250_v53, %s4993_s11 }
  0x8f   : > { %789 = vrot.lane.b32.xlu1 %v720_v57, %s4993_s11 }
  0x91   : > { %1188 = vrot.lane.b32.xlu0 %v5146_v60, %s4997_s16 }
  0x93   : > { %1190 = vrot.lane.b32.xlu1 %v5155_v3, %s4997_s16 }
  0x95   : > { %884 = vrot.lane.b32.xlu0 %v5149_v61, %s4994_s12 }
  0x97   : > { %886 = vrot.lane.b32.xlu1 %v5140_v58, %s4994_s12 }
  0x99   : > { %1294 = vrot.lane.b32.xlu0 %v5201_v31, %s4998_s6 }
  0x9b   : > { %1296 = vrot.lane.b32.xlu1 %v5196_v27, %s4998_s6 }
  0x9d   : > { %990 = vrot.lane.b32.xlu0 %v5180_v17, %s4995_s13  ;;  %v735_v17 = vrot.slane %v5183_v21, 2 }
  0x9f   : > { %992 = vrot.lane.b32.xlu1 %v5175_v14, %s4995_s13  ;;  %v734_v14 = vrot.slane %v5189_v23, 2  ;;  %v5418_v53 = vsel %vm706_vm3, %v735_v17, %v737_v46 }
  0xa1   : > { %1399 = vrot.lane.b32.xlu0 %v5370_v40, %s4999_s10  ;;  %v5409_v49 = vsel %vm706_vm3, %v734_v14, %v735_v17  ;;  %v282_v14 = vld [vmem:[#allocation2 + $0x80] sm:$0xff] }
  0xa2   : > { %v320_v17 = vrot.slane %v282_v14, 1  ;;  %v395_v46 = vrot.slane %v282_v14, 7 }
  0xa3   : > { %1401 = vrot.lane.b32.xlu1 %v5377_v43, %s4999_s10 }
  0xa5   : > { %1095 = vrot.lane.b32.xlu0 %v727_v29, %s4996_s14 }
  0xa7   : > { %1097 = vrot.lane.b32.xlu1 %v729_v5, %s4996_s14 }
  0xa9   : > { %791 = vrot.lane.b32.xlu0 %v722_v37, %s4993_s11 }
  0xab   : > { %793 = vrot.lane.b32.xlu1 %v724_v38, %s4993_s11  ;;  %v5474_v38 = vsel %vm706_vm3, %v739_v28, %v741_v32  ;;  %v5487_v32 = vsel %vm366_vm1, %v320_v17, %v395_v46 }
  0xac   : > { %v743_v7 = vrot.slane %v5487_v32, 2 }
  0xad   : > { %1192 = vrot.lane.b32.xlu0 %v5189_v23, %s4997_s16 }
  0xaf   : > { %1194 = vrot.lane.b32.xlu1 %v5183_v21, %s4997_s16 }
  0xb1   : > { %888 = vrot.lane.b32.xlu0 %v5146_v60, %s4994_s12 }
  0xb3   : > { %890 = vrot.lane.b32.xlu1 %v5155_v3, %s4994_s12 }
  0xb5   : > { %1298 = vrot.lane.b32.xlu0 %v5217_v39, %s4998_s6  ;;  %v5395_v8 = vpop.permute.xlu1 %614 }
  0xb7   : > { %v5399_v44 = vpop.permute.xlu0 %610  ;;  %1300 = vrot.lane.b32.xlu1 %v5212_v34, %s4998_s6 }
  0xb8   : > { %v1492_v20 = vsel %vm261_vm0, %v5103_v26, %v5399_v44 }
  0xb9   : > { %994 = vrot.lane.b32.xlu0 %v5201_v31, %s4995_s13  ;;  %v5406_v48 = vpop.permute.xlu1 %616 }
  0xbb   : > { %v5411_v50 = vpop.permute.xlu0 %612  ;;  %996 = vrot.lane.b32.xlu1 %v5196_v27, %s4995_s13 }
  0xbc   : > { %v1493_v26 = vsel %vm261_vm0, %v5100_v25, %v5411_v50 }
  0xbd   : > { %1403 = vrot.lane.b32.xlu0 %v5409_v49, %s4999_s10  ;;  %v5420_v54 = vpop.permute.xlu1 %620 }
  0xbf   : > { %v5422_v31 = vpop.permute.xlu0 %618  ;;  %1405 = vrot.lane.b32.xlu1 %v5418_v53, %s4999_s10 }
  0xc1   : > { %1099 = vrot.lane.b32.xlu0 %v5370_v40, %s4996_s14  ;;  %v5428_v56 = vpop.permute.xlu1 %624 }
  0xc3   : > { %v5430_v57 = vpop.permute.xlu0 %622  ;;  %1101 = vrot.lane.b32.xlu1 %v5377_v43, %s4996_s14 }
  0xc5   : > { %795 = vrot.lane.b32.xlu0 %v727_v29, %s4993_s11  ;;  %v5435_v27 = vpop.permute.xlu1 %628 }
  0xc7   : > { %v5437_v59 = vpop.permute.xlu0 %626  ;;  %797 = vrot.lane.b32.xlu1 %v729_v5, %s4993_s11 }
  0xc9   : > { %1196 = vrot.lane.b32.xlu0 %v5186_v22, %s4997_s16  ;;  %v5442_v62 = vpop.permute.xlu1 %632 }
  0xcb   : > { %v5444_v63 = vpop.permute.xlu0 %630  ;;  %1198 = vrot.lane.b32.xlu1 %v5205_v33, %s4997_s16 }
  0xcd   : > { %892 = vrot.lane.b32.xlu0 %v5189_v23, %s4994_s12  ;;  %v5450_v12 = vpop.permute.xlu1 %636 }
  0xcf   : > { %v5452_v13 = vpop.permute.xlu0 %634  ;;  %894 = vrot.lane.b32.xlu1 %v5183_v21, %s4994_s12 }
  0xd1   : > { %1302 = vrot.lane.b32.xlu0 %v5230_v45, %s4998_s6  ;;  %v780_v15 = vpop.permute.xlu1 %779 }
  0xd3   : > { %v5459_v29 = vpop.permute.xlu0 %638  ;;  %1304 = vrot.lane.b32.xlu1 %v5234_v47, %s4998_s6 }
  0xd4   : > { %7650 = vst [vmem:[#allocation16_spill] sm:$0xff] %v5459_v29 }
  0xd5   : > { %998 = vrot.lane.b32.xlu0 %v5217_v39, %s4995_s13  ;;  %v877_v5 = vpop.permute.xlu1 %876  ;;  %v283_v39 = vld [vmem:[#allocation2 + $0x88] sm:$0xff] }
  0xd6   : > { %v396_v10 = vrot.slane %v283_v39, 7 }
  0xd7   : > { %v782_v37 = vpop.permute.xlu0 %781  ;;  %1000 = vrot.lane.b32.xlu1 %v5212_v34, %s4995_s13 }
  0xd8   : > { %v5493_v14 = vsel %vm366_vm1, %v395_v46, %v396_v10  ;;  %v5506_v11 = vsel %vm366_vm1, %v396_v10, %v7577_v1 }
  0xd9   : > { %1407 = vrot.lane.b32.xlu0 %v5467_v36, %s4999_s10  ;;  %v983_v52 = vpop.permute.xlu1 %982  ;;  %v575_v17 = vrot.slane %v5493_v14, 1 }
  0xdb   : > { %v879_v4 = vpop.permute.xlu0 %878  ;;  %1409 = vrot.lane.b32.xlu1 %v5474_v38, %s4999_s10 }
  0xdd   : > { %1103 = vrot.lane.b32.xlu0 %v5409_v49, %s4996_s14  ;;  %v1088_v41 = vpop.permute.xlu1 %1087 }
  0xdf   : > { %v985_v34 = vpop.permute.xlu0 %984  ;;  %1105 = vrot.lane.b32.xlu1 %v5418_v53, %s4996_s14 }
  0xe1   : > { %799 = vrot.lane.b32.xlu0 %v5370_v40, %s4993_s11  ;;  %v1090_v28 = vpop.permute.xlu1 %1089  ;;  %v574_v40 = vrot.slane %v5487_v32, 1 }
  0xe3   : > { %v5490_v0 = vpop.permute.xlu0 %783  ;;  %801 = vrot.lane.b32.xlu1 %v5377_v43, %s4993_s11  ;;  %v7581_v43 = vrot.slane %v5506_v11, 1  ;;  %v5514_v16 = vsel %vm537_vm2, %v574_v40, %v575_v17  ;;  %v744_v40 = vrot.slane %v5493_v14, 2 }
  0xe5   : > { %1200 = vrot.lane.b32.xlu0 %v5487_v32, %s4997_s16  ;;  %v5499_v39 = vpop.permute.xlu1 %785  ;;  %v5525_v10 = vsel %vm537_vm2, %v575_v17, %v7581_v43  ;;  %v746_v17 = vrot.slane %v5506_v11, 2  ;;  %v1525_v43 = vsel %vm1524_vm5, %v1492_v20, %v780_v15  ;;  %v1526_v20 = vsel %vm1524_vm5, %v1493_v26, %v782_v37 }
  0xe6   : > { %v1559_v25 = vsel %vm1557_vm6, %v1526_v20, %v879_v4 }
  0xe7   : > { %v1185_v2 = vpop.permute.xlu0 %1184  ;;  %1202 = vrot.lane.b32.xlu1 %v5493_v14, %s4997_s16  ;;  %v5559_v44 = vsel %vm706_vm3, %v744_v40, %v746_v17  ;;  %v1592_v15 = vsel %vm1590_vm7, %v1559_v25, %v985_v34 }
  0xe9   : > { %896 = vrot.lane.b32.xlu0 %v5186_v22, %s4994_s12  ;;  %v1187_v46 = vpop.permute.xlu1 %1186  ;;  %v1558_v22 = vsel %vm1557_vm6, %v1525_v43, %v877_v5  ;;  %v285_v43 = vld [vmem:[#allocation2 + $0x98] sm:$0xff] }
  0xeb   : > { %v5516_v24 = vpop.permute.xlu0 %880  ;;  %898 = vrot.lane.b32.xlu1 %v5205_v33, %s4994_s12  ;;  %v5541_v33 = vsel %vm706_vm3, %v743_v7, %v744_v40 }
  0xed   : > { %1306 = vrot.lane.b32.xlu0 %v5514_v16, %s4998_s6  ;;  %v5527_v1 = vpop.permute.xlu1 %882 }
  0xef   : > { %v1291_v6 = vpop.permute.xlu0 %1290  ;;  %1308 = vrot.lane.b32.xlu1 %v5525_v10, %s4998_s6 }
  0xf1   : > { %1002 = vrot.lane.b32.xlu0 %v5230_v45, %s4995_s13  ;;  %v1293_v55 = vpop.permute.xlu1 %1292  ;;  %v1591_v45 = vsel %vm1590_vm7, %v1558_v22, %v983_v52  ;;  %v1625_v52 = vsel %vm1623_vm8, %v1592_v15, %v1090_v28 }
  0xf2   : > { %v1624_v7 = vsel %vm1623_vm8, %v1591_v45, %v1088_v41  ;;  %v1658_v4 = vsel %vm1656_vm9, %v1625_v52, %v1187_v46  ;;  %v400_v45 = vrot.slane %v285_v43, 7 }
  0xf3   : > { %v5544_v29 = vpop.permute.xlu0 %986  ;;  %1004 = vrot.lane.b32.xlu1 %v5234_v47, %s4995_s13  ;;  %v1657_v22 = vsel %vm1656_vm9, %v1624_v7, %v1185_v2  ;;  %v1691_v34 = vsel %vm1689_vm10, %v1658_v4, %v1293_v55 }
  0xf4   : > { %v1690_v5 = vsel %vm1689_vm10, %v1657_v22, %v1291_v6  ;;  %v485_v22 = vrot.slane %v285_v43, 5 }
  0xf5   : > { %1411 = vrot.lane.b32.xlu0 %v5541_v33, %s4999_s10  ;;  %v5563_v50 = vpop.permute.xlu1 %988 }
  0xf7   : > { %v1396_v37 = vpop.permute.xlu0 %1395  ;;  %1413 = vrot.lane.b32.xlu1 %v5559_v44, %s4999_s10 }
  0xf8   : > { %v1723_v41 = vsel %vm1722_vm11, %v1690_v5, %v1396_v37  ;;  %v7654_v37 = vrot.slane %v5480_v9, 7  ;;  %v515_v9 = vsel %vm366_vm1, %v400_v45, %v485_v22 }
  0xf9   : > { %v1769_v2 = vsel %vm1767_vm12, %v1723_v41, 0  ;;  %1107 = vrot.lane.b32.xlu0 %v5467_v36, %s4996_s14  ;;  %v1398_v6 = vpop.permute.xlu1 %1397 }
  0xfa   : > { %v5576_v40 = vand.u32 4294901760, %v1769_v2  ;;  %v1724_v28 = vsel %vm1722_vm11, %v1691_v34, %v1398_v6  ;;  %v5598_v52 = vsel %vm366_vm1, %v7654_v37, %v400_v45 }
  0xfb   : > { %v1092_v26 = vpop.permute.xlu0 %1091  ;;  %v1772_v7 = vsel %vm1767_vm12, %v1724_v28, 0  ;;  %1109 = vrot.lane.b32.xlu1 %v5474_v38, %s4996_s14  ;;  %v581_v28 = vrot.slane %v515_v9, 1 }
  0xfc   : > { %v5580_v20 = vsub.f32 %v1769_v2, %v5576_v40  ;;  %v5585_v46 = vand.u32 4294901760, %v1772_v7  ;;  %v579_v2 = vrot.slane %v5598_v52, 1 }
  0xfd   : > { %803 = vrot.lane.b32.xlu0 %v5409_v49, %s4993_s11  ;;  %v1094_v55 = vpop.permute.xlu1 %1093 }
  0xfe   : > { %7651 = vst [vmem:[#allocation17_spill] sm:$0xff] %v5580_v20  ;;  %7652 = vst [vmem:[#allocation18_spill] sm:$0xff] %v5585_v46  ;;  %v1940_v25 = vand.u32 4294901760, %v5580_v20  ;;  %v5591_v15 = vsub.f32 %v1772_v7, %v5585_v46  ;;  %v5627_v22 = vsel %vm537_vm2, %v579_v2, %v581_v28 }
  0xff   : > { %v5593_v5 = vpop.permute.xlu0 %787  ;;  %805 = vrot.lane.b32.xlu1 %v5418_v53, %s4993_s11 }
 0x100   : > { %7653 = vst [vmem:[#allocation19_spill] sm:$0xff] %v5591_v15  ;;  %4463 = vmatprep.mubr.f32.mxu0 %v1940_v25  ;;  %v1941_v49 = vsub.f32 %v5580_v20, %v1940_v25  ;;  %v1950_v41 = vand.u32 4294901760, %v5591_v15  ;;  %v7655_v25 = vrot.slane %v5506_v11, 1 }
 0x101   : > { %1204 = vrot.lane.b32.xlu0 %v5506_v11, %s4997_s16  ;;  %v5606_v43 = vpop.permute.xlu1 %789 }
 0x102   : > { %v1942_v4 = vand.u32 4294901760, %v1941_v49  ;;  %4464 = vmatmul.mubr.f32.vlgmr.msra.gmra.mrb[0].mxu0 %v1950_v41  ;;  %v1951_v6 = vsub.f32 %v5591_v15, %v1950_v41  ;;  %v5618_v37 = vsel %vm537_vm2, %v7655_v25, %v579_v2  ;;  %v748_v41 = vrot.slane %v5598_v52, 2 }
 0x103   : > { %v1189_v34 = vpop.permute.xlu0 %1188  ;;  %1206 = vrot.lane.b32.xlu1 %v5598_v52, %s4997_s16 }
 0x104   : > { %4289 = vmatprep.mubr.f32.mxu1 %v1942_v4  ;;  %v1952_v53 = vand.u32 4294901760, %v1951_v6  ;;  %v1494_v6 = vsel %vm261_vm0, %v5089_v18, %v5395_v8  ;;  %v5644_v25 = vsel %vm706_vm3, %v746_v17, %v748_v41  ;;  %v1495_v18 = vsel %vm261_vm0, %v5092_v19, %v5406_v48 }
 0x105   : > { %900 = vrot.lane.b32.xlu0 %v5487_v32, %s4994_s12  ;;  %v1191_v7 = vpop.permute.xlu1 %1190  ;;  %v1527_v2 = vsel %vm1524_vm5, %v1494_v6, %v5490_v0  ;;  %v1528_v0 = vsel %vm1524_vm5, %v1495_v18, %v5499_v39  ;;  %v287_v6 = vld [vmem:[#allocation2 + $0xa8] sm:$0xff] }
 0x106   : > { %4290 = vmatmul.mubr.f32.vlgmr.msra.gmra.mrb[0].mxu1 %v1952_v53  ;;  %v750_v53 = vrot.slane %v515_v9, 2  ;;  %v1560_v15 = vsel %vm1557_vm6, %v1527_v2, %v5516_v24  ;;  %v1561_v19 = vsel %vm1557_vm6, %v1528_v0, %v5527_v1 }
 0x107   : > { %v5620_v45 = vpop.permute.xlu0 %884  ;;  %902 = vrot.lane.b32.xlu1 %v5493_v14, %s4994_s12  ;;  %v1593_v8 = vsel %vm1590_vm7, %v1560_v15, %v5544_v29  ;;  %v286_v15 = vld [vmem:[#allocation2 + $0xa0] sm:$0xff]  ;;  %v1594_v9 = vsel %vm1590_vm7, %v1561_v19, %v5563_v50 }
 0x108   : > { %v1626_v17 = vsel %vm1623_vm8, %v1593_v8, %v1092_v26  ;;  %v5663_v24 = vsel %vm706_vm3, %v748_v41, %v750_v53  ;;  %v1627_v2 = vsel %vm1623_vm8, %v1594_v9, %v1094_v55  ;;  %v321_v53 = vrot.slane %v286_v15, 1 }
 0x109   : > { %1310 = vrot.lane.b32.xlu0 %v5618_v37, %s4998_s6  ;;  %v5629_v49 = vpop.permute.xlu1 %886  ;;  %v1659_v48 = vsel %vm1656_vm9, %v1626_v17, %v1189_v34  ;;  %v1660_v1 = vsel %vm1656_vm9, %v1627_v2, %v1191_v7  ;;  %v402_v50 = vrot.slane %v286_v15, 7  ;;  %v403_v55 = vrot.slane %v287_v6, 7 }
 0x10b   : > { %v1295_v4 = vpop.permute.xlu0 %1294  ;;  %1312 = vrot.lane.b32.xlu1 %v5627_v22, %s4998_s6 }
 0x10c   : > { %v1692_v39 = vsel %vm1689_vm10, %v1659_v48, %v1295_v4 }
 0x10d   : > { %1006 = vrot.lane.b32.xlu0 %v5514_v16, %s4995_s13  ;;  %v1297_v28 = vpop.permute.xlu1 %1296 }
 0x10e   : > { %v1693_v4 = vsel %vm1689_vm10, %v1660_v1, %v1297_v28  ;;  %v5696_v28 = vsel %vm366_vm1, %v321_v53, %v402_v50 }
 0x10f   : > { %v5648_v20 = vpop.permute.xlu0 %990  ;;  %1008 = vrot.lane.b32.xlu1 %v5525_v10, %s4995_s13 }
 0x111   : > { %1415 = vrot.lane.b32.xlu0 %v5644_v25, %s4999_s10  ;;  %v5668_v29 = vpop.permute.xlu1 %992 }
 0x113   : > { %v1400_v26 = vpop.permute.xlu0 %1399  ;;  %1417 = vrot.lane.b32.xlu1 %v5663_v24, %s4999_s10 }
 0x114   : > { %v1725_v41 = vsel %vm1722_vm11, %v1692_v39, %v1400_v26  ;;  %v5700_v39 = vsel %vm366_vm1, %v402_v50, %v403_v55 }
 0x115   : > { %v1775_v34 = vsel %vm1767_vm12, %v1725_v41, 0  ;;  %1111 = vrot.lane.b32.xlu0 %v5541_v33, %s4996_s14  ;;  %v1402_v8 = vpop.permute.xlu1 %1401  ;;  %v583_v41 = vrot.slane %v5696_v28, 1  ;;  %v584_v1 = vrot.slane %v5700_v39, 1 }
 0x116   : > { %v5682_v18 = vand.u32 4294901760, %v1775_v34  ;;  %v1726_v0 = vsel %vm1722_vm11, %v1693_v4, %v1402_v8 }
 0x117   : > { %v1096_v17 = vpop.permute.xlu0 %1095  ;;  %v1778_v7 = vsel %vm1767_vm12, %v1726_v0, 0  ;;  %807 = vrot.lane.b32.xlu1 %v5467_v36, %s4993_s11  ;;  %v5710_v36 = vld [vmem:[#allocation2 + $0xb0] sm:$0xff] }
 0x118   : > { %7656 = vst [vmem:[#allocation20_spill] sm:$0xff] %v5682_v18  ;;  %v5686_v19 = vsub.f32 %v1775_v34, %v5682_v18  ;;  %v5691_v48 = vand.u32 4294901760, %v1778_v7  ;;  %v7588_v8 = vrot.slane %v5710_v36, 7 }
 0x119   : > { %640 = vrot.lane.b32.xlu0 %v5234_v47, %s4992_s9  ;;  %v1098_v15 = vpop.permute.xlu1 %1097 }
 0x11a   : > { %7657 = vst [vmem:[#allocation21_spill] sm:$0xff] %v5686_v19  ;;  %7658 = vst [vmem:[#allocation22_spill] sm:$0xff] %v5691_v48  ;;  %v1960_v9 = vand.u32 4294901760, %v5686_v19  ;;  %v5703_v26 = vsub.f32 %v1778_v7, %v5691_v48  ;;  %v5726_v7 = vsel %vm537_vm2, %v583_v41, %v584_v1 }
 0x11b   : > { %v5705_v6 = vpop.permute.xlu0 %791  ;;  %1208 = vrot.lane.b32.xlu1 %v5696_v28, %s4997_s16 }
 0x11c   : > { %7659 = vst [vmem:[#allocation23_spill] sm:$0xff] %v5703_v26  ;;  %4466 = vmatprep.mubr.f32.mxu0 %v1960_v9  ;;  %v1961_v47 = vsub.f32 %v5686_v19, %v1960_v9  ;;  %v1970_v2 = vand.u32 4294901760, %v5703_v26 }
 0x11d   : > { %1113 = vrot.lane.b32.xlu0 %v5559_v44, %s4996_s14  ;;  %v5717_v34 = vpop.permute.xlu1 %793 }
 0x11e   : > { %v1962_v53 = vand.u32 4294901760, %v1961_v47  ;;  %4467 = vmatmul.mubr.f32.gmra.mrb[2].mxu0 %v1970_v2  ;;  %v1971_v4 = vsub.f32 %v5703_v26, %v1970_v2  ;;  %v5733_v47 = vsel %vm366_vm1, %v403_v55, %v7588_v8  ;;  %v753_v2 = vrot.slane %v5700_v39, 2 }
 0x11f   : > { %v1193_v50 = vpop.permute.xlu0 %1192  ;;  %904 = vrot.lane.b32.xlu1 %v5506_v11, %s4994_s12  ;;  %v1496_v55 = vsel %vm261_vm0, %v5113_v35, %v5422_v31  ;;  %v1497_v35 = vsel %vm261_vm0, %v5109_v30, %v5420_v54 }
 0x120   : > { %4292 = vmatprep.mubr.f32.mxu1 %v1962_v53  ;;  %v1972_v0 = vand.u32 4294901760, %v1971_v4  ;;  %v586_v53 = vrot.slane %v5733_v47, 1  ;;  %v1529_v8 = vsel %vm1524_vm5, %v1496_v55, %v5593_v5  ;;  %v1530_v5 = vsel %vm1524_vm5, %v1497_v35, %v5606_v43 }
 0x121   : > { %809 = vrot.lane.b32.xlu0 %v5474_v38, %s4993_s11  ;;  %v1195_v9 = vpop.permute.xlu1 %1194  ;;  %v752_v38 = vrot.slane %v5696_v28, 2  ;;  %v1562_v18 = vsel %vm1557_vm6, %v1529_v8, %v5620_v45  ;;  %v755_v45 = vrot.slane %v5733_v47, 2  ;;  %v1563_v8 = vsel %vm1557_vm6, %v1530_v5, %v5629_v49  ;;  %v289_v5 = vld [vmem:[#allocation2 + $0xb8] sm:$0xff] }
 0x122   : > { %4293 = vmatmul.mubr.f32.gmra.mrb[2].mxu1 %v1972_v0  ;;  %v5759_v48 = vsel %vm537_vm2, %v584_v1, %v586_v53  ;;  %v1595_v31 = vsel %vm1590_vm7, %v1562_v18, %v5648_v20  ;;  %v1596_v20 = vsel %vm1590_vm7, %v1563_v8, %v5668_v29  ;;  %v407_v8 = vrot.slane %v289_v5, 7 }
 0x123   : > { %v5728_v19 = vpop.permute.xlu0 %888  ;;  %1314 = vrot.lane.b32.xlu1 %v5726_v7, %s4998_s6  ;;  %v5752_v0 = vsel %vm706_vm3, %v752_v38, %v753_v2  ;;  %v1628_v1 = vsel %vm1623_vm8, %v1595_v31, %v1096_v17  ;;  %v1629_v17 = vsel %vm1623_vm8, %v1596_v20, %v1098_v15  ;;  %v5797_v29 = vsel %vm706_vm3, %v753_v2, %v755_v45 }
 0x124   : > { %v1661_v30 = vsel %vm1656_vm9, %v1628_v1, %v1193_v50  ;;  %v1662_v55 = vsel %vm1656_vm9, %v1629_v17, %v1195_v9 }
 0x125   : > { %1210 = vrot.lane.b32.xlu0 %v5700_v39, %s4997_s16  ;;  %v5741_v41 = vpop.permute.xlu1 %890 }
 0x127   : > { %v1299_v4 = vpop.permute.xlu0 %1298  ;;  %1010 = vrot.lane.b32.xlu1 %v5618_v37, %s4995_s13 }
 0x128   : > { %v1694_v18 = vsel %vm1689_vm10, %v1661_v30, %v1299_v4 }
 0x129   : > { %906 = vrot.lane.b32.xlu0 %v5598_v52, %s4994_s12  ;;  %v1301_v26 = vpop.permute.xlu1 %1300 }
 0x12a   : > { %v1695_v50 = vsel %vm1689_vm10, %v1662_v55, %v1301_v26  ;;  %v7662_v55 = vrot.slane %v5710_v36, 7  ;;  %v486_v36 = vrot.slane %v289_v5, 5  ;;  %v1498_v5 = vsel %vm261_vm0, %v5122_v42, %v5430_v57 }
 0x12b   : > { %v5763_v46 = vpop.permute.xlu0 %994  ;;  %1419 = vrot.lane.b32.xlu1 %v5752_v0, %s4999_s10 }
 0x12d   : > { %1316 = vrot.lane.b32.xlu0 %v5759_v48, %s4998_s6  ;;  %v5781_v54 = vpop.permute.xlu1 %996 }
 0x12f   : > { %v1404_v43 = vpop.permute.xlu0 %1403  ;;  %1012 = vrot.lane.b32.xlu1 %v5627_v22, %s4995_s13 }
 0x130   : > { %v1727_v38 = vsel %vm1722_vm11, %v1694_v18, %v1404_v43 }
 0x131   : > { %v1781_v49 = vsel %vm1767_vm12, %v1727_v38, 0  ;;  %642 = vrot.lane.b32.xlu0 %v5514_v16, %s4992_s9  ;;  %v1406_v4 = vpop.permute.xlu1 %1405 }
 0x132   : > { %v5800_v15 = vand.u32 4294901760, %v1781_v49  ;;  %v1728_v35 = vsel %vm1722_vm11, %v1695_v50, %v1406_v4 }
 0x133   : > { %v1100_v31 = vpop.permute.xlu0 %1099  ;;  %v1784_v1 = vsel %vm1767_vm12, %v1728_v35, 0  ;;  %1421 = vrot.lane.b32.xlu1 %v5797_v29, %s4999_s10 }
 0x134   : > { %v5804_v9 = vsub.f32 %v1781_v49, %v5800_v15  ;;  %v5809_v16 = vand.u32 4294901760, %v1784_v1  ;;  %v5830_v49 = vsel %vm366_vm1, %v7662_v55, %v407_v8 }
 0x135   : > { %1115 = vrot.lane.b32.xlu0 %v5644_v25, %s4996_s14  ;;  %v1102_v26 = vpop.permute.xlu1 %1101 }
 0x136   : > { %7660 = vst [vmem:[#allocation24_spill] sm:$0xff] %v5804_v9  ;;  %v1980_v2 = vand.u32 4294901760, %v5804_v9  ;;  %v5815_v30 = vsub.f32 %v1784_v1, %v5809_v16 }
 0x137   : > { %v5817_v20 = vpop.permute.xlu0 %795  ;;  %811 = vrot.lane.b32.xlu1 %v5541_v33, %s4993_s11 }
 0x138   : > { %7661 = vst [vmem:[#allocation25_spill] sm:$0xff] %v5815_v30  ;;  %4469 = vmatprep.mubr.f32.mxu0 %v1980_v2  ;;  %v1981_v18 = vsub.f32 %v5804_v9, %v1980_v2  ;;  %v1990_v43 = vand.u32 4294901760, %v5815_v30 }
 0x139   : > { %644 = vrot.lane.b32.xlu0 %v5525_v10, %s4992_s9  ;;  %v5825_v17 = vpop.permute.xlu1 %797  ;;  %v588_v10 = vrot.slane %v5830_v49, 1 }
 0x13a   : > { %v1982_v38 = vand.u32 4294901760, %v1981_v18  ;;  %4470 = vmatmul.mubr.f32.gmra.mrb[4].mxu0 %v1990_v43  ;;  %v1991_v4 = vsub.f32 %v5815_v30, %v1990_v43 }
 0x13b   : > { %v1197_v50 = vpop.permute.xlu0 %1196  ;;  %1212 = vrot.lane.b32.xlu1 %v5733_v47, %s4997_s16  ;;  %v5847_v2 = vsel %vm537_vm2, %v586_v53, %v588_v10  ;;  %v1531_v53 = vsel %vm1524_vm5, %v1498_v5, %v5705_v6 }
 0x13c   : > { %4295 = vmatprep.mubr.f32.mxu1 %v1982_v38  ;;  %v1992_v33 = vand.u32 4294901760, %v1991_v4  ;;  %v516_v38 = vsel %vm366_vm1, %v407_v8, %v486_v36  ;;  %v1564_v8 = vsel %vm1557_vm6, %v1531_v53, %v5728_v19  ;;  %v1499_v36 = vsel %vm261_vm0, %v5127_v51, %v5428_v56 }
 0x13d   : > { %1117 = vrot.lane.b32.xlu0 %v5663_v24, %s4996_s14  ;;  %v1199_v35 = vpop.permute.xlu1 %1198  ;;  %v590_v4 = vrot.slane %v516_v38, 1  ;;  %v1597_v42 = vsel %vm1590_vm7, %v1564_v8, %v5763_v46  ;;  %v1532_v57 = vsel %vm1524_vm5, %v1499_v36, %v5717_v34 }
 0x13e   : > { %4296 = vmatmul.mubr.f32.gmra.mrb[4].mxu1 %v1992_v33  ;;  %v1630_v6 = vsel %vm1623_vm8, %v1597_v42, %v1100_v31  ;;  %v1565_v51 = vsel %vm1557_vm6, %v1532_v57, %v5741_v41 }
 0x13f   : > { %v5838_v1 = vpop.permute.xlu0 %892  ;;  %908 = vrot.lane.b32.xlu1 %v5696_v28, %s4994_s12  ;;  %v1663_v56 = vsel %vm1656_vm9, %v1630_v6, %v1197_v50  ;;  %v5889_v5 = vsel %vm537_vm2, %v588_v10, %v590_v4  ;;  %v1598_v34 = vsel %vm1590_vm7, %v1565_v51, %v5781_v54  ;;  %v759_v10 = vrot.slane %v516_v38, 2  ;;  %v290_v51 = vld [vmem:[#allocation2 + $0xc0] sm:$0xff] }
 0x140   : > { %v1631_v8 = vsel %vm1623_vm8, %v1598_v34, %v1102_v26 }
 0x141   : > { %813 = vrot.lane.b32.xlu0 %v5559_v44, %s4993_s11  ;;  %v5849_v18 = vpop.permute.xlu1 %894  ;;  %v757_v44 = vrot.slane %v5830_v49, 2  ;;  %v1664_v41 = vsel %vm1656_vm9, %v1631_v8, %v1199_v35  ;;  %v409_v8 = vrot.slane %v290_v51, 7 }
 0x143   : > { %v1303_v43 = vpop.permute.xlu0 %1302  ;;  %1318 = vrot.lane.b32.xlu1 %v5847_v2, %s4998_s6  ;;  %v5881_v19 = vsel %vm706_vm3, %v755_v45, %v757_v44  ;;  %v5917_v38 = vsel %vm706_vm3, %v757_v44, %v759_v10  ;;  %v322_v44 = vrot.slane %v290_v51, 1 }
 0x144   : > { %v1696_v31 = vsel %vm1689_vm10, %v1663_v56, %v1303_v43 }
 0x145   : > { %1214 = vrot.lane.b32.xlu0 %v5830_v49, %s4997_s16  ;;  %v1305_v55 = vpop.permute.xlu1 %1304 }
 0x146   : > { %v1697_v54 = vsel %vm1689_vm10, %v1664_v41, %v1305_v55 }
 0x147   : > { %v5864_v33 = vpop.permute.xlu0 %998  ;;  %1014 = vrot.lane.b32.xlu1 %v5726_v7, %s4995_s13 }
 0x149   : > { %910 = vrot.lane.b32.xlu0 %v5700_v39, %s4994_s12  ;;  %v5886_v46 = vpop.permute.xlu1 %1000 }
 0x14b   : > { %v1408_v53 = vpop.permute.xlu0 %1407  ;;  %1423 = vrot.lane.b32.xlu1 %v5881_v19, %s4999_s10 }
 0x14c   : > { %v1729_v45 = vsel %vm1722_vm11, %v1696_v31, %v1408_v53  ;;  %v291_v31 = vld [vmem:[#allocation2 + $0xc8] sm:$0xff] }
 0x14d   : > { %v1787_v50 = vsel %vm1767_vm12, %v1729_v45, 0  ;;  %1320 = vrot.lane.b32.xlu0 %v5889_v5, %s4998_s6  ;;  %v1410_v43 = vpop.permute.xlu1 %1409 }
 0x14e   : > { %v5903_v4 = vand.u32 4294901760, %v1787_v50  ;;  %v1730_v26 = vsel %vm1722_vm11, %v1697_v54, %v1410_v43 }
 0x14f   : > { %v1104_v36 = vpop.permute.xlu0 %1103  ;;  %v1790_v57 = vsel %vm1767_vm12, %v1730_v26, 0  ;;  %1016 = vrot.lane.b32.xlu1 %v5759_v48, %s4995_s13  ;;  %v5939_v26 = vsel %vm366_vm1, %v322_v44, %v409_v8 }
 0x150   : > { %v5907_v42 = vsub.f32 %v1787_v50, %v5903_v4  ;;  %v5912_v35 = vand.u32 4294901760, %v1790_v57  ;;  %v410_v50 = vrot.slane %v291_v31, 7  ;;  %v5948_v31 = vld [vmem:[#allocation2 + $0xd0] sm:$0xff] }
 0x151   : > { %646 = vrot.lane.b32.xlu0 %v5618_v37, %s4992_s9  ;;  %v1106_v55 = vpop.permute.xlu1 %1105 }
 0x152   : > { %7663 = vst [vmem:[#allocation26_spill] sm:$0xff] %v5907_v42  ;;  %v2000_v6 = vand.u32 4294901760, %v5907_v42  ;;  %v5921_v56 = vsub.f32 %v1790_v57, %v5912_v35 }
 0x153   : > { %v5923_v34 = vpop.permute.xlu0 %799  ;;  %1425 = vrot.lane.b32.xlu1 %v5917_v38, %s4999_s10 }
 0x154   : > { %7664 = vst [vmem:[#allocation27_spill] sm:$0xff] %v5921_v56  ;;  %4472 = vmatprep.mubr.f32.mxu0 %v2000_v6  ;;  %v2001_v53 = vsub.f32 %v5907_v42, %v2000_v6  ;;  %v2010_v37 = vand.u32 4294901760, %v5921_v56  ;;  %v5942_v6 = vsel %vm366_vm1, %v409_v8, %v410_v50  ;;  %v1500_v8 = vsel %vm261_vm0, %v5149_v61, %v5437_v59 }
 0x155   : > { %1119 = vrot.lane.b32.xlu0 %v5752_v0, %s4996_s14  ;;  %v5931_v45 = vpop.permute.xlu1 %801  ;;  %v7665_v42 = vrot.slane %v5948_v31, 7  ;;  %v1501_v61 = vsel %vm261_vm0, %v5140_v58, %v5435_v27 }
 0x156   : > { %v2002_v41 = vand.u32 4294901760, %v2001_v53  ;;  %4473 = vmatmul.mubr.f32.gmra.mrb[6].mxu0 %v2010_v37  ;;  %v2011_v54 = vsub.f32 %v5921_v56, %v2010_v37 }
 0x157   : > { %v1201_v10 = vpop.permute.xlu0 %1200  ;;  %815 = vrot.lane.b32.xlu1 %v5644_v25, %s4993_s11  ;;  %v593_v25 = vrot.slane %v5942_v6, 1  ;;  %v5976_v30 = vsel %vm366_vm1, %v410_v50, %v7665_v42  ;;  %v762_v42 = vrot.slane %v5942_v6, 2 }
 0x158   : > { %4298 = vmatprep.mubr.f32.mxu1 %v2002_v41  ;;  %v2012_v43 = vand.u32 4294901760, %v2011_v54  ;;  %v1533_v54 = vsel %vm1524_vm5, %v1500_v8, %v5817_v20  ;;  %v7600_v50 = vrot.slane %v5976_v30, 1 }
 0x159   : > { %648 = vrot.lane.b32.xlu0 %v5627_v22, %s4992_s9  ;;  %v1203_v57 = vpop.permute.xlu1 %1202  ;;  %v592_v22 = vrot.slane %v5939_v26, 1  ;;  %v1566_v44 = vsel %vm1557_vm6, %v1533_v54, %v5838_v1  ;;  %v761_v1 = vrot.slane %v5939_v26, 2 }
 0x15a   : > { %4299 = vmatmul.mubr.f32.gmra.mrb[6].mxu1 %v2012_v43  ;;  %v1599_v59 = vsel %vm1590_vm7, %v1566_v44, %v5864_v33 }
 0x15b   : > { %v5944_v51 = vpop.permute.xlu0 %896  ;;  %1216 = vrot.lane.b32.xlu1 %v5939_v26, %s4997_s16  ;;  %v5965_v41 = vsel %vm537_vm2, %v592_v22, %v593_v25  ;;  %v1632_v20 = vsel %vm1623_vm8, %v1599_v59, %v1104_v36  ;;  %v6010_v54 = vsel %vm706_vm3, %v761_v1, %v762_v42  ;;  %v7599_v1 = vrot.slane %v5976_v30, 2 }
 0x15c   : > { %v1665_v27 = vsel %vm1656_vm9, %v1632_v20, %v1201_v10 }
 0x15d   : > { %1121 = vrot.lane.b32.xlu0 %v5797_v29, %s4996_s14  ;;  %v5954_v53 = vpop.permute.xlu1 %898 }
 0x15f   : > { %v1307_v37 = vpop.permute.xlu0 %1306  ;;  %912 = vrot.lane.b32.xlu1 %v5733_v47, %s4994_s12 }
 0x160   : > { %v1698_v36 = vsel %vm1689_vm10, %v1665_v27, %v1307_v37 }
 0x161   : > { %817 = vrot.lane.b32.xlu0 %v5663_v24, %s4993_s11  ;;  %v1309_v43 = vpop.permute.xlu1 %1308  ;;  %v1534_v24 = vsel %vm1524_vm5, %v1501_v61, %v5825_v17  ;;  %v6018_v61 = vsel %vm537_vm2, %v593_v25, %v7600_v50  ;;  %v1503_v50 = vsel %vm261_vm0, %v5155_v3, %v5442_v62 }
 0x162   : > { %v1567_v58 = vsel %vm1557_vm6, %v1534_v24, %v5849_v18 }
 0x163   : > { %v5971_v56 = vpop.permute.xlu0 %1002  ;;  %1322 = vrot.lane.b32.xlu1 %v5965_v41, %s4998_s6  ;;  %v1600_v17 = vsel %vm1590_vm7, %v1567_v58, %v5886_v46 }
 0x164   : > { %v1633_v44 = vsel %vm1623_vm8, %v1600_v17, %v1106_v55 }
 0x165   : > { %1218 = vrot.lane.b32.xlu0 %v5942_v6, %s4997_s16  ;;  %v5995_v33 = vpop.permute.xlu1 %1004  ;;  %v1666_v18 = vsel %vm1656_vm9, %v1633_v44, %v1203_v57  ;;  %v6047_v44 = vsel %vm706_vm3, %v762_v42, %v7599_v1 }
 0x166   : > { %v1699_v46 = vsel %vm1689_vm10, %v1666_v18, %v1309_v43 }
 0x167   : > { %v1412_v22 = vpop.permute.xlu0 %1411  ;;  %1018 = vrot.lane.b32.xlu1 %v5847_v2, %s4995_s13 }
 0x168   : > { %v1731_v8 = vsel %vm1722_vm11, %v1698_v36, %v1412_v22 }
 0x169   : > { %v1793_v10 = vsel %vm1767_vm12, %v1731_v8, 0  ;;  %914 = vrot.lane.b32.xlu0 %v5830_v49, %s4994_s12  ;;  %v1414_v55 = vpop.permute.xlu1 %1413 }
 0x16a   : > { %v6013_v37 = vand.u32 4294901760, %v1793_v10  ;;  %v1732_v57 = vsel %vm1722_vm11, %v1699_v46, %v1414_v55  ;;  %v293_v55 = vld [vmem:[#allocation2 + $0xd8] sm:$0xff] }
 0x16b   : > { %v1108_v59 = vpop.permute.xlu0 %1107  ;;  %v1796_v20 = vsel %vm1767_vm12, %v1732_v57, 0  ;;  %1427 = vrot.lane.b32.xlu1 %v6010_v54, %s4999_s10  ;;  %v487_v1 = vrot.slane %v293_v55, 5 }
 0x16c   : > { %v6022_v24 = vsub.f32 %v1793_v10, %v6013_v37  ;;  %v6027_v43 = vand.u32 4294901760, %v1796_v20 }
 0x16d   : > { %1324 = vrot.lane.b32.xlu0 %v6018_v61, %s4998_s6  ;;  %v1110_v25 = vpop.permute.xlu1 %1109 }
 0x16e   : > { %7666 = vst [vmem:[#allocation28_spill] sm:$0xff] %v6022_v24  ;;  %v2020_v58 = vand.u32 4294901760, %v6022_v24  ;;  %v6034_v27 = vsub.f32 %v1796_v20, %v6027_v43  ;;  %v414_v20 = vrot.slane %v293_v55, 7 }
 0x16f   : > { %v6036_v17 = vpop.permute.xlu0 %803  ;;  %1020 = vrot.lane.b32.xlu1 %v5889_v5, %s4995_s13 }
 0x170   : > { %7667 = vst [vmem:[#allocation29_spill] sm:$0xff] %v6034_v27  ;;  %4475 = vmatprep.mubr.f32.mxu0 %v2020_v58  ;;  %v2021_v36 = vsub.f32 %v6022_v24, %v2020_v58  ;;  %v2030_v22 = vand.u32 4294901760, %v6034_v27 }
 0x171   : > { %650 = vrot.lane.b32.xlu0 %v5726_v7, %s4992_s9  ;;  %v6049_v8 = vpop.permute.xlu1 %805 }
 0x172   : > { %v2022_v18 = vand.u32 4294901760, %v2021_v36  ;;  %4476 = vmatmul.mubr.f32.gmra.mrb[8].mxu0 %v2030_v22  ;;  %v2031_v46 = vsub.f32 %v6034_v27, %v2030_v22  ;;  %v7668_v36 = vrot.slane %v5948_v31, 7  ;;  %v7680_v27 = vld [vmem:[#allocation6_spill] sm:$0xff] }
 0x173   : > { %v1205_v10 = vpop.permute.xlu0 %1204  ;;  %1429 = vrot.lane.b32.xlu1 %v6047_v44, %s4999_s10 }
 0x174   : > { %4301 = vmatprep.mubr.f32.mxu1 %v2022_v18  ;;  %v2032_v7 = vand.u32 4294901760, %v2031_v46  ;;  %v6067_v22 = vsel %vm366_vm1, %v7668_v36, %v414_v20  ;;  %v1502_v46 = vsel %vm261_vm0, %v5146_v60, %v5444_v63  ;;  %v1536_v63 = vsel %vm1524_vm5, %v1503_v50, %v5931_v45 }
 0x175   : > { %1123 = vrot.lane.b32.xlu0 %v5881_v19, %s4996_s14  ;;  %v1207_v57 = vpop.permute.xlu1 %1206  ;;  %v1569_v3 = vsel %vm1557_vm6, %v1536_v63, %v5954_v53 }
 0x176   : > { %4302 = vmatmul.mubr.f32.gmra.mrb[8].mxu1 %v2032_v7  ;;  %v1602_v45 = vsel %vm1590_vm7, %v1569_v3, %v5995_v33  ;;  %v766_v33 = vrot.slane %v6067_v22, 2 }
 0x177   : > { %v6056_v42 = vpop.permute.xlu0 %900  ;;  %819 = vrot.lane.b32.xlu1 %v5752_v0, %s4993_s11  ;;  %v1535_v0 = vsel %vm1524_vm5, %v1502_v46, %v5923_v34  ;;  %v1635_v46 = vsel %vm1623_vm8, %v1602_v45, %v1110_v25 }
 0x178   : > { %v1568_v7 = vsel %vm1557_vm6, %v1535_v0, %v5944_v51  ;;  %v7669_v51 = vrot.slane %v5976_v30, 1  ;;  %v1668_v53 = vsel %vm1656_vm9, %v1635_v46, %v1207_v57 }
 0x179   : > { %652 = vrot.lane.b32.xlu0 %v5759_v48, %s4992_s9  ;;  %v6062_v58 = vpop.permute.xlu1 %902  ;;  %v597_v48 = vrot.slane %v6067_v22, 1  ;;  %v1601_v60 = vsel %vm1590_vm7, %v1568_v7, %v5971_v56 }
 0x17a   : > { %v1634_v34 = vsel %vm1623_vm8, %v1601_v60, %v1108_v59 }
 0x17b   : > { %v1311_v18 = vpop.permute.xlu0 %1310  ;;  %1220 = vrot.lane.b32.xlu1 %v5976_v30, %s4997_s16  ;;  %v6098_v55 = vsel %vm537_vm2, %v7669_v51, %v597_v48  ;;  %v1667_v62 = vsel %vm1656_vm9, %v1634_v34, %v1205_v10 }
 0x17c   : > { %v1700_v50 = vsel %vm1689_vm10, %v1667_v62, %v1311_v18 }
 0x17d   : > { %1125 = vrot.lane.b32.xlu0 %v5917_v38, %s4996_s14  ;;  %v1313_v31 = vpop.permute.xlu1 %1312 }
 0x17e   : > { %v1701_v18 = vsel %vm1689_vm10, %v1668_v53, %v1313_v31  ;;  %v7673_v31 = vrot.slane %v5976_v30, 2 }
 0x17f   : > { %v6081_v36 = vpop.permute.xlu0 %1006  ;;  %916 = vrot.lane.b32.xlu1 %v5939_v26, %s4994_s12 }
 0x180   : > { %v6135_v51 = vsel %vm706_vm3, %v7673_v31, %v766_v33 }
 0x181   : > { %821 = vrot.lane.b32.xlu0 %v5797_v29, %s4993_s11  ;;  %v6103_v56 = vpop.permute.xlu1 %1008  ;;  %v517_v29 = vsel %vm366_vm1, %v414_v20, %v487_v1 }
 0x182   : > { %v599_v25 = vrot.slane %v517_v29, 1  ;;  %v768_v53 = vrot.slane %v517_v29, 2  ;;  %v294_v29 = vld [vmem:[#allocation2 + $0xe0] sm:$0xff] }
 0x183   : > { %v1416_v59 = vpop.permute.xlu0 %1415  ;;  %1326 = vrot.lane.b32.xlu1 %v6098_v55, %s4998_s6 }
 0x184   : > { %v1733_v0 = vsel %vm1722_vm11, %v1700_v50, %v1416_v59  ;;  %v6141_v45 = vsel %vm537_vm2, %v597_v48, %v599_v25 }
 0x185   : > { %v1799_v10 = vsel %vm1767_vm12, %v1733_v0, 0  ;;  %1222 = vrot.lane.b32.xlu0 %v6067_v22, %s4997_s16  ;;  %v1418_v1 = vpop.permute.xlu1 %1417 }
 0x186   : > { %v6119_v7 = vand.u32 4294901760, %v1799_v10  ;;  %v1734_v20 = vsel %vm1722_vm11, %v1701_v18, %v1418_v1 }
 0x187   : > { %v1112_v60 = vpop.permute.xlu0 %1111  ;;  %v1802_v57 = vsel %vm1767_vm12, %v1734_v20, 0  ;;  %1022 = vrot.lane.b32.xlu1 %v5965_v41, %s4995_s13  ;;  %v6160_v20 = vsel %vm706_vm3, %v766_v33, %v768_v53  ;;  %v1504_v33 = vsel %vm261_vm0, %v5189_v23, %v5452_v13 }
 0x188   : > { %7670 = vst [vmem:[#allocation30_spill] sm:$0xff] %v6119_v7  ;;  %v6123_v63 = vsub.f32 %v1799_v10, %v6119_v7  ;;  %v6128_v34 = vand.u32 4294901760, %v1802_v57  ;;  %v1537_v53 = vsel %vm1524_vm5, %v1504_v33, %v6036_v17 }
 0x189   : > { %918 = vrot.lane.b32.xlu0 %v5942_v6, %s4994_s12  ;;  %v6137_v3 = vpop.permute.xlu1 %807 }
 0x18a   : > { %7671 = vst [vmem:[#allocation31_spill] sm:$0xff] %v6123_v63  ;;  %7672 = vst [vmem:[#allocation32_spill] sm:$0xff] %v6128_v34  ;;  %v2040_v62 = vand.u32 4294901760, %v6123_v63  ;;  %v6144_v50 = vsub.f32 %v1802_v57, %v6128_v34 }
 0x18b   : > { %v6146_v59 = vpop.permute.xlu0 %640  ;;  %1431 = vrot.lane.b32.xlu1 %v6135_v51, %s4999_s10 }
 0x18c   : > { %7674 = vst [vmem:[#allocation33_spill] sm:$0xff] %v6144_v50  ;;  %4478 = vmatprep.mubr.f32.mxu0 %v2040_v62  ;;  %v2041_v46 = vsub.f32 %v6123_v63, %v2040_v62  ;;  %v2050_v0 = vand.u32 4294901760, %v6144_v50  ;;  %v295_v62 = vld [vmem:[#allocation2 + $0xe8] sm:$0xff]  ;;  %v297_v63 = vld [vmem:[#allocation2 + $0xf8] sm:$0xff] }
 0x18d   : > { %1328 = vrot.lane.b32.xlu0 %v6141_v45, %s4998_s6  ;;  %v1209_v10 = vpop.permute.xlu1 %1208 }
 0x18e   : > { %v2042_v48 = vand.u32 4294901760, %v2041_v46  ;;  %4479 = vmatmul.mubr.f32.gmra.mrb[10].mxu0 %v2050_v0  ;;  %v2051_v1 = vsub.f32 %v6144_v50, %v2050_v0  ;;  %v323_v46 = vrot.slane %v294_v29, 1  ;;  %v416_v0 = vrot.slane %v294_v29, 7 }
 0x18f   : > { %v1114_v18 = vpop.permute.xlu0 %1113  ;;  %1024 = vrot.lane.b32.xlu1 %v6018_v61, %s4995_s13  ;;  %v1570_v29 = vsel %vm1557_vm6, %v1537_v53, %v6056_v42 }
 0x190   : > { %4304 = vmatprep.mubr.f32.mxu1 %v2042_v48  ;;  %v2052_v25 = vand.u32 4294901760, %v2051_v1  ;;  %v417_v48 = vrot.slane %v295_v62, 7  ;;  %v1603_v23 = vsel %vm1590_vm7, %v1570_v29, %v6081_v36  ;;  %v1505_v29 = vsel %vm261_vm0, %v5183_v21, %v5450_v12 }
 0x191   : > { %654 = vrot.lane.b32.xlu0 %v5847_v2, %s4992_s9  ;;  %v6162_v57 = vpop.permute.xlu1 %904 }
 0x192   : > { %4305 = vmatmul.mubr.f32.gmra.mrb[10].mxu1 %v2052_v25  ;;  %v6180_v25 = vsel %vm366_vm1, %v323_v46, %v416_v0  ;;  %v6187_v50 = vsel %vm366_vm1, %v416_v0, %v417_v48 }
 0x193   : > { %v6164_v31 = vpop.permute.xlu0 %809  ;;  %1433 = vrot.lane.b32.xlu1 %v6160_v20, %s4999_s10  ;;  %v601_v42 = vrot.slane %v6180_v25, 1  ;;  %v602_v46 = vrot.slane %v6187_v50, 1 }
 0x195   : > { %1127 = vrot.lane.b32.xlu0 %v6010_v54, %s4996_s14  ;;  %v1315_v2 = vpop.permute.xlu1 %1314 }
 0x197   : > { %v1211_v1 = vpop.permute.xlu0 %1210  ;;  %823 = vrot.lane.b32.xlu1 %v5881_v19, %s4993_s11  ;;  %v1636_v19 = vsel %vm1623_vm8, %v1603_v23, %v1112_v60  ;;  %v1538_v23 = vsel %vm1524_vm5, %v1505_v29, %v6049_v8 }
 0x198   : > { %v1669_v17 = vsel %vm1656_vm9, %v1636_v19, %v1209_v10 }
 0x199   : > { %656 = vrot.lane.b32.xlu0 %v5889_v5, %s4992_s9  ;;  %v6184_v62 = vpop.permute.xlu1 %1010  ;;  %v6196_v5 = vld [vmem:[#allocation2 + $0xf0] sm:$0xff]  ;;  %v1702_v36 = vsel %vm1689_vm10, %v1669_v17, %v1315_v2  ;;  %v6219_v2 = vsel %vm537_vm2, %v601_v42, %v602_v46  ;;  %v1571_v17 = vsel %vm1557_vm6, %v1538_v23, %v6062_v58 }
 0x19a   : > { %v7602_v53 = vrot.slane %v6196_v5, 7  ;;  %v1604_v12 = vsel %vm1590_vm7, %v1571_v17, %v6103_v56  ;;  %v7681_v9 = vrot.slane %v6196_v5, 7 }
 0x19b   : > { %v6191_v13 = vpop.permute.xlu0 %906  ;;  %1224 = vrot.lane.b32.xlu1 %v6180_v25, %s4997_s16  ;;  %v1637_v42 = vsel %vm1623_vm8, %v1604_v12, %v1114_v18 }
 0x19c   : > { %v1670_v58 = vsel %vm1656_vm9, %v1637_v42, %v1211_v1 }
 0x19d   : > { %1129 = vrot.lane.b32.xlu0 %v6047_v44, %s4996_s14  ;;  %v1420_v0 = vpop.permute.xlu1 %1419 }
 0x19e   : > { %v1735_v33 = vsel %vm1722_vm11, %v1702_v36, %v1420_v0  ;;  %v770_v0 = vrot.slane %v6180_v25, 2 }
 0x19f   : > { %v1317_v60 = vpop.permute.xlu0 %1316  ;;  %v1805_v10 = vsel %vm1767_vm12, %v1735_v33, 0  ;;  %920 = vrot.lane.b32.xlu1 %v5976_v30, %s4994_s12  ;;  %v771_v33 = vrot.slane %v6187_v50, 2 }
 0x1a0   : > { %v6214_v19 = vand.u32 4294901760, %v1805_v10  ;;  %v1703_v29 = vsel %vm1689_vm10, %v1670_v58, %v1317_v60 }
 0x1a1   : > { %825 = vrot.lane.b32.xlu0 %v5917_v38, %s4993_s11  ;;  %v6223_v21 = vpop.permute.xlu1 %1012  ;;  %v6235_v38 = vsel %vm366_vm1, %v417_v48, %v7602_v53  ;;  %v6258_v42 = vsel %vm706_vm3, %v770_v0, %v771_v33 }
 0x1a2   : > { %7675 = vst [vmem:[#allocation34_spill] sm:$0xff] %v6214_v19  ;;  %v6228_v36 = vsub.f32 %v1805_v10, %v6214_v19  ;;  %v7603_v10 = vrot.slane %v6235_v38, 1 }
 0x1a3   : > { %v6230_v8 = vpop.permute.xlu0 %642  ;;  %1330 = vrot.lane.b32.xlu1 %v6219_v2, %s4998_s6 }
 0x1a4   : > { %7676 = vst [vmem:[#allocation35_spill] sm:$0xff] %v6228_v36  ;;  %v2060_v56 = vand.u32 4294901760, %v6228_v36 }
 0x1a5   : > { %1226 = vrot.lane.b32.xlu0 %v6187_v50, %s4997_s16  ;;  %v1422_v48 = vpop.permute.xlu1 %1421 }
 0x1a6   : > { %v1736_v18 = vsel %vm1722_vm11, %v1703_v29, %v1422_v48  ;;  %4481 = vmatprep.mubr.f32.mxu0 %v2060_v56  ;;  %v2061_v1 = vsub.f32 %v6228_v36, %v2060_v56  ;;  %v6265_v56 = vsel %vm537_vm2, %v602_v46, %v7603_v10 }
 0x1a7   : > { %v1116_v23 = vpop.permute.xlu0 %1115  ;;  %v1808_v17 = vsel %vm1767_vm12, %v1736_v18, 0  ;;  %1026 = vrot.lane.b32.xlu1 %v6098_v55, %s4995_s13  ;;  %v7608_v18 = vrot.slane %v6235_v38, 2 }
 0x1a8   : > { %v6253_v12 = vand.u32 4294901760, %v1808_v17  ;;  %v2062_v60 = vand.u32 4294901760, %v2061_v1 }
 0x1a9   : > { %922 = vrot.lane.b32.xlu0 %v6067_v22, %s4994_s12  ;;  %v6260_v58 = vpop.permute.xlu1 %811 }
 0x1aa   : > { %7677 = vst [vmem:[#allocation36_spill] sm:$0xff] %v6253_v12  ;;  %v6268_v29 = vsub.f32 %v1808_v17, %v6253_v12  ;;  %4307 = vmatprep.mubr.f32.mxu1 %v2062_v60  ;;  %v6286_v60 = vsel %vm706_vm3, %v771_v33, %v7608_v18 }
 0x1ab   : > { %v6270_v48 = vpop.permute.xlu0 %644  ;;  %1435 = vrot.lane.b32.xlu1 %v6258_v42, %s4999_s10 }
 0x1ac   : > { %7678 = vst [vmem:[#allocation37_spill] sm:$0xff] %v6268_v29  ;;  %v2070_v0 = vand.u32 4294901760, %v6268_v29 }
 0x1ad   : > { %1332 = vrot.lane.b32.xlu0 %v6265_v56, %s4998_s6  ;;  %v1213_v1 = vpop.permute.xlu1 %1212 }
 0x1ae   : > { %4482 = vmatmul.mubr.f32.gmra.mrb[12].mxu0 %v2070_v0  ;;  %v2071_v46 = vsub.f32 %v6268_v29, %v2070_v0  ;;  %v7679_v29 = vld [vmem:[#allocation16_spill] sm:$0xff] }
 0x1af   : > { %v1118_v53 = vpop.permute.xlu0 %1117  ;;  %1028 = vrot.lane.b32.xlu1 %v6141_v45, %s4995_s13  ;;  %v1506_v33 = vsel %vm261_vm0, %v7680_v27, %v7679_v29 }
 0x1b0   : > { %v2072_v17 = vand.u32 4294901760, %v2071_v46 }
 0x1b1   : > { %658 = vrot.lane.b32.xlu0 %v5965_v41, %s4992_s9  ;;  %v6288_v10 = vpop.permute.xlu1 %908  ;;  %v421_v41 = vrot.slane %v297_v63, 7 }
 0x1b2   : > { %4308 = vmatmul.mubr.f32.gmra.mrb[12].mxu1 %v2072_v17  ;;  %v1539_v17 = vsel %vm1524_vm5, %v1506_v33, %v6137_v3  ;;  %v7682_v33 = vld [vmem:[#allocation7_spill] sm:$0xff] }
 0x1b3   : > { %v6290_v36 = vpop.permute.xlu0 %813  ;;  %1437 = vrot.lane.b32.xlu1 %v6286_v60, %s4999_s10  ;;  %v1572_v18 = vsel %vm1557_vm6, %v1539_v17, %v6162_v57  ;;  %v6312_v12 = vsel %vm366_vm1, %v7681_v9, %v421_v41 }
 0x1b4   : > { %v1605_v27 = vsel %vm1590_vm7, %v1572_v18, %v6184_v62  ;;  %v606_v57 = vrot.slane %v6312_v12, 1  ;;  %v488_v18 = vrot.slane %v297_v63, 5 }
 0x1b5   : > { %1131 = vrot.lane.b32.xlu0 %v6135_v51, %s4996_s14  ;;  %v1319_v0 = vpop.permute.xlu1 %1318  ;;  %v1638_v3 = vsel %vm1623_vm8, %v1605_v27, %v1116_v23  ;;  %v1507_v23 = vsel %vm261_vm0, %v7682_v33, %v6146_v59 }
 0x1b7   : > { %v1215_v46 = vpop.permute.xlu0 %1214  ;;  %827 = vrot.lane.b32.xlu1 %v6010_v54, %s4993_s11 }
 0x1b9   : > { %660 = vrot.lane.b32.xlu0 %v6018_v61, %s4992_s9  ;;  %v6307_v24 = vpop.permute.xlu1 %1014  ;;  %v1671_v61 = vsel %vm1656_vm9, %v1638_v3, %v1213_v1  ;;  %v1540_v1 = vsel %vm1524_vm5, %v1507_v23, %v6164_v31 }
 0x1ba   : > { %v1704_v9 = vsel %vm1689_vm10, %v1671_v61, %v1319_v0  ;;  %v7684_v0 = vrot.slane %v6235_v38, 1  ;;  %v1573_v59 = vsel %vm1557_vm6, %v1540_v1, %v6191_v13 }
 0x1bb   : > { %v6316_v54 = vpop.permute.xlu0 %910  ;;  %1228 = vrot.lane.b32.xlu1 %v6235_v38, %s4997_s16  ;;  %v1606_v61 = vsel %vm1590_vm7, %v1573_v59, %v6223_v21  ;;  %v775_v21 = vrot.slane %v6312_v12, 2 }
 0x1bc   : > { %v6342_v63 = vsel %vm537_vm2, %v7684_v0, %v606_v57 }
 0x1bd   : > { %1133 = vrot.lane.b32.xlu0 %v6160_v20, %s4996_s14  ;;  %v1424_v5 = vpop.permute.xlu1 %1423 }
 0x1be   : > { %v1737_v29 = vsel %vm1722_vm11, %v1704_v9, %v1424_v5  ;;  %v1639_v5 = vsel %vm1623_vm8, %v1606_v61, %v1118_v53 }
 0x1bf   : > { %v1321_v62 = vpop.permute.xlu0 %1320  ;;  %v1811_v17 = vsel %vm1767_vm12, %v1737_v29, 0  ;;  %924 = vrot.lane.b32.xlu1 %v6180_v25, %s4994_s12  ;;  %v1672_v29 = vsel %vm1656_vm9, %v1639_v5, %v1215_v46 }
 0x1c0   : > { %v6335_v27 = vand.u32 4294901760, %v1811_v17  ;;  %v1705_v33 = vsel %vm1689_vm10, %v1672_v29, %v1321_v62  ;;  %v7687_v62 = vrot.slane %v6235_v38, 2 }
 0x1c1   : > { %829 = vrot.lane.b32.xlu0 %v6047_v44, %s4993_s11  ;;  %v6346_v3 = vpop.permute.xlu1 %1016  ;;  %v518_v44 = vsel %vm366_vm1, %v421_v41, %v488_v18 }
 0x1c2   : > { %7683 = vst [vmem:[#allocation16_spill] sm:$0xff] %v6335_v27  ;;  %v6351_v31 = vsub.f32 %v1811_v17, %v6335_v27  ;;  %v608_v17 = vrot.slane %v518_v44, 1  ;;  %v6377_v59 = vsel %vm706_vm3, %v7687_v62, %v775_v21  ;;  %v298_v62 = vld [vmem:[#allocation2 + $0x100] sm:$0xff] }
 0x1c3   : > { %v6353_v9 = vpop.permute.xlu0 %646  ;;  %1334 = vrot.lane.b32.xlu1 %v6342_v63, %s4998_s6 }
 0x1c4   : > { %7685 = vst [vmem:[#allocation6_spill] sm:$0xff] %v6351_v31  ;;  %v2080_v13 = vand.u32 4294901760, %v6351_v31  ;;  %v6382_v5 = vsel %vm537_vm2, %v606_v57, %v608_v17 }
 0x1c5   : > { %1230 = vrot.lane.b32.xlu0 %v6312_v12, %s4997_s16  ;;  %v1426_v23 = vpop.permute.xlu1 %1425 }
 0x1c6   : > { %v1738_v41 = vsel %vm1722_vm11, %v1705_v33, %v1426_v23  ;;  %4484 = vmatprep.mubr.f32.mxu0 %v2080_v13  ;;  %v2081_v53 = vsub.f32 %v6351_v31, %v2080_v13  ;;  %v777_v23 = vrot.slane %v518_v44, 2  ;;  %v299_v44 = vld [vmem:[#allocation2 + $0x108] sm:$0xff] }
 0x1c7   : > { %v1120_v18 = vpop.permute.xlu0 %1119  ;;  %v1814_v1 = vsel %vm1767_vm12, %v1738_v41, 0  ;;  %1030 = vrot.lane.b32.xlu1 %v6219_v2, %s4995_s13 }
 0x1c8   : > { %v6370_v46 = vand.u32 4294901760, %v1814_v1  ;;  %v2082_v0 = vand.u32 4294901760, %v2081_v53 }
 0x1c9   : > { %926 = vrot.lane.b32.xlu0 %v6187_v50, %s4994_s12  ;;  %v6379_v61 = vpop.permute.xlu1 %815 }
 0x1ca   : > { %7686 = vst [vmem:[#allocation7_spill] sm:$0xff] %v6370_v46  ;;  %v6385_v29 = vsub.f32 %v1814_v1, %v6370_v46  ;;  %4310 = vmatprep.mubr.f32.mxu1 %v2082_v0  ;;  %v6400_v1 = vsel %vm706_vm3, %v775_v21, %v777_v23  ;;  %v1508_v21 = vsel %vm261_vm0, %v5487_v32, %v6230_v8 }
 0x1cb   : > { %v6387_v13 = vpop.permute.xlu0 %648  ;;  %1439 = vrot.lane.b32.xlu1 %v6377_v59, %s4999_s10  ;;  %v1541_v23 = vsel %vm1524_vm5, %v1508_v21, %v6260_v58 }
 0x1cc   : > { %7688 = vst [vmem:[#allocation38_spill] sm:$0xff] %v6385_v29  ;;  %v2090_v33 = vand.u32 4294901760, %v6385_v29 }
 0x1cd   : > { %1336 = vrot.lane.b32.xlu0 %v6382_v5, %s4998_s6  ;;  %v1217_v41 = vpop.permute.xlu1 %1216 }
 0x1ce   : > { %4485 = vmatmul.mubr.f32.gmra.mrb[14].mxu0 %v2090_v33  ;;  %v2091_v57 = vsub.f32 %v6385_v29, %v2090_v33  ;;  %v324_v33 = vrot.slane %v298_v62, 1  ;;  %v423_v29 = vrot.slane %v298_v62, 7  ;;  %v1574_v62 = vsel %vm1557_vm6, %v1541_v23, %v6288_v10 }
 0x1cf   : > { %v1122_v53 = vpop.permute.xlu0 %1121  ;;  %1032 = vrot.lane.b32.xlu1 %v6265_v56, %s4995_s13  ;;  %v1607_v32 = vsel %vm1590_vm7, %v1574_v62, %v6307_v24  ;;  %v1509_v62 = vsel %vm261_vm0, %v5493_v14, %v6270_v48 }
 0x1d0   : > { %v2092_v17 = vand.u32 4294901760, %v2091_v57  ;;  %v424_v57 = vrot.slane %v299_v44, 7  ;;  %v1640_v8 = vsel %vm1623_vm8, %v1607_v32, %v1120_v18  ;;  %v1542_v32 = vsel %vm1524_vm5, %v1509_v62, %v6290_v36 }
 0x1d1   : > { %662 = vrot.lane.b32.xlu0 %v6098_v55, %s4992_s9  ;;  %v6402_v0 = vpop.permute.xlu1 %912  ;;  %v1673_v58 = vsel %vm1656_vm9, %v1640_v8, %v1217_v41 }
 0x1d2   : > { %4311 = vmatmul.mubr.f32.gmra.mrb[14].mxu1 %v2092_v17  ;;  %v6420_v17 = vsel %vm366_vm1, %v324_v33, %v423_v29  ;;  %v6427_v27 = vsel %vm366_vm1, %v423_v29, %v424_v57 }
 0x1d3   : > { %v6404_v31 = vpop.permute.xlu0 %817  ;;  %1441 = vrot.lane.b32.xlu1 %v6400_v1, %s4999_s10  ;;  %v973_v10 = vrot.slane %v6420_v17, 1  ;;  %v974_v29 = vrot.slane %v6427_v27, 1 }
 0x1d5   : > { %1135 = vrot.lane.b32.xlu0 %v6258_v42, %s4996_s14  ;;  %v1323_v55 = vpop.permute.xlu1 %1322 }
 0x1d6   : > { %v1706_v24 = vsel %vm1689_vm10, %v1673_v58, %v1323_v55  ;;  %v6459_v55 = vsel %vm537_vm2, %v973_v10, %v974_v29  ;;  %v1575_v58 = vsel %vm1557_vm6, %v1542_v32, %v6316_v54 }
 0x1d7   : > { %v1219_v46 = vpop.permute.xlu0 %1218  ;;  %831 = vrot.lane.b32.xlu1 %v6135_v51, %s4993_s11  ;;  %v1608_v48 = vsel %vm1590_vm7, %v1575_v58, %v6346_v3 }
 0x1d8   : > { %v1641_v10 = vsel %vm1623_vm8, %v1608_v48, %v1122_v53 }
 0x1d9   : > { %664 = vrot.lane.b32.xlu0 %v6141_v45, %s4992_s9  ;;  %v6424_v44 = vpop.permute.xlu1 %1018  ;;  %v6436_v45 = vld [vmem:[#allocation2 + $0x110] sm:$0xff]  ;;  %v1674_v54 = vsel %vm1656_vm9, %v1641_v10, %v1219_v46 }
 0x1da   : > { %v7619_v23 = vrot.slane %v6436_v45, 7 }
 0x1db   : > { %v6431_v51 = vpop.permute.xlu0 %914  ;;  %1232 = vrot.lane.b32.xlu1 %v6420_v17, %s4997_s16 }
 0x1dd   : > { %1137 = vrot.lane.b32.xlu0 %v6286_v60, %s4996_s14  ;;  %v1428_v33 = vpop.permute.xlu1 %1427 }
 0x1de   : > { %v1739_v21 = vsel %vm1722_vm11, %v1706_v24, %v1428_v33  ;;  %v1078_v33 = vrot.slane %v6420_v17, 2 }
 0x1df   : > { %v1325_v18 = vpop.permute.xlu0 %1324  ;;  %v1817_v41 = vsel %vm1767_vm12, %v1739_v21, 0  ;;  %928 = vrot.lane.b32.xlu1 %v6235_v38, %s4994_s12  ;;  %v1079_v21 = vrot.slane %v6427_v27, 2 }
 0x1e0   : > { %v6454_v8 = vand.u32 4294901760, %v1817_v41  ;;  %v1707_v62 = vsel %vm1689_vm10, %v1674_v54, %v1325_v18 }
 0x1e1   : > { %833 = vrot.lane.b32.xlu0 %v6160_v20, %s4993_s11  ;;  %v6463_v14 = vpop.permute.xlu1 %1020  ;;  %v6475_v20 = vsel %vm366_vm1, %v424_v57, %v7619_v23  ;;  %v6498_v10 = vsel %vm706_vm3, %v1078_v33, %v1079_v21 }
 0x1e2   : > { %7689 = vst [vmem:[#allocation39_spill] sm:$0xff] %v6454_v8  ;;  %v6468_v24 = vsub.f32 %v1817_v41, %v6454_v8  ;;  %v7620_v41 = vrot.slane %v6475_v20, 1  ;;  %v7693_v8 = vrot.slane %v6436_v45, 7 }
 0x1e3   : > { %v6470_v36 = vpop.permute.xlu0 %650  ;;  %1338 = vrot.lane.b32.xlu1 %v6459_v55, %s4998_s6 }
 0x1e4   : > { %7690 = vst [vmem:[#allocation40_spill] sm:$0xff] %v6468_v24  ;;  %v2100_v3 = vand.u32 4294901760, %v6468_v24 }
 0x1e5   : > { %1234 = vrot.lane.b32.xlu0 %v6427_v27, %s4997_s16  ;;  %v1430_v57 = vpop.permute.xlu1 %1429 }
 0x1e6   : > { %v1740_v53 = vsel %vm1722_vm11, %v1707_v62, %v1430_v57  ;;  %4487 = vmatprep.mubr.f32.mxu0 %v2100_v3  ;;  %v2101_v46 = vsub.f32 %v6468_v24, %v2100_v3  ;;  %v6505_v3 = vsel %vm537_vm2, %v974_v29, %v7620_v41 }
 0x1e7   : > { %v1124_v32 = vpop.permute.xlu0 %1123  ;;  %v1820_v58 = vsel %vm1767_vm12, %v1740_v53, 0  ;;  %1034 = vrot.lane.b32.xlu1 %v6342_v63, %s4995_s13  ;;  %v7624_v53 = vrot.slane %v6475_v20, 2 }
 0x1e8   : > { %v6493_v48 = vand.u32 4294901760, %v1820_v58  ;;  %v2102_v18 = vand.u32 4294901760, %v2101_v46 }
 0x1e9   : > { %930 = vrot.lane.b32.xlu0 %v6312_v12, %s4994_s12  ;;  %v6500_v54 = vpop.permute.xlu1 %819 }
 0x1ea   : > { %7691 = vst [vmem:[#allocation41_spill] sm:$0xff] %v6493_v48  ;;  %v6508_v62 = vsub.f32 %v1820_v58, %v6493_v48  ;;  %4313 = vmatprep.mubr.f32.mxu1 %v2102_v18  ;;  %v6526_v18 = vsel %vm706_vm3, %v1079_v21, %v7624_v53  ;;  %v301_v48 = vld [vmem:[#allocation2 + $0x118] sm:$0xff]  ;;  %v1510_v21 = vsel %vm261_vm0, %v5506_v11, %v6353_v9 }
 0x1eb   : > { %v6510_v57 = vpop.permute.xlu0 %652  ;;  %1443 = vrot.lane.b32.xlu1 %v6498_v10, %s4999_s10 }
 0x1ec   : > { %7692 = vst [vmem:[#allocation42_spill] sm:$0xff] %v6508_v62  ;;  %v2110_v33 = vand.u32 4294901760, %v6508_v62 }
 0x1ed   : > { %1340 = vrot.lane.b32.xlu0 %v6505_v3, %s4998_s6  ;;  %v1221_v46 = vpop.permute.xlu1 %1220 }
 0x1ee   : > { %4488 = vmatmul.mubr.f32.gmra.mrb[16].mxu0 %v2110_v33  ;;  %v2111_v29 = vsub.f32 %v6508_v62, %v2110_v33 }
 0x1ef   : > { %v1126_v23 = vpop.permute.xlu0 %1125  ;;  %1036 = vrot.lane.b32.xlu1 %v6382_v5, %s4995_s13 }
 0x1f0   : > { %v2112_v58 = vand.u32 4294901760, %v2111_v29 }
 0x1f1   : > { %666 = vrot.lane.b32.xlu0 %v6219_v2, %s4992_s9  ;;  %v6528_v41 = vpop.permute.xlu1 %916  ;;  %v428_v2 = vrot.slane %v301_v48, 7 }
 0x1f2   : > { %4314 = vmatmul.mubr.f32.gmra.mrb[16].mxu1 %v2112_v58  ;;  %v1543_v58 = vsel %vm1524_vm5, %v1510_v21, %v6379_v61 }
 0x1f3   : > { %v6530_v24 = vpop.permute.xlu0 %821  ;;  %1445 = vrot.lane.b32.xlu1 %v6526_v18, %s4999_s10  ;;  %v1576_v53 = vsel %vm1557_vm6, %v1543_v58, %v6402_v0  ;;  %v6552_v19 = vsel %vm366_vm1, %v7693_v8, %v428_v2 }
 0x1f4   : > { %v1609_v11 = vsel %vm1590_vm7, %v1576_v53, %v6424_v44  ;;  %v978_v61 = vrot.slane %v6552_v19, 1  ;;  %v489_v53 = vrot.slane %v301_v48, 5 }
 0x1f5   : > { %1139 = vrot.lane.b32.xlu0 %v6377_v59, %s4996_s14  ;;  %v1327_v33 = vpop.permute.xlu1 %1326  ;;  %v1642_v9 = vsel %vm1623_vm8, %v1609_v11, %v1124_v32  ;;  %v1511_v32 = vsel %vm261_vm0, %v5598_v52, %v6387_v13 }
 0x1f7   : > { %v1223_v29 = vpop.permute.xlu0 %1222  ;;  %835 = vrot.lane.b32.xlu1 %v6258_v42, %s4993_s11 }
 0x1f9   : > { %668 = vrot.lane.b32.xlu0 %v6265_v56, %s4992_s9  ;;  %v6547_v62 = vpop.permute.xlu1 %1022  ;;  %v1675_v56 = vsel %vm1656_vm9, %v1642_v9, %v1221_v46  ;;  %v1544_v46 = vsel %vm1524_vm5, %v1511_v32, %v6404_v31 }
 0x1fa   : > { %v1708_v0 = vsel %vm1689_vm10, %v1675_v56, %v1327_v33  ;;  %v7695_v33 = vrot.slane %v6475_v20, 1  ;;  %v1577_v52 = vsel %vm1557_vm6, %v1544_v46, %v6431_v51  ;;  %v4925_v51 = vld [vmem:[%s7562_s2] sm:$0xff]  ;;  %v7697_v56 = vld [vmem:[#allocation8_spill] sm:$0xff] }
 0x1fb   : > { %v6556_v42 = vpop.permute.xlu0 %918  ;;  %1236 = vrot.lane.b32.xlu1 %v6475_v20, %s4997_s16 }
 0x1fc   : > { %v6582_v48 = vsel %vm537_vm2, %v7695_v33, %v978_v61 }
 0x1fd   : > { %1141 = vrot.lane.b32.xlu0 %v6400_v1, %s4996_s14  ;;  %v1432_v45 = vpop.permute.xlu1 %1431 }
 0x1fe   : > { %v1741_v8 = vsel %vm1722_vm11, %v1708_v0, %v1432_v45  ;;  %v7698_v0 = vand.u32 4294901760, %v7697_v56 }
 0x1ff   : > { %v1329_v44 = vpop.permute.xlu0 %1328  ;;  %v1823_v21 = vsel %vm1767_vm12, %v1741_v8, 0  ;;  %932 = vrot.lane.b32.xlu1 %v6420_v17, %s4994_s12  ;;  %v1610_v17 = vsel %vm1590_vm7, %v1577_v52, %v6463_v14  ;;  %v4926_v14 = vld [vmem:[%s7562_s2 + $0x8] sm:$0xff]  ;;  %v7699_v8 = vld [vmem:[#allocation9_spill] sm:$0xff] }
 0x200   : > { %v6575_v58 = vand.u32 4294901760, %v1823_v21  ;;  %v1643_v9 = vsel %vm1623_vm8, %v1610_v17, %v1126_v23  ;;  %v6604_v45 = vsub.f32 %v4925_v51, %v7698_v0  ;;  %v7700_v32 = vand.u32 4294901760, %v7699_v8 }
 0x201   : > { %837 = vrot.lane.b32.xlu0 %v6286_v60, %s4993_s11  ;;  %v6586_v13 = vpop.permute.xlu1 %1024  ;;  %v519_v60 = vsel %vm366_vm1, %v428_v2, %v489_v53  ;;  %v1676_v23 = vsel %vm1656_vm9, %v1643_v9, %v1223_v29 }
 0x202   : > { %7694 = vst [vmem:[#allocation43_spill] sm:$0xff] %v6575_v58  ;;  %v6591_v31 = vsub.f32 %v1823_v21, %v6575_v58  ;;  %v6611_v2 = vsub.f32 %v4926_v14, %v7700_v32  ;;  %v1083_v21 = vrot.slane %v6552_v19, 2  ;;  %v1709_v46 = vsel %vm1689_vm10, %v1676_v23, %v1329_v44 }
 0x203   : > { %v6593_v11 = vpop.permute.xlu0 %654  ;;  %1342 = vrot.lane.b32.xlu1 %v6582_v48, %s4998_s6  ;;  %v980_v52 = vrot.slane %v519_v60, 1  ;;  %v2261_v17 = vand.u32 4294901760, %v6604_v45  ;;  %v7702_v23 = vrot.slane %v6475_v20, 2 }
 0x204   : > { %7696 = vst [vmem:[#allocation44_spill] sm:$0xff] %v6591_v31  ;;  %v2120_v53 = vand.u32 4294901760, %v6591_v31  ;;  %v2268_v51 = vand.u32 4294901760, %v6611_v2 }
 0x205   : > { %1238 = vrot.lane.b32.xlu0 %v6552_v19, %s4997_s16  ;;  %v1434_v33 = vpop.permute.xlu1 %1433  ;;  %v2262_v44 = vsub.f32 %v6604_v45, %v2261_v17 }
 0x206   : > { %v1742_v56 = vsel %vm1722_vm11, %v1709_v46, %v1434_v33  ;;  %4490 = vmatprep.mubr.f32.mxu0 %v2120_v53  ;;  %v2121_v29 = vsub.f32 %v6591_v31, %v2120_v53  ;;  %v2269_v14 = vsub.f32 %v6611_v2, %v2268_v51  ;;  %v6637_v46 = vsel %vm706_vm3, %v7702_v23, %v1083_v21 }
 0x207   : > { %v6622_v0 = vpop.permute.xlu0 %1127  ;;  %v1826_v9 = vsel %vm1767_vm12, %v1742_v56, 0  ;;  %1038 = vrot.lane.b32.xlu1 %v6459_v55, %s4995_s13  ;;  %v4659_v53 = vpack.c.bf16 %v2268_v51, %v2261_v17  ;;  %v6642_v55 = vsel %vm537_vm2, %v978_v61, %v980_v52  ;;  %v2263_v56 = vand.u32 4294901760, %v2262_v44 }
 0x208   : > { %v6630_v8 = vand.u32 4294901760, %v1826_v9  ;;  %v2122_v32 = vand.u32 4294901760, %v2121_v29  ;;  %v2270_v31 = vand.u32 4294901760, %v2269_v14  ;;  %v1085_v52 = vrot.slane %v519_v60, 2  ;;  %v302_v60 = vld [vmem:[#allocation2 + $0x120] sm:$0xff] }
 0x209   : > { %934 = vrot.lane.b32.xlu0 %v6427_v27, %s4994_s12  ;;  %v6639_v33 = vpop.permute.xlu1 %823  ;;  %4660 = vmatprep.subr.bf16.mxu0 %v4659_v53  ;;  %v430_v23 = vrot.slane %v302_v60, 7 }
 0x20a   : > { %7701 = vst [vmem:[#allocation8_spill] sm:$0xff] %v6630_v8  ;;  %v6645_v58 = vsub.f32 %v1826_v9, %v6630_v8  ;;  %4316 = vmatprep.mubr.f32.mxu1 %v2122_v32  ;;  %v4635_v27 = vpack.c.bf16 %v2270_v31, %v2263_v56  ;;  %4662 = vmatpush3.bf16.msra.mxu0 %v4659_v53  ;;  %v303_v32 = vld [vmem:[#allocation2 + $0x128] sm:$0xff] }
 0x20b   : > { %v6647_v34 = vpop.permute.xlu0 %656  ;;  %1447 = vrot.lane.b32.xlu1 %v6637_v46, %s4999_s10  ;;  %v6662_v9 = vsel %vm706_vm3, %v1083_v21, %v1085_v52  ;;  %v431_v53 = vrot.slane %v303_v32, 7  ;;  %v1512_v21 = vsel %vm261_vm0, %v5696_v28, %v6470_v36 }
 0x20c   : > { %7703 = vst [vmem:[#allocation9_spill] sm:$0xff] %v6645_v58  ;;  %v2130_v61 = vand.u32 4294901760, %v6645_v58  ;;  %4636 = vmatprep.subr.bf16.mxu1 %v4635_v27  ;;  %v1545_v28 = vsel %vm1524_vm5, %v1512_v21, %v6500_v54 }
 0x20d   : > { %1344 = vrot.lane.b32.xlu0 %v6642_v55, %s4998_s6  ;;  %v1225_v17 = vpop.permute.xlu1 %1224  ;;  %4638 = vmatpush3.bf16.msra.mxu1 %v4635_v27  ;;  %v4927_v27 = vld [vmem:[%s7562_s2 + $0x10] sm:$0xff]  ;;  %v1578_v36 = vsel %vm1557_vm6, %v1545_v28, %v6528_v41 }
 0x20e   : > { %4491 = vmatmul.mubr.f32.gmra.mrb[18].mxu0 %v2130_v61  ;;  %v2131_v29 = vsub.f32 %v6645_v58, %v2130_v61  ;;  %v7704_v61 = vld [vmem:[#allocation11_spill] sm:$0xff]  ;;  %v1611_v54 = vsel %vm1590_vm7, %v1578_v36, %v6547_v62  ;;  %v6715_v41 = vld [vmem:[#allocation2 + $0x130] sm:$0xff] }
 0x20f   : > { %v6654_v51 = vpop.permute.xlu0 %1129  ;;  %1040 = vrot.lane.b32.xlu1 %v6505_v3, %s4995_s13  ;;  %v325_v3 = vrot.slane %v302_v60, 1  ;;  %v7705_v52 = vand.u32 4294901760, %v7704_v61  ;;  %v6703_v61 = vsel %vm366_vm1, %v430_v23, %v431_v53 }
 0x210   : > { %v2132_v31 = vand.u32 4294901760, %v2131_v29  ;;  %v1282_v62 = vrot.slane %v6703_v61, 1 }
 0x211   : > { %670 = vrot.lane.b32.xlu0 %v6342_v63, %s4992_s9  ;;  %v6664_v44 = vpop.permute.xlu1 %920  ;;  %v6682_v29 = vsub.f32 %v4927_v27, %v7705_v52 }
 0x212   : > { %4317 = vmatmul.mubr.f32.gmra.mrb[18].mxu1 %v2132_v31  ;;  %v7706_v31 = vld [vmem:[#allocation12_spill] sm:$0xff] }
 0x213   : > { %v6666_v14 = vpop.permute.xlu0 %825  ;;  %1449 = vrot.lane.b32.xlu1 %v6662_v9, %s4999_s10  ;;  %v7707_v60 = vand.u32 4294901760, %v7706_v31  ;;  %v2275_v52 = vand.u32 4294901760, %v6682_v29 }
 0x215   : > { %1143 = vrot.lane.b32.xlu0 %v6498_v10, %s4996_s14  ;;  %v1331_v63 = vpop.permute.xlu1 %1330  ;;  %v4928_v10 = vld [vmem:[%s7562_s2 + $0x18] sm:$0xff] }
 0x216   : > { %v6689_v32 = vsub.f32 %v4928_v10, %v7707_v60 }
 0x217   : > { %v1227_v56 = vpop.permute.xlu0 %1226  ;;  %839 = vrot.lane.b32.xlu1 %v6377_v59, %s4993_s11  ;;  %v6696_v59 = vsel %vm366_vm1, %v325_v3, %v430_v23  ;;  %v2276_v3 = vsub.f32 %v6682_v29, %v2275_v52 }
 0x218   : > { %v2282_v10 = vand.u32 4294901760, %v6689_v32  ;;  %v1281_v28 = vrot.slane %v6696_v59, 1 }
 0x219   : > { %672 = vrot.lane.b32.xlu0 %v6382_v5, %s4992_s9  ;;  %v6700_v27 = vpop.permute.xlu1 %1026  ;;  %v1644_v5 = vsel %vm1623_vm8, %v1611_v54, %v6622_v0  ;;  %v2277_v54 = vand.u32 4294901760, %v2276_v3 }
 0x21a   : > { %v2283_v23 = vsub.f32 %v6689_v32, %v2282_v10  ;;  %v4663_v31 = vpack.c.bf16 %v2282_v10, %v2275_v52  ;;  %v1677_v60 = vsel %vm1656_vm9, %v1644_v5, %v1225_v17  ;;  %v433_v52 = vrot.slane %v6715_v41, 7 }
 0x21b   : > { %v6709_v21 = vpop.permute.xlu0 %922  ;;  %1240 = vrot.lane.b32.xlu1 %v6696_v59, %s4997_s16  ;;  %v1710_v0 = vsel %vm1689_vm10, %v1677_v60, %v1331_v63  ;;  %v1513_v17 = vsel %vm261_vm0, %v5700_v39, %v6510_v57  ;;  %v1283_v41 = vsel %vm537_vm2, %v1281_v28, %v1282_v62 }
 0x21c   : > { %v2284_v58 = vand.u32 4294901760, %v2283_v23  ;;  %4664 = vmatprep.subr.bf16.mxu0 %v4663_v31  ;;  %v1546_v10 = vsel %vm1524_vm5, %v1513_v17, %v6530_v24  ;;  %v1387_v23 = vrot.slane %v6703_v61, 2 }
 0x21d   : > { %1145 = vrot.lane.b32.xlu0 %v6526_v18, %s4996_s14  ;;  %v1436_v36 = vpop.permute.xlu1 %1435  ;;  %4666 = vmatpush3.bf16.msra.mxu0 %v4663_v31  ;;  %v1579_v3 = vsel %vm1557_vm6, %v1546_v10, %v6556_v42 }
 0x21e   : > { %v1743_v8 = vsel %vm1722_vm11, %v1710_v0, %v1436_v36  ;;  %v4639_v63 = vpack.c.bf16 %v2284_v58, %v2277_v54  ;;  %v6752_v58 = vsel %vm366_vm1, %v431_v53, %v433_v52 }
 0x21f   : > { %v1333_v7 = vpop.permute.xlu0 %1332  ;;  %v1829_v18 = vsel %vm1767_vm12, %v1743_v8, 0  ;;  %936 = vrot.lane.b32.xlu1 %v6475_v20, %s4994_s12  ;;  %v1612_v20 = vsel %vm1590_vm7, %v1579_v3, %v6586_v13  ;;  %v1386_v8 = vrot.slane %v6696_v59, 2  ;;  %v1284_v60 = vrot.slane %v6752_v58, 1 }
 0x220   : > { %v6735_v5 = vand.u32 4294901760, %v1829_v18  ;;  %4640 = vmatprep.subr.bf16.mxu1 %v4639_v63  ;;  %v1389_v10 = vrot.slane %v6752_v58, 2 }
 0x221   : > { %841 = vrot.lane.b32.xlu0 %v6400_v1, %s4993_s11  ;;  %v6742_v39 = vpop.permute.xlu1 %1028  ;;  %4642 = vmatpush3.bf16.msra.mxu1 %v4639_v63  ;;  %v1645_v1 = vsel %vm1623_vm8, %v1612_v20, %v6654_v51  ;;  %v1285_v54 = vsel %vm537_vm2, %v1282_v62, %v1284_v60  ;;  %v305_v63 = vld [vmem:[#allocation2 + $0x138] sm:$0xff] }
 0x222   : > { %v6747_v57 = vsub.f32 %v1829_v18, %v6735_v5  ;;  %v1678_v42 = vsel %vm1656_vm9, %v1645_v1, %v1227_v56  ;;  %v490_v3 = vrot.slane %v305_v63, 5  ;;  %v7708_v1 = vld [vmem:[#allocation15_spill] sm:$0xff] }
 0x223   : > { %v6749_v24 = vpop.permute.xlu0 %658  ;;  %1346 = vrot.lane.b32.xlu1 %v1283_v41, %s4998_s6  ;;  %v1711_v53 = vsel %vm1689_vm10, %v1678_v42, %v1333_v7  ;;  %v435_v41 = vrot.slane %v305_v63, 7  ;;  %v7709_v42 = vld [vmem:[#allocation14_spill] sm:$0xff] }
 0x224   : > { %v2140_v13 = vand.u32 4294901760, %v6747_v57 }
 0x225   : > { %1242 = vrot.lane.b32.xlu0 %v6703_v61, %s4997_s16  ;;  %v1438_v31 = vpop.permute.xlu1 %1437  ;;  %v1388_v61 = vsel %vm706_vm3, %v1386_v8, %v1387_v23  ;;  %v6790_v8 = vsub.f32 %v7709_v42, %v7708_v1 }
 0x226   : > { %v1744_v51 = vsel %vm1722_vm11, %v1711_v53, %v1438_v31  ;;  %4493 = vmatprep.mubr.f32.mxu0 %v2140_v13  ;;  %v2141_v56 = vsub.f32 %v6747_v57, %v2140_v13 }
 0x227   : > { %v1132_v28 = vpop.permute.xlu0 %1131  ;;  %v1832_v59 = vsel %vm1767_vm12, %v1744_v51, 0  ;;  %1042 = vrot.lane.b32.xlu1 %v6582_v48, %s4995_s13  ;;  %v2289_v53 = vand.u32 4294901760, %v6790_v8  ;;  %v1390_v51 = vsel %vm706_vm3, %v1387_v23, %v1389_v10  ;;  %v7710_v23 = vld [vmem:[#allocation10_spill] sm:$0xff] }
 0x228   : > { %v6770_v0 = vand.u32 4294901760, %v1832_v59  ;;  %v2142_v7 = vand.u32 4294901760, %v2141_v56  ;;  %v436_v56 = vsel %vm366_vm1, %v433_v52, %v435_v41 }
 0x229   : > { %938 = vrot.lane.b32.xlu0 %v6552_v19, %s4994_s12  ;;  %v6775_v36 = vpop.permute.xlu1 %827  ;;  %4519 = vmatprep.subr.mxu0 %v2289_v53 }
 0x22a   : > { %v6779_v17 = vsub.f32 %v1832_v59, %v6770_v0  ;;  %4319 = vmatprep.mubr.f32.mxu1 %v2142_v7  ;;  %v520_v59 = vsel %vm366_vm1, %v435_v41, %v490_v3  ;;  %4520 = vmatpush3.msra.mxu0 %v2289_v53  ;;  %v1391_v41 = vrot.slane %v436_v56, 2 }
 0x22b   : > { %v6781_v18 = vpop.permute.xlu0 %660  ;;  %1451 = vrot.lane.b32.xlu1 %v1388_v61, %s4999_s10  ;;  %v2290_v61 = vsub.f32 %v6790_v8, %v2289_v53  ;;  %4668 = vmatprep.subr.bf16.mxu0 %v7710_v23 }
 0x22c   : > { %v2150_v19 = vand.u32 4294901760, %v6779_v17 }
 0x22d   : > { %1348 = vrot.lane.b32.xlu0 %v1285_v54, %s4998_s6  ;;  %v1229_v48 = vpop.permute.xlu1 %1228  ;;  %v2291_v54 = vand.u32 4294901760, %v2290_v61 }
 0x22e   : > { %4494 = vmatmul.mubr.f32.gmra.mrb[20].mxu0 %v2150_v19  ;;  %v2151_v62 = vsub.f32 %v6779_v17, %v2150_v19  ;;  %v1514_v19 = vsel %vm261_vm0, %v5733_v47, %v6593_v11 }
 0x22f   : > { %v1134_v20 = vpop.permute.xlu0 %1133  ;;  %1147 = vrot.lane.b32.xlu1 %v6637_v46, %s4996_s14  ;;  %v1286_v46 = vrot.slane %v436_v56, 1  ;;  %4345 = vmatprep.subr.mxu1 %v2291_v54 }
 0x230   : > { %v2152_v13 = vand.u32 4294901760, %v2151_v62  ;;  %4346 = vmatpush3.msra.mxu1 %v2291_v54  ;;  %v1393_v62 = vrot.slane %v520_v59, 2  ;;  %v6847_v54 = vpack.c.bf16 %v6611_v2, %v6604_v45 }
 0x231   : > { %1044 = vrot.lane.b32.xlu0 %v6642_v55, %s4995_s13  ;;  %v6797_v31 = vpop.permute.xlu1 %924  ;;  %v1288_v55 = vrot.slane %v520_v59, 1  ;;  %v1287_v53 = vsel %vm537_vm2, %v1284_v60, %v1286_v46  ;;  %v1392_v60 = vsel %vm706_vm3, %v1389_v10, %v1391_v41 }
 0x232   : > { %4320 = vmatmul.mubr.f32.gmra.mrb[20].mxu1 %v2152_v13  ;;  %4644 = vmatprep.subr.bf16.mxu1 %v6847_v54 }
 0x233   : > { %v6802_v7 = vpop.permute.xlu0 %829  ;;  %1149 = vrot.lane.b32.xlu1 %v6662_v9, %s4996_s14  ;;  %v1547_v9 = vsel %vm1524_vm5, %v1514_v19, %v6639_v33  ;;  %v1289_v3 = vsel %vm537_vm2, %v1286_v46, %v1288_v55 }
 0x234   : > { %v1580_v42 = vsel %vm1557_vm6, %v1547_v9, %v6664_v44 }
 0x235   : > { %1453 = vrot.lane.b32.xlu0 %v1390_v51, %s4999_s10  ;;  %v1335_v52 = vpop.permute.xlu1 %1334  ;;  %v1613_v47 = vsel %vm1590_vm7, %v1580_v42, %v6700_v27  ;;  %v1394_v51 = vsel %vm706_vm3, %v1391_v41, %v1393_v62 }
 0x236   : > { %v1646_v33 = vsel %vm1623_vm8, %v1613_v47, %v1132_v28  ;;  %v1515_v28 = vsel %vm261_vm0, %v5830_v49, %v6647_v34 }
 0x237   : > { %v1231_v63 = vpop.permute.xlu0 %1230  ;;  %1246 = vrot.lane.b32.xlu1 %v436_v56, %s4997_s16 }
 0x239   : > { %1244 = vrot.lane.b32.xlu0 %v6752_v58, %s4997_s16  ;;  %v1031_v13 = vpop.permute.xlu1 %1030  ;;  %v1679_v58 = vsel %vm1656_vm9, %v1646_v33, %v1229_v48  ;;  %v1548_v48 = vsel %vm1524_vm5, %v1515_v28, %v6666_v14  ;;  %v1516_v28 = vsel %vm261_vm0, %v5939_v26, %v6749_v24 }
 0x23a   : > { %v1712_v44 = vsel %vm1689_vm10, %v1679_v58, %v1335_v52  ;;  %v1581_v10 = vsel %vm1557_vm6, %v1548_v48, %v6709_v21 }
 0x23b   : > { %v6823_v11 = vpop.permute.xlu0 %926  ;;  %1352 = vrot.lane.b32.xlu1 %v1289_v3, %s4998_s6  ;;  %v1614_v49 = vsel %vm1590_vm7, %v1581_v10, %v6742_v39 }
 0x23c   : > { %v1647_v14 = vsel %vm1623_vm8, %v1614_v49, %v1134_v20  ;;  %v6886_v49 = vpack.c.bf16 %v6689_v32, %v6682_v29 }
 0x23d   : > { %1350 = vrot.lane.b32.xlu0 %v1287_v53, %s4998_s6  ;;  %v1440_v56 = vpop.permute.xlu1 %1439  ;;  %v1680_v19 = vsel %vm1656_vm9, %v1647_v14, %v1231_v63 }
 0x23e   : > { %v1745_v59 = vsel %vm1722_vm11, %v1712_v44, %v1440_v56 }
 0x23f   : > { %v1337_v27 = vpop.permute.xlu0 %1336  ;;  %v1835_v61 = vsel %vm1767_vm12, %v1745_v59, 0  ;;  %1457 = vrot.lane.b32.xlu1 %v1394_v51, %s4999_s10 }
 0x240   : > { %v6840_v46 = vand.u32 4294901760, %v1835_v61  ;;  %v1713_v9 = vsel %vm1689_vm10, %v1680_v19, %v1337_v27 }
 0x241   : > { %1455 = vrot.lane.b32.xlu0 %v1392_v60, %s4999_s10  ;;  %v1033_v55 = vpop.permute.xlu1 %1032 }
 0x242   : > { %v6852_v34 = vsub.f32 %v1835_v61, %v6840_v46  ;;  %v1549_v61 = vsel %vm1524_vm5, %v1516_v28, %v6775_v36 }
 0x243   : > { %v6854_v52 = vpop.permute.xlu0 %662  ;;  %v1582_v48 = vsel %vm1557_vm6, %v1549_v61, %v6797_v31  ;;  %v1517_v31 = vsel %vm261_vm0, %v5942_v6, %v6781_v18 }
 0x244   : > { %v2160_v21 = vand.u32 4294901760, %v6852_v34  ;;  %v1615_v14 = vsel %vm1590_vm7, %v1582_v48, %v1031_v13  ;;  %v1550_v32 = vsel %vm1524_vm5, %v1517_v31, %v6802_v7 }
 0x245   : > { %v1442_v45 = vpop.permute.xlu1 %1441 }
 0x246   : > { %v1746_v2 = vsel %vm1722_vm11, %v1713_v9, %v1442_v45  ;;  %4496 = vmatprep.mubr.f32.mxu0 %v2160_v21  ;;  %v2161_v39 = vsub.f32 %v6852_v34, %v2160_v21 }
 0x247   : > { %v1136_v41 = vpop.permute.xlu0 %1135  ;;  %v1838_v3 = vsel %vm1767_vm12, %v1746_v2, 0  ;;  %v1583_v2 = vsel %vm1557_vm6, %v1550_v32, %v6823_v11 }
 0x248   : > { %v6864_v62 = vand.u32 4294901760, %v1838_v3  ;;  %v2162_v20 = vand.u32 4294901760, %v2161_v39  ;;  %v1648_v21 = vsel %vm1623_vm8, %v1615_v14, %v1136_v41  ;;  %v1616_v39 = vsel %vm1590_vm7, %v1583_v2, %v1033_v55 }
 0x249   : > { %v6866_v42 = vpop.permute.xlu1 %831 }
 0x24a   : > { %v6869_v63 = vsub.f32 %v1838_v3, %v6864_v62  ;;  %4322 = vmatprep.mubr.f32.mxu1 %v2162_v20 }
 0x24b   : > { %v6871_v53 = vpop.permute.xlu0 %664 }
 0x24c   : > { %v2170_v47 = vand.u32 4294901760, %v6869_v63 }
 0x24d   : > { %v1233_v33 = vpop.permute.xlu1 %1232 }
 0x24e   : > { %4497 = vmatmul.mubr.f32.gmra.mrb[22].mxu0 %v2170_v47  ;;  %v2171_v51 = vsub.f32 %v6869_v63, %v2170_v47  ;;  %v1681_v9 = vsel %vm1656_vm9, %v1648_v21, %v1233_v33 }
 0x24f   : > { %v1138_v58 = vpop.permute.xlu0 %1137 }
 0x250   : > { %v2172_v44 = vand.u32 4294901760, %v2171_v51  ;;  %v1649_v6 = vsel %vm1623_vm8, %v1616_v39, %v1138_v58 }
 0x251   : > { %v929_v56 = vpop.permute.xlu1 %928 }
 0x252   : > { %4323 = vmatmul.mubr.f32.gmra.mrb[22].mxu1 %v2172_v44 }
 0x253   : > { %v6875_v60 = vpop.permute.xlu0 %833 }
 0x255   : > { %v1339_v59 = vpop.permute.xlu1 %1338 }
 0x256   : > { %v1714_v26 = vsel %vm1689_vm10, %v1681_v9, %v1339_v59 }
 0x257   : > { %v1235_v27 = vpop.permute.xlu0 %1234 }
 0x258   : > { %v1682_v18 = vsel %vm1656_vm9, %v1649_v6, %v1235_v27 }
 0x259   : > { %v1035_v10 = vpop.permute.xlu1 %1034 }
 0x25b   : > { %v931_v19 = vpop.permute.xlu0 %930 }
 0x25d   : > { %v1444_v24 = vpop.permute.xlu1 %1443 }
 0x25e   : > { %v1747_v36 = vsel %vm1722_vm11, %v1714_v26, %v1444_v24 }
 0x25f   : > { %v1341_v45 = vpop.permute.xlu0 %1340  ;;  %v1841_v29 = vsel %vm1767_vm12, %v1747_v36, 0 }
 0x260   : > { %v6899_v13 = vand.u32 4294901760, %v1841_v29  ;;  %v1715_v7 = vsel %vm1689_vm10, %v1682_v18, %v1341_v45 }
 0x261   : > { %v1037_v41 = vpop.permute.xlu1 %1036 }
 0x262   : > { %v6905_v3 = vsub.f32 %v1841_v29, %v6899_v13  ;;  %v1518_v29 = vsel %vm261_vm0, %v5976_v30, %v6854_v52  ;;  %v1519_v30 = vsel %vm261_vm0, %v6067_v22, %v6871_v53 }
 0x263   : > { %v6907_v20 = vpop.permute.xlu0 %666  ;;  %v1551_v32 = vsel %vm1524_vm5, %v1518_v29, %v6866_v42  ;;  %v1552_v42 = vsel %vm1524_vm5, %v1519_v30, %v6875_v60 }
 0x264   : > { %v2180_v47 = vand.u32 4294901760, %v6905_v3  ;;  %v1584_v2 = vsel %vm1557_vm6, %v1551_v32, %v929_v56 }
 0x265   : > { %v1446_v33 = vpop.permute.xlu1 %1445  ;;  %v1617_v6 = vsel %vm1590_vm7, %v1584_v2, %v1035_v10  ;;  %v1585_v10 = vsel %vm1557_vm6, %v1552_v42, %v931_v19 }
 0x266   : > { %v1748_v51 = vsel %vm1722_vm11, %v1715_v7, %v1446_v33  ;;  %4499 = vmatprep.mubr.f32.mxu0 %v2180_v47  ;;  %v2181_v55 = vsub.f32 %v6905_v3, %v2180_v47 }
 0x267   : > { %v1140_v11 = vpop.permute.xlu0 %1139  ;;  %v1844_v44 = vsel %vm1767_vm12, %v1748_v51, 0 }
 0x268   : > { %v6916_v59 = vand.u32 4294901760, %v1844_v44  ;;  %v2182_v28 = vand.u32 4294901760, %v2181_v55  ;;  %v1650_v47 = vsel %vm1623_vm8, %v1617_v6, %v1140_v11 }
 0x269   : > { %v6918_v61 = vpop.permute.xlu1 %835 }
 0x26a   : > { %v6921_v58 = vsub.f32 %v1844_v44, %v6916_v59  ;;  %4325 = vmatprep.mubr.f32.mxu1 %v2182_v28  ;;  %v1618_v28 = vsel %vm1590_vm7, %v1585_v10, %v1037_v41  ;;  %v1520_v10 = vsel %vm261_vm0, %v6180_v25, %v6907_v20 }
 0x26b   : > { %v6923_v27 = vpop.permute.xlu0 %668 }
 0x26c   : > { %v2190_v48 = vand.u32 4294901760, %v6921_v58  ;;  %v1521_v20 = vsel %vm261_vm0, %v6187_v50, %v6923_v27 }
 0x26d   : > { %v1237_v14 = vpop.permute.xlu1 %1236 }
 0x26e   : > { %4500 = vmatmul.mubr.f32.gmra.mrb[24].mxu0 %v2190_v48  ;;  %v2191_v9 = vsub.f32 %v6921_v58, %v2190_v48  ;;  %v1683_v7 = vsel %vm1656_vm9, %v1650_v47, %v1237_v14 }
 0x26f   : > { %v1142_v21 = vpop.permute.xlu0 %1141 }
 0x270   : > { %v2192_v26 = vand.u32 4294901760, %v2191_v9  ;;  %v1651_v9 = vsel %vm1623_vm8, %v1618_v28, %v1142_v21  ;;  %v1553_v28 = vsel %vm1524_vm5, %v1520_v10, %v6918_v61 }
 0x271   : > { %v933_v24 = vpop.permute.xlu1 %932 }
 0x272   : > { %4326 = vmatmul.mubr.f32.gmra.mrb[24].mxu1 %v2192_v26 }
 0x273   : > { %v6927_v36 = vpop.permute.xlu0 %837 }
 0x275   : > { %v1343_v45 = vpop.permute.xlu1 %1342 }
 0x276   : > { %v1716_v33 = vsel %vm1689_vm10, %v1683_v7, %v1343_v45 }
 0x277   : > { %v1239_v31 = vpop.permute.xlu0 %1238 }
 0x278   : > { %v1684_v22 = vsel %vm1656_vm9, %v1651_v9, %v1239_v31  ;;  %v1586_v9 = vsel %vm1557_vm6, %v1553_v28, %v933_v24  ;;  %v1554_v24 = vsel %vm1524_vm5, %v1521_v20, %v6927_v36 }
 0x279   : > { %v1039_v39 = vpop.permute.xlu1 %1038 }
 0x27b   : > { %v935_v18 = vpop.permute.xlu0 %934 }
 0x27d   : > { %v1448_v51 = vpop.permute.xlu1 %1447 }
 0x27e   : > { %v1749_v55 = vsel %vm1722_vm11, %v1716_v33, %v1448_v51 }
 0x27f   : > { %v1345_v44 = vpop.permute.xlu0 %1344  ;;  %v1847_v52 = vsel %vm1767_vm12, %v1749_v55, 0 }
 0x280   : > { %v6946_v56 = vand.u32 4294901760, %v1847_v52  ;;  %v1717_v60 = vsel %vm1689_vm10, %v1684_v22, %v1345_v44 }
 0x281   : > { %v1041_v11 = vpop.permute.xlu1 %1040 }
 0x282   : > { %v6951_v48 = vsub.f32 %v1847_v52, %v6946_v56 }
 0x283   : > { %v6953_v14 = vpop.permute.xlu0 %670 }
 0x284   : > { %v2200_v53 = vand.u32 4294901760, %v6951_v48 }
 0x285   : > { %v1450_v26 = vpop.permute.xlu1 %1449 }
 0x286   : > { %v1750_v45 = vsel %vm1722_vm11, %v1717_v60, %v1450_v26  ;;  %4502 = vmatprep.mubr.f32.mxu0 %v2200_v53  ;;  %v2201_v41 = vsub.f32 %v6951_v48, %v2200_v53  ;;  %v1619_v53 = vsel %vm1590_vm7, %v1586_v9, %v1039_v39 }
 0x287   : > { %v1144_v19 = vpop.permute.xlu0 %1143  ;;  %v1850_v29 = vsel %vm1767_vm12, %v1750_v45, 0 }
 0x288   : > { %v6962_v32 = vand.u32 4294901760, %v1850_v29  ;;  %v2202_v2 = vand.u32 4294901760, %v2201_v41  ;;  %v1652_v26 = vsel %vm1623_vm8, %v1619_v53, %v1144_v19  ;;  %v1587_v19 = vsel %vm1557_vm6, %v1554_v24, %v935_v18 }
 0x289   : > { %v840_v6 = vpop.permute.xlu1 %839 }
 0x28a   : > { %v6965_v21 = vsub.f32 %v1850_v29, %v6962_v32  ;;  %4328 = vmatprep.mubr.f32.mxu1 %v2202_v2 }
 0x28b   : > { %v673_v31 = vpop.permute.xlu0 %672 }
 0x28c   : > { %v2210_v47 = vand.u32 4294901760, %v6965_v21 }
 0x28d   : > { %v1241_v7 = vpop.permute.xlu1 %1240 }
 0x28e   : > { %4503 = vmatmul.mubr.f32.gmra.mrb[26].mxu0 %v2210_v47  ;;  %v2211_v51 = vsub.f32 %v6965_v21, %v2210_v47  ;;  %v1685_v45 = vsel %vm1656_vm9, %v1652_v26, %v1241_v7 }
 0x28f   : > { %v1146_v33 = vpop.permute.xlu0 %1145 }
 0x290   : > { %v2212_v55 = vand.u32 4294901760, %v2211_v51 }
 0x291   : > { %v937_v44 = vpop.permute.xlu1 %936 }
 0x292   : > { %4329 = vmatmul.mubr.f32.gmra.mrb[26].mxu1 %v2212_v55  ;;  %v1620_v55 = vsel %vm1590_vm7, %v1587_v19, %v1041_v11 }
 0x293   : > { %v842_v30 = vpop.permute.xlu0 %841 }
 0x295   : > { %v1347_v52 = vpop.permute.xlu1 %1346 }
 0x296   : > { %v1718_v41 = vsel %vm1689_vm10, %v1685_v45, %v1347_v52  ;;  %v1653_v52 = vsel %vm1623_vm8, %v1620_v55, %v1146_v33 }
 0x297   : > { %v1243_v42 = vpop.permute.xlu0 %1242 }
 0x298   : > { %v1686_v50 = vsel %vm1656_vm9, %v1653_v52, %v1243_v42  ;;  %v1523_v42 = vsel %vm261_vm0, %v6312_v12, %v673_v31 }
 0x299   : > { %v1043_v22 = vpop.permute.xlu1 %1042 }
 0x29b   : > { %v939_v60 = vpop.permute.xlu0 %938 }
 0x29d   : > { %v1452_v29 = vpop.permute.xlu1 %1451 }
 0x29e   : > { %v1751_v2 = vsel %vm1722_vm11, %v1718_v41, %v1452_v29  ;;  %v1522_v29 = vsel %vm261_vm0, %v6235_v38, %v6953_v14 }
 0x29f   : > { %v1349_v47 = vpop.permute.xlu0 %1348  ;;  %v1853_v25 = vsel %vm1767_vm12, %v1751_v2, 0  ;;  %v1556_v2 = vsel %vm1524_vm5, %v1523_v42, %v842_v30 }
 0x2a0   : > { %v6984_v61 = vand.u32 4294901760, %v1853_v25  ;;  %v1719_v28 = vsel %vm1689_vm10, %v1686_v50, %v1349_v47  ;;  %v1555_v47 = vsel %vm1524_vm5, %v1522_v29, %v840_v6 }
 0x2a1   : > { %v1148_v39 = vpop.permute.xlu1 %1147  ;;  %v1588_v19 = vsel %vm1557_vm6, %v1555_v47, %v937_v44  ;;  %v7711_v47 = vld [vmem:[#allocation18_spill] sm:$0xff] }
 0x2a2   : > { %v6990_v7 = vsub.f32 %v1853_v25, %v6984_v61  ;;  %v1589_v25 = vsel %vm1557_vm6, %v1556_v2, %v939_v60  ;;  %v1621_v55 = vsel %vm1590_vm7, %v1588_v19, %v1043_v22  ;;  %v7720_v19 = vld [vmem:[#allocation7_spill] sm:$0xff] }
 0x2a3   : > { %v1045_v51 = vpop.permute.xlu0 %1044  ;;  %v1654_v14 = vsel %vm1623_vm8, %v1621_v55, %v1148_v39  ;;  %v7723_v55 = vld [vmem:[#allocation43_spill] sm:$0xff] }
 0x2a4   : > { %v2220_v10 = vand.u32 4294901760, %v6990_v7  ;;  %v1622_v12 = vsel %vm1590_vm7, %v1589_v25, %v1045_v51  ;;  %v7712_v25 = vld [vmem:[#allocation20_spill] sm:$0xff] }
 0x2a5   : > { %v1150_v27 = vpop.permute.xlu1 %1149 }
 0x2a6   : > { %4505 = vmatprep.mubr.f32.mxu0 %v2220_v10  ;;  %v2221_v36 = vsub.f32 %v6990_v7, %v2220_v10  ;;  %v1655_v52 = vsel %vm1623_vm8, %v1622_v12, %v1150_v27  ;;  %v7721_v12 = vld [vmem:[#allocation39_spill] sm:$0xff] }
 0x2a7   : > { %v1454_v9 = vpop.permute.xlu0 %1453 }
 0x2a8   : > { %v1752_v18 = vsel %vm1722_vm11, %v1719_v28, %v1454_v9  ;;  %v2222_v26 = vand.u32 4294901760, %v2221_v36 }
 0x2a9   : > { %v1856_v53 = vsel %vm1767_vm12, %v1752_v18, 0  ;;  %v1247_v11 = vpop.permute.xlu1 %1246 }
 0x2aa   : > { %v7000_v45 = vand.u32 4294901760, %v1856_v53  ;;  %4331 = vmatprep.mubr.f32.mxu1 %v2222_v26  ;;  %v1688_v6 = vsel %vm1656_vm9, %v1655_v52, %v1247_v11  ;;  %v7724_v52 = vld [vmem:[#allocation8_spill] sm:$0xff] }
 0x2ab   : > { %v1245_v33 = vpop.permute.xlu0 %1244 }
 0x2ac   : > { %v7005_v41 = vsub.f32 %v1856_v53, %v7000_v45  ;;  %v1687_v30 = vsel %vm1656_vm9, %v1654_v14, %v1245_v33  ;;  %v7726_v14 = vld [vmem:[#allocation19_spill] sm:$0xff] }
 0x2ad   : > { %v1353_v20 = vpop.permute.xlu1 %1352 }
 0x2ae   : > { %v2230_v24 = vand.u32 4294901760, %v7005_v41  ;;  %v1721_v60 = vsel %vm1689_vm10, %v1688_v6, %v1353_v20  ;;  %v7713_v20 = vld [vmem:[#allocation13_spill] sm:$0xff] }
 0x2af   : > { %v1351_v31 = vpop.permute.xlu0 %1350  ;;  %v7727_v6 = vld [vmem:[#allocation21_spill] sm:$0xff] }
 0x2b0   : > { %4506 = vmatmul.mubr.f32.gmra.mrb[28].mxu0 %v2230_v24  ;;  %v2231_v38 = vsub.f32 %v7005_v41, %v2230_v24  ;;  %v1720_v51 = vsel %vm1689_vm10, %v1687_v30, %v1351_v31  ;;  %v7714_v24 = vld [vmem:[#allocation22_spill] sm:$0xff]  ;;  %v7722_v31 = vld [vmem:[#allocation41_spill] sm:$0xff]  ;;  %v7728_v30 = vld [vmem:[#allocation23_spill] sm:$0xff] }
 0x2b1   : > { %v1458_v10 = vpop.permute.xlu1 %1457 }
 0x2b2   : > { %v2232_v44 = vand.u32 4294901760, %v2231_v38  ;;  %v1754_v50 = vsel %vm1722_vm11, %v1721_v60, %v1458_v10  ;;  %v7725_v38 = vld [vmem:[#allocation17_spill] sm:$0xff]  ;;  %v7731_v10 = vld [vmem:[#allocation26_spill] sm:$0xff] }
 0x2b3   : > { %v1456_v22 = vpop.permute.xlu0 %1455  ;;  %v1862_v27 = vsel %vm1767_vm12, %v1754_v50, 0  ;;  %v7730_v60 = vld [vmem:[#allocation25_spill] sm:$0xff]  ;;  %v7740_v50 = vld [vmem:[#allocation38_spill] sm:$0xff] }
 0x2b4   : > { %v1753_v28 = vsel %vm1722_vm11, %v1720_v51, %v1456_v22  ;;  %4332 = vmatmul.mubr.f32.gmra.mrb[28].mxu1 %v2232_v44  ;;  %v7027_v9 = vand.u32 4294901760, %v1862_v27  ;;  %v7732_v44 = vld [vmem:[#allocation27_spill] sm:$0xff]  ;;  %v7739_v51 = vld [vmem:[#allocation6_spill] sm:$0xff]  ;;  %v7741_v22 = vld [vmem:[#allocation40_spill] sm:$0xff] }
 0x2b5   : > { %v1859_v39 = vsel %vm1767_vm12, %v1753_v28, 0  ;;  %v7743_v28 = vld [vmem:[#allocation44_spill] sm:$0xff] }
 0x2b6   : > { %v7030_v36 = vand.u32 4294901760, %v1859_v39  ;;  %v7033_v18 = vsub.f32 %v1862_v27, %v7027_v9  ;;  %v7742_v27 = vld [vmem:[#allocation42_spill] sm:$0xff] }
 0x2b8   : > { %v7036_v53 = vsub.f32 %v1859_v39, %v7030_v36  ;;  %v2250_v26 = vand.u32 4294901760, %v7033_v18  ;;  %v7744_v39 = vld [vmem:[#allocation9_spill] sm:$0xff] }
 0x2ba   : > { %v2240_v11 = vand.u32 4294901760, %v7036_v53  ;;  %v2251_v33 = vsub.f32 %v7033_v18, %v2250_v26 }
 0x2bc   : > { %4508 = vmatprep.mubr.f32.mxu0 %v2240_v11  ;;  %v2241_v42 = vsub.f32 %v7036_v53, %v2240_v11  ;;  %v2252_v29 = vand.u32 4294901760, %v2251_v33 }
 0x2bd   : > { %4509 = vmatmul.mubr.f32.gmra.mrb[30].mxu0 %v2250_v26 }
 0x2be   : > { %4521 = vmatprep.mubr.f32.mxu0 %v5576_v40  ;;  %v2242_v2 = vand.u32 4294901760, %v2241_v42 }
 0x2c0   : > { %4334 = vmatprep.mubr.f32.mxu1 %v2242_v2 }
 0x2c1   : > { %4335 = vmatmul.mubr.f32.gmra.mrb[30].mxu1 %v2252_v29  ;;  %4522 = vmatmul.mubr.f32.vlgmr.msra.gmra.mrb[0].mxu0 %v7711_v47 }
 0x2c2   : > { %4347 = vmatprep.mubr.f32.mxu1 %v5576_v40  ;;  %4524 = vmatprep.mubr.f32.mxu0 %v7712_v25 }
 0x2c3   : > { %4670 = vmatpush3.bf16.msra.mxu0 %v7710_v23  ;;  %v7715_v23 = vld [vmem:[#allocation30_spill] sm:$0xff] }
 0x2c4   : > { %4672 = vmatprep.subr.bf16.mxu0 %v7713_v20 }
 0x2c5   : > { %4348 = vmatmul.mubr.f32.vlgmr.msra.gmra.mrb[0].mxu1 %v7711_v47  ;;  %4525 = vmatmul.mubr.f32.gmra.mrb[2].mxu0 %v7714_v24 }
 0x2c6   : > { %4646 = vmatpush3.bf16.msra.mxu1 %v6847_v54  ;;  %4350 = vmatprep.mubr.f32.mxu1 %v7712_v25  ;;  %v7717_v54 = vld [vmem:[#allocation34_spill] sm:$0xff] }
 0x2c7   : > { %4527 = vmatprep.mubr.f32.mxu0 %v5800_v15  ;;  %4648 = vmatprep.subr.bf16.mxu1 %v6886_v49 }
 0x2c8   : > { %4674 = vmatpush3.bf16.msra.mxu0 %v7713_v20 }
 0x2c9   : > { %4351 = vmatmul.mubr.f32.gmra.mrb[2].mxu1 %v7714_v24  ;;  %4528 = vmatmul.mubr.f32.gmra.mrb[4].mxu0 %v5809_v16 }
 0x2ca   : > { %4353 = vmatprep.mubr.f32.mxu1 %v5800_v15  ;;  %4530 = vmatprep.mubr.f32.mxu0 %v5903_v4 }
 0x2cb   : > { %4650 = vmatpush3.bf16.msra.mxu1 %v6886_v49  ;;  %4577 = vmatprep.subr.mxu0 %v7708_v1  ;;  %v7718_v49 = vld [vmem:[#allocation36_spill] sm:$0xff] }
 0x2cc   : > { %4403 = vmatprep.subr.mxu1 %v6790_v8  ;;  %4578 = vmatpush3.msra.mxu0 %v7708_v1  ;;  %v7716_v1 = vld [vmem:[#allocation32_spill] sm:$0xff] }
 0x2cd   : > { %4354 = vmatmul.mubr.f32.gmra.mrb[4].mxu1 %v5809_v16  ;;  %4531 = vmatmul.mubr.f32.gmra.mrb[6].mxu0 %v5912_v35 }
 0x2ce   : > { %4356 = vmatprep.mubr.f32.mxu1 %v5903_v4  ;;  %4533 = vmatprep.mubr.f32.mxu0 %v6013_v37 }
 0x2cf   : > { %4404 = vmatpush3.msra.mxu1 %v6790_v8  ;;  %v7719_v8 = vld [vmem:[#allocation16_spill] sm:$0xff] }
 0x2d1   : > { %4357 = vmatmul.mubr.f32.gmra.mrb[6].mxu1 %v5912_v35  ;;  %4534 = vmatmul.mubr.f32.gmra.mrb[8].mxu0 %v6027_v43 }
 0x2d2   : > { %4359 = vmatprep.mubr.f32.mxu1 %v6013_v37  ;;  %4536 = vmatprep.mubr.f32.mxu0 %v7715_v23 }
 0x2d5   : > { %4360 = vmatmul.mubr.f32.gmra.mrb[8].mxu1 %v6027_v43  ;;  %4537 = vmatmul.mubr.f32.gmra.mrb[10].mxu0 %v7716_v1 }
 0x2d6   : > { %4362 = vmatprep.mubr.f32.mxu1 %v7715_v23  ;;  %4539 = vmatprep.mubr.f32.mxu0 %v7717_v54 }
 0x2d9   : > { %4363 = vmatmul.mubr.f32.gmra.mrb[10].mxu1 %v7716_v1  ;;  %4540 = vmatmul.mubr.f32.gmra.mrb[12].mxu0 %v7718_v49 }
 0x2da   : > { %4365 = vmatprep.mubr.f32.mxu1 %v7717_v54  ;;  %4542 = vmatprep.mubr.f32.mxu0 %v7719_v8 }
 0x2dd   : > { %4366 = vmatmul.mubr.f32.gmra.mrb[12].mxu1 %v7718_v49  ;;  %4543 = vmatmul.mubr.f32.gmra.mrb[14].mxu0 %v7720_v19 }
 0x2de   : > { %4368 = vmatprep.mubr.f32.mxu1 %v7719_v8  ;;  %4545 = vmatprep.mubr.f32.mxu0 %v7721_v12 }
 0x2e1   : > { %4369 = vmatmul.mubr.f32.gmra.mrb[14].mxu1 %v7720_v19  ;;  %4546 = vmatmul.mubr.f32.gmra.mrb[16].mxu0 %v7722_v31 }
 0x2e2   : > { %4371 = vmatprep.mubr.f32.mxu1 %v7721_v12  ;;  %4548 = vmatprep.mubr.f32.mxu0 %v7723_v55 }
 0x2e5   : > { %4372 = vmatmul.mubr.f32.gmra.mrb[16].mxu1 %v7722_v31  ;;  %4549 = vmatmul.mubr.f32.gmra.mrb[18].mxu0 %v7724_v52 }
 0x2e6   : > { %4374 = vmatprep.mubr.f32.mxu1 %v7723_v55  ;;  %4551 = vmatprep.mubr.f32.mxu0 %v6735_v5 }
 0x2e9   : > { %4375 = vmatmul.mubr.f32.gmra.mrb[18].mxu1 %v7724_v52  ;;  %4552 = vmatmul.mubr.f32.gmra.mrb[20].mxu0 %v6770_v0 }
 0x2ea   : > { %4377 = vmatprep.mubr.f32.mxu1 %v6735_v5  ;;  %4554 = vmatprep.mubr.f32.mxu0 %v6840_v46 }
 0x2ed   : > { %4378 = vmatmul.mubr.f32.gmra.mrb[20].mxu1 %v6770_v0  ;;  %4555 = vmatmul.mubr.f32.gmra.mrb[22].mxu0 %v6864_v62 }
 0x2ee   : > { %4380 = vmatprep.mubr.f32.mxu1 %v6840_v46  ;;  %4557 = vmatprep.mubr.f32.mxu0 %v6899_v13 }
 0x2f1   : > { %4381 = vmatmul.mubr.f32.gmra.mrb[22].mxu1 %v6864_v62  ;;  %4558 = vmatmul.mubr.f32.gmra.mrb[24].mxu0 %v6916_v59 }
 0x2f2   : > { %4383 = vmatprep.mubr.f32.mxu1 %v6899_v13  ;;  %4560 = vmatprep.mubr.f32.mxu0 %v6946_v56 }
 0x2f5   : > { %4384 = vmatmul.mubr.f32.gmra.mrb[24].mxu1 %v6916_v59  ;;  %4561 = vmatmul.mubr.f32.gmra.mrb[26].mxu0 %v6962_v32 }
 0x2f6   : > { %4386 = vmatprep.mubr.f32.mxu1 %v6946_v56  ;;  %4563 = vmatprep.mubr.f32.mxu0 %v6984_v61 }
 0x2f9   : > { %4387 = vmatmul.mubr.f32.gmra.mrb[26].mxu1 %v6962_v32  ;;  %4564 = vmatmul.mubr.f32.gmra.mrb[28].mxu0 %v7000_v45 }
 0x2fa   : > { %4389 = vmatprep.mubr.f32.mxu1 %v6984_v61  ;;  %4566 = vmatprep.mubr.f32.mxu0 %v7030_v36 }
 0x2fd   : > { %4390 = vmatmul.mubr.f32.gmra.mrb[28].mxu1 %v7000_v45  ;;  %4567 = vmatmul.mubr.f32.gmra.mrb[30].mxu0 %v7027_v9 }
 0x2fe   : > { %4392 = vmatprep.mubr.f32.mxu1 %v7030_v36  ;;  %4579 = vmatprep.mubr.f32.mxu0 %v5576_v40  ;;  %v7729_v40 = vld [vmem:[#allocation24_spill] sm:$0xff] }
 0x301   : > { %4393 = vmatmul.mubr.f32.gmra.mrb[30].mxu1 %v7027_v9  ;;  %4580 = vmatmul.mubr.f32.vlgmr.msra.gmra.mrb[0].mxu0 %v7711_v47 }
 0x302   : > { %4405 = vmatprep.mubr.f32.mxu1 %v7725_v38  ;;  %4582 = vmatprep.mubr.f32.mxu0 %v7712_v25 }
 0x305   : > { %4406 = vmatmul.mubr.f32.vlgmr.msra.gmra.mrb[0].mxu1 %v7726_v14  ;;  %4583 = vmatmul.mubr.f32.gmra.mrb[2].mxu0 %v7714_v24 }
 0x306   : > { %4408 = vmatprep.mubr.f32.mxu1 %v7727_v6  ;;  %4585 = vmatprep.mubr.f32.mxu0 %v5800_v15  ;;  %v7733_v15 = vld [vmem:[#allocation28_spill] sm:$0xff] }
 0x309   : > { %4409 = vmatmul.mubr.f32.gmra.mrb[2].mxu1 %v7728_v30  ;;  %4586 = vmatmul.mubr.f32.gmra.mrb[4].mxu0 %v5809_v16  ;;  %v7734_v16 = vld [vmem:[#allocation29_spill] sm:$0xff] }
 0x30a   : > { %4411 = vmatprep.mubr.f32.mxu1 %v7729_v40  ;;  %4588 = vmatprep.mubr.f32.mxu0 %v5903_v4  ;;  %v7735_v4 = vld [vmem:[#allocation31_spill] sm:$0xff] }
 0x30d   : > { %4412 = vmatmul.mubr.f32.gmra.mrb[4].mxu1 %v7730_v60  ;;  %4589 = vmatmul.mubr.f32.gmra.mrb[6].mxu0 %v5912_v35  ;;  %v7736_v35 = vld [vmem:[#allocation33_spill] sm:$0xff] }
 0x30e   : > { %4414 = vmatprep.mubr.f32.mxu1 %v7731_v10  ;;  %4591 = vmatprep.mubr.f32.mxu0 %v6013_v37  ;;  %v7737_v37 = vld [vmem:[#allocation35_spill] sm:$0xff] }
 0x311   : > { %4415 = vmatmul.mubr.f32.gmra.mrb[6].mxu1 %v7732_v44  ;;  %4592 = vmatmul.mubr.f32.gmra.mrb[8].mxu0 %v6027_v43  ;;  %v7738_v43 = vld [vmem:[#allocation37_spill] sm:$0xff] }
 0x312   : > { %4417 = vmatprep.mubr.f32.mxu1 %v7733_v15  ;;  %4594 = vmatprep.mubr.f32.mxu0 %v7715_v23 }
 0x315   : > { %4418 = vmatmul.mubr.f32.gmra.mrb[8].mxu1 %v7734_v16  ;;  %4595 = vmatmul.mubr.f32.gmra.mrb[10].mxu0 %v7716_v1 }
 0x316   : > { %4420 = vmatprep.mubr.f32.mxu1 %v7735_v4  ;;  %4597 = vmatprep.mubr.f32.mxu0 %v7717_v54 }
 0x319   : > { %4421 = vmatmul.mubr.f32.gmra.mrb[10].mxu1 %v7736_v35  ;;  %4598 = vmatmul.mubr.f32.gmra.mrb[12].mxu0 %v7718_v49 }
 0x31a   : > { %4423 = vmatprep.mubr.f32.mxu1 %v7737_v37  ;;  %4600 = vmatprep.mubr.f32.mxu0 %v7719_v8 }
 0x31d   : > { %4424 = vmatmul.mubr.f32.gmra.mrb[12].mxu1 %v7738_v43  ;;  %4601 = vmatmul.mubr.f32.gmra.mrb[14].mxu0 %v7720_v19 }
 0x31e   : > { %4426 = vmatprep.mubr.f32.mxu1 %v7739_v51  ;;  %4603 = vmatprep.mubr.f32.mxu0 %v7721_v12 }
 0x321   : > { %4427 = vmatmul.mubr.f32.gmra.mrb[14].mxu1 %v7740_v50  ;;  %4604 = vmatmul.mubr.f32.gmra.mrb[16].mxu0 %v7722_v31 }
 0x322   : > { %4429 = vmatprep.mubr.f32.mxu1 %v7741_v22  ;;  %4606 = vmatprep.mubr.f32.mxu0 %v7723_v55 }
 0x325   : > { %4430 = vmatmul.mubr.f32.gmra.mrb[16].mxu1 %v7742_v27  ;;  %4607 = vmatmul.mubr.f32.gmra.mrb[18].mxu0 %v7724_v52 }
 0x326   : > { %4432 = vmatprep.mubr.f32.mxu1 %v7743_v28  ;;  %4609 = vmatprep.mubr.f32.mxu0 %v6735_v5 }
 0x329   : > { %4433 = vmatmul.mubr.f32.gmra.mrb[18].mxu1 %v7744_v39  ;;  %4610 = vmatmul.mubr.f32.gmra.mrb[20].mxu0 %v6770_v0  ;;  %v7183_v0 = vld [vmem:[%s7563_s3] ss:$0 sm:$0xff] }
 0x32a   : > { %4435 = vmatprep.mubr.f32.mxu1 %v6747_v57  ;;  %4612 = vmatprep.mubr.f32.mxu0 %v6840_v46 }
 0x32d   : > { %4436 = vmatmul.mubr.f32.gmra.mrb[20].mxu1 %v6779_v17  ;;  %4613 = vmatmul.mubr.f32.gmra.mrb[22].mxu0 %v6864_v62 }
 0x32e   : > { %4438 = vmatprep.mubr.f32.mxu1 %v6852_v34  ;;  %4615 = vmatprep.mubr.f32.mxu0 %v6899_v13 }
 0x331   : > { %4439 = vmatmul.mubr.f32.gmra.mrb[22].mxu1 %v6869_v63  ;;  %4616 = vmatmul.mubr.f32.gmra.mrb[24].mxu0 %v6916_v59 }
 0x332   : > { %4441 = vmatprep.mubr.f32.mxu1 %v6905_v3  ;;  %4618 = vmatprep.mubr.f32.mxu0 %v6946_v56 }
 0x335   : > { %4442 = vmatmul.mubr.f32.gmra.mrb[24].mxu1 %v6921_v58  ;;  %4619 = vmatmul.mubr.f32.gmra.mrb[26].mxu0 %v6962_v32 }
 0x336   : > { %4444 = vmatprep.mubr.f32.mxu1 %v6951_v48  ;;  %4621 = vmatprep.mubr.f32.mxu0 %v6984_v61 }
 0x339   : > { %4445 = vmatmul.mubr.f32.gmra.mrb[26].mxu1 %v6965_v21  ;;  %4622 = vmatmul.mubr.f32.gmra.mrb[28].mxu0 %v7000_v45 }
 0x33a   : > { %4447 = vmatprep.mubr.f32.mxu1 %v6990_v7  ;;  %4624 = vmatprep.mubr.f32.mxu0 %v7030_v36 }
 0x33d   : > { %4448 = vmatmul.mubr.f32.gmra.mrb[28].mxu1 %v7005_v41  ;;  %4625 = vmatmul.mubr.f32.gmra.mrb[30].mxu0 %v7027_v9 }
 0x33e   : > { %4450 = vmatprep.mubr.f32.mxu1 %v7036_v53 }
 0x341   : > { %4451 = vmatmul.mubr.f32.gmra.mrb[30].mxu1 %v7033_v18 }
 0x3d4   : > { %v4581_v5 = vpop.f32.mrb[0].mxu0 }
 0x3d5   : > { %v3509_v57 = vpop.f32.mrb[1].mxu0 }
 0x3d8   : > { %v4407_v17 = vpop.f32.mrb[0].mxu1  ;;  %v4584_v46 = vpop.f32.mrb[2].mxu0 }
 0x3d9   : > { %v4675_v34 = vadd.f32 %v4407_v17, %v7183_v0  ;;  %v2618_v62 = vpop.f32.mrb[1].mxu1  ;;  %v3521_v63 = vpop.f32.mrb[3].mxu0 }
 0x3da   : > { %v4677_v13 = vadd.f32 %v7183_v0, %v2618_v62 }
 0x3db   : > { %v7187_v3 = vadd.f32 %v4675_v34, %v4581_v5 }
 0x3dc   : > { %v7189_v59 = vadd.f32 %v4677_v13, %v3509_v57  ;;  %v4410_v58 = vpop.f32.mrb[2].mxu1  ;;  %v4587_v56 = vpop.f32.mrb[4].mxu0 }
 0x3dd   : > { %3700 = vst.msk [vmem:[%s5075_s15 + $0x8] sm:$0xff] %vm1524_vm5, %v7187_v3  ;;  %v4679_v48 = vadd.f32 %v4410_v58, %v7183_v0  ;;  %v2632_v32 = vpop.f32.mrb[3].mxu1  ;;  %v3533_v21 = vpop.f32.mrb[5].mxu0 }
 0x3de   : > { %3699 = vst.msk [vmem:[%s5075_s15] sm:$0xff] %vm1524_vm5, %v7189_v59  ;;  %v4681_v61 = vadd.f32 %v7183_v0, %v2632_v32 }
 0x3df   : > { %v7199_v7 = vadd.f32 %v4679_v48, %v4584_v46 }
 0x3e0   : > { %v7201_v45 = vadd.f32 %v4681_v61, %v3521_v63  ;;  %v4413_v41 = vpop.f32.mrb[4].mxu1  ;;  %v4590_v9 = vpop.f32.mrb[6].mxu0 }
 0x3e1   : > { %3702 = vst.msk [vmem:[%s5075_s15 + $0x18] sm:$0xff] %vm1524_vm5, %v7199_v7  ;;  %v4683_v36 = vadd.f32 %v4413_v41, %v7183_v0  ;;  %v2646_v18 = vpop.f32.mrb[5].mxu1  ;;  %v3545_v53 = vpop.f32.mrb[7].mxu0 }
 0x3e2   : > { %3701 = vst.msk [vmem:[%s5075_s15 + $0x10] sm:$0xff] %vm1524_vm5, %v7201_v45  ;;  %v4685_v26 = vadd.f32 %v7183_v0, %v2646_v18 }
 0x3e3   : > { %v7211_v11 = vadd.f32 %v4683_v36, %v4587_v56 }
 0x3e4   : > { %v7213_v33 = vadd.f32 %v4685_v26, %v3533_v21  ;;  %v4416_v42 = vpop.f32.mrb[6].mxu1  ;;  %v4593_v29 = vpop.f32.mrb[8].mxu0 }
 0x3e5   : > { %3704 = vst.msk [vmem:[%s5075_s15 + $0x28] sm:$0xff] %vm1524_vm5, %v7211_v11  ;;  %v4687_v2 = vadd.f32 %v4416_v42, %v7183_v0  ;;  %v2660_v47 = vpop.f32.mrb[7].mxu1  ;;  %v3557_v25 = vpop.f32.mrb[9].mxu0 }
 0x3e6   : > { %3703 = vst.msk [vmem:[%s5075_s15 + $0x20] sm:$0xff] %vm1524_vm5, %v7213_v33  ;;  %v4689_v20 = vadd.f32 %v7183_v0, %v2660_v47 }
 0x3e7   : > { %v7223_v24 = vadd.f32 %v4687_v2, %v4590_v9 }
 0x3e8   : > { %v7225_v23 = vadd.f32 %v4689_v20, %v3545_v53  ;;  %v4419_v1 = vpop.f32.mrb[8].mxu1  ;;  %v4596_v54 = vpop.f32.mrb[10].mxu0 }
 0x3e9   : > { %3706 = vst.msk [vmem:[%s5075_s15 + $0x38] sm:$0xff] %vm1524_vm5, %v7223_v24  ;;  %v4691_v49 = vadd.f32 %v4419_v1, %v7183_v0  ;;  %v2674_v8 = vpop.f32.mrb[9].mxu1  ;;  %v3569_v19 = vpop.f32.mrb[11].mxu0 }
 0x3ea   : > { %3705 = vst.msk [vmem:[%s5075_s15 + $0x30] sm:$0xff] %vm1524_vm5, %v7225_v23  ;;  %v4693_v12 = vadd.f32 %v7183_v0, %v2674_v8 }
 0x3eb   : > { %v7235_v31 = vadd.f32 %v4691_v49, %v4593_v29 }
 0x3ec   : > { %v7237_v55 = vadd.f32 %v4693_v12, %v3557_v25  ;;  %v4422_v52 = vpop.f32.mrb[10].mxu1  ;;  %v4599_v38 = vpop.f32.mrb[12].mxu0 }
 0x3ed   : > { %3708 = vst.msk [vmem:[%s5075_s15 + $0x48] sm:$0xff] %vm1524_vm5, %v7235_v31  ;;  %v4695_v14 = vadd.f32 %v4422_v52, %v7183_v0  ;;  %v2688_v6 = vpop.f32.mrb[11].mxu1  ;;  %v3581_v30 = vpop.f32.mrb[13].mxu0 }
 0x3ee   : > { %3707 = vst.msk [vmem:[%s5075_s15 + $0x40] sm:$0xff] %vm1524_vm5, %v7237_v55  ;;  %v4697_v40 = vadd.f32 %v7183_v0, %v2688_v6 }
 0x3ef   : > { %v7247_v60 = vadd.f32 %v4695_v14, %v4596_v54 }
 0x3f0   : > { %v7249_v10 = vadd.f32 %v4697_v40, %v3569_v19  ;;  %v4425_v44 = vpop.f32.mrb[12].mxu1  ;;  %v4602_v15 = vpop.f32.mrb[14].mxu0 }
 0x3f1   : > { %3710 = vst.msk [vmem:[%s5075_s15 + $0x58] sm:$0xff] %vm1524_vm5, %v7247_v60  ;;  %v4699_v16 = vadd.f32 %v4425_v44, %v7183_v0  ;;  %v2702_v4 = vpop.f32.mrb[13].mxu1  ;;  %v3593_v35 = vpop.f32.mrb[15].mxu0 }
 0x3f2   : > { %3709 = vst.msk [vmem:[%s5075_s15 + $0x50] sm:$0xff] %vm1524_vm5, %v7249_v10  ;;  %v4701_v37 = vadd.f32 %v7183_v0, %v2702_v4 }
 0x3f3   : > { %v7259_v43 = vadd.f32 %v4699_v16, %v4599_v38 }
 0x3f4   : > { %v7261_v51 = vadd.f32 %v4701_v37, %v3581_v30  ;;  %v4428_v50 = vpop.f32.mrb[14].mxu1  ;;  %v4605_v22 = vpop.f32.mrb[16].mxu0 }
 0x3f5   : > { %3712 = vst.msk [vmem:[%s5075_s15 + $0x68] sm:$0xff] %vm1524_vm5, %v7259_v43  ;;  %v4703_v27 = vadd.f32 %v4428_v50, %v7183_v0  ;;  %v2716_v28 = vpop.f32.mrb[15].mxu1  ;;  %v3605_v39 = vpop.f32.mrb[17].mxu0 }
 0x3f6   : > { %3711 = vst.msk [vmem:[%s5075_s15 + $0x60] sm:$0xff] %vm1524_vm5, %v7261_v51  ;;  %v4705_v5 = vadd.f32 %v7183_v0, %v2716_v28 }
 0x3f7   : > { %v7271_v57 = vadd.f32 %v4703_v27, %v4602_v15 }
 0x3f8   : > { %v7273_v17 = vadd.f32 %v4705_v5, %v3593_v35  ;;  %v4431_v46 = vpop.f32.mrb[16].mxu1  ;;  %v4608_v34 = vpop.f32.mrb[18].mxu0 }
 0x3f9   : > { %3714 = vst.msk [vmem:[%s5075_s15 + $0x78] sm:$0xff] %vm1524_vm5, %v7271_v57  ;;  %v4707_v62 = vadd.f32 %v4431_v46, %v7183_v0  ;;  %v2730_v63 = vpop.f32.mrb[17].mxu1  ;;  %v3617_v13 = vpop.f32.mrb[19].mxu0 }
 0x3fa   : > { %3713 = vst.msk [vmem:[%s5075_s15 + $0x70] sm:$0xff] %vm1524_vm5, %v7273_v17  ;;  %v4709_v58 = vadd.f32 %v7183_v0, %v2730_v63 }
 0x3fb   : > { %v7283_v56 = vadd.f32 %v4707_v62, %v4605_v22 }
 0x3fc   : > { %v7285_v48 = vadd.f32 %v4709_v58, %v3605_v39  ;;  %v4434_v32 = vpop.f32.mrb[18].mxu1  ;;  %v4611_v21 = vpop.f32.mrb[20].mxu0 }
 0x3fd   : > { %3716 = vst.msk [vmem:[%s5075_s15 + $0x88] sm:$0xff] %vm1524_vm5, %v7283_v56  ;;  %v4711_v61 = vadd.f32 %v4434_v32, %v7183_v0  ;;  %v2744_v41 = vpop.f32.mrb[19].mxu1  ;;  %v3629_v9 = vpop.f32.mrb[21].mxu0 }
 0x3fe   : > { %3715 = vst.msk [vmem:[%s5075_s15 + $0x80] sm:$0xff] %vm1524_vm5, %v7285_v48  ;;  %v4713_v36 = vadd.f32 %v7183_v0, %v2744_v41 }
 0x3ff   : > { %v7295_v18 = vadd.f32 %v4711_v61, %v4608_v34 }
 0x400   : > { %v7297_v53 = vadd.f32 %v4713_v36, %v3617_v13  ;;  %v4437_v26 = vpop.f32.mrb[20].mxu1  ;;  %v4614_v42 = vpop.f32.mrb[22].mxu0 }
 0x401   : > { %3718 = vst.msk [vmem:[%s5075_s15 + $0x98] sm:$0xff] %vm1524_vm5, %v7295_v18  ;;  %v4715_v29 = vadd.f32 %v4437_v26, %v7183_v0  ;;  %v2758_v2 = vpop.f32.mrb[21].mxu1  ;;  %v3641_v47 = vpop.f32.mrb[23].mxu0 }
 0x402   : > { %3717 = vst.msk [vmem:[%s5075_s15 + $0x90] sm:$0xff] %vm1524_vm5, %v7297_v53  ;;  %v4717_v25 = vadd.f32 %v7183_v0, %v2758_v2  ;;  %v5000_v2 = vmov (!%p4053_p13), 0.0  }
 0x403   : > { %v7307_v20 = vadd.f32 %v4715_v29, %v4611_v21  ;;  %3736 = vst.msk [vmem:[%s5080_s18] sm:$0x3] (!%p4053_p13), %vm3735_vm13, %v5000_v2 }
 0x404   : > { %v7309_v1 = vadd.f32 %v4717_v25, %v3629_v9  ;;  %v4440_v54 = vpop.f32.mrb[22].mxu1  ;;  %v4617_v49 = vpop.f32.mrb[24].mxu0 }
 0x405   : > { %3720 = vst.msk [vmem:[%s5075_s15 + $0xa8] sm:$0xff] %vm1524_vm5, %v7307_v20  ;;  %v4719_v8 = vadd.f32 %v4440_v54, %v7183_v0  ;;  %v2772_v19 = vpop.f32.mrb[23].mxu1  ;;  %v3653_v12 = vpop.f32.mrb[25].mxu0 }
 0x406   : > { %3719 = vst.msk [vmem:[%s5075_s15 + $0xa0] sm:$0xff] %vm1524_vm5, %v7309_v1  ;;  %v4721_v52 = vadd.f32 %v7183_v0, %v2772_v19 }
 0x407   : > { %v7319_v38 = vadd.f32 %v4719_v8, %v4614_v42 }
 0x408   : > { %v7321_v14 = vadd.f32 %v4721_v52, %v3641_v47  ;;  %v4443_v6 = vpop.f32.mrb[24].mxu1  ;;  %v4620_v30 = vpop.f32.mrb[26].mxu0 }
 0x409   : > { %3722 = vst.msk [vmem:[%s5075_s15 + $0xb8] sm:$0xff] %vm1524_vm5, %v7319_v38  ;;  %v4723_v40 = vadd.f32 %v4443_v6, %v7183_v0  ;;  %v2786_v44 = vpop.f32.mrb[25].mxu1  ;;  %v3665_v15 = vpop.f32.mrb[27].mxu0 }
 0x40a   : > { %3721 = vst.msk [vmem:[%s5075_s15 + $0xb0] sm:$0xff] %vm1524_vm5, %v7321_v14  ;;  %v4725_v16 = vadd.f32 %v7183_v0, %v2786_v44 }
 0x40b   : > { %v7331_v4 = vadd.f32 %v4723_v40, %v4617_v49 }
 0x40c   : > { %v7333_v35 = vadd.f32 %v4725_v16, %v3653_v12  ;;  %v4446_v37 = vpop.f32.mrb[26].mxu1  ;;  %v4623_v50 = vpop.f32.mrb[28].mxu0 }
 0x40d   : > { %3724 = vst.msk [vmem:[%s5075_s15 + $0xc8] sm:$0xff] %vm1524_vm5, %v7331_v4  ;;  %v4727_v22 = vadd.f32 %v4446_v37, %v7183_v0  ;;  %v2800_v27 = vpop.f32.mrb[27].mxu1  ;;  %v3677_v28 = vpop.f32.mrb[29].mxu0 }
 0x40e   : > { %3723 = vst.msk [vmem:[%s5075_s15 + $0xc0] sm:$0xff] %vm1524_vm5, %v7333_v35  ;;  %v4729_v39 = vadd.f32 %v7183_v0, %v2800_v27 }
 0x40f   : > { %v7343_v5 = vadd.f32 %v4727_v22, %v4620_v30 }
 0x410   : > { %v7345_v46 = vadd.f32 %v4729_v39, %v3665_v15  ;;  %v4449_v34 = vpop.f32.mrb[28].mxu1  ;;  %v4626_v62 = vpop.f32.mrb[30].mxu0 }
 0x411   : > { %3726 = vst.msk [vmem:[%s5075_s15 + $0xd8] sm:$0xff] %vm1524_vm5, %v7343_v5  ;;  %v4731_v63 = vadd.f32 %v4449_v34, %v7183_v0  ;;  %v2814_v13 = vpop.f32.mrb[29].mxu1  ;;  %v3689_v58 = vpop.f32.mrb[31].mxu0 }
 0x412   : > { %3725 = vst.msk [vmem:[%s5075_s15 + $0xd0] sm:$0xff] %vm1524_vm5, %v7345_v46  ;;  %v4733_v32 = vadd.f32 %v7183_v0, %v2814_v13 }
 0x413   : > { %v7355_v21 = vadd.f32 %v4731_v63, %v4623_v50 }
 0x414   : > { %v7357_v61 = vadd.f32 %v4733_v32, %v3677_v28  ;;  %v4452_v41 = vpop.f32.mrb[30].mxu1  ;;  %3734 = sbr.rel (%p4053_p13) target bundleno = 1051 (0x41b), region = 43 }
 0x415   : > { %3728 = vst.msk [vmem:[%s5075_s15 + $0xe8] sm:$0xff] %vm1524_vm5, %v7355_v21  ;;  %v4735_v9 = vadd.f32 %v4452_v41, %v7183_v0  ;;  %v2828_v36 = vpop.f32.mrb[31].mxu1 }
 0x416   : > { %3727 = vst.msk [vmem:[%s5075_s15 + $0xe0] sm:$0xff] %vm1524_vm5, %v7357_v61  ;;  %v4737_v26 = vadd.f32 %v7183_v0, %v2828_v36 }
 0x417   : > { %v7367_v42 = vadd.f32 %v4735_v9, %v4626_v62 }
 0x418   : > { %v7369_v29 = vadd.f32 %v4737_v26, %v3689_v58 }
 0x419   : > { %3730 = vst.msk [vmem:[%s5075_s15 + $0xf8] sm:$0xff] %vm1524_vm5, %v7367_v42 }
 0x41a   : > { %3729 = vst.msk [vmem:[%s5075_s15 + $0xf0] sm:$0xff] %vm1524_vm5, %v7369_v29 }
 0x41b PF: > { %v3738_v0 = vsel %vm1524_vm5, %v7189_v59, 0.0  ;;  %v3739_v47 = vsel %vm1524_vm5, %v7187_v3, 0.0  ;;  %v3741_v25 = vsel %vm1524_vm5, %v7201_v45, 0.0  ;;  %v3743_v49 = vsel %vm1524_vm5, %v7199_v7, 0.0 }
 0x41c   : > { %v3740_v54 = vadd.f32 %v3739_v47, %v3738_v0  ;;  %v3745_v19 = vsel %vm1524_vm5, %v7213_v33, 0.0  ;;  %v3747_v52 = vsel %vm1524_vm5, %v7211_v11, 0.0  ;;  %v3749_v30 = vsel %vm1524_vm5, %v7225_v23, 0.0 }
 0x41d   : > { %v3751_v44 = vsel %vm1524_vm5, %v7223_v24, 0.0  ;;  %v3753_v16 = vsel %vm1524_vm5, %v7237_v55, 0.0  ;;  %v3755_v50 = vsel %vm1524_vm5, %v7235_v31, 0.0  ;;  %v3811_v22 = vmul.f32 %v7189_v59, %v7189_v59 }
 0x41e   : > { %v3742_v8 = vadd.f32 %v3741_v25, %v3740_v54  ;;  %v3812_v27 = vmul.f32 %v7187_v3, %v7187_v3  ;;  %v3813_v39 = vmul.f32 %v7201_v45, %v7201_v45  ;;  %v3757_v34 = vsel %vm1524_vm5, %v7249_v10, 0.0 }
 0x41f   : > { %v3814_v62 = vmul.f32 %v7199_v7, %v7199_v7  ;;  %v3759_v13 = vsel %vm1524_vm5, %v7247_v60, 0.0  ;;  %v3815_v59 = vmul.f32 %v7213_v33, %v7213_v33  ;;  %v3843_v58 = vsel %vm1524_vm5, %v3811_v22, 0.0 }
 0x420   : > { %v3744_v12 = vadd.f32 %v3743_v49, %v3742_v8  ;;  %v3844_v3 = vsel %vm1524_vm5, %v3812_v27, 0.0  ;;  %v3846_v45 = vsel %vm1524_vm5, %v3813_v39, 0.0  ;;  %v3761_v9 = vsel %vm1524_vm5, %v7261_v51, 0.0 }
 0x421   : > { %v3845_v41 = vadd.f32 %v3844_v3, %v3843_v58  ;;  %v3816_v7 = vmul.f32 %v7211_v11, %v7211_v11  ;;  %v3848_v36 = vsel %vm1524_vm5, %v3814_v62, 0.0  ;;  %v3763_v33 = vsel %vm1524_vm5, %v7259_v43, 0.0 }
 0x422   : > { %v3746_v6 = vadd.f32 %v3745_v19, %v3744_v12  ;;  %v3817_v0 = vmul.f32 %v7225_v23, %v7225_v23  ;;  %v3850_v47 = vsel %vm1524_vm5, %v3815_v59, 0.0  ;;  %v3765_v49 = vsel %vm1524_vm5, %v7273_v17, 0.0 }
 0x423   : > { %v3847_v2 = vadd.f32 %v3846_v45, %v3845_v41  ;;  %v3818_v11 = vmul.f32 %v7223_v24, %v7223_v24  ;;  %v3852_v8 = vsel %vm1524_vm5, %v3816_v7, 0.0  ;;  %v3819_v23 = vmul.f32 %v7237_v55, %v7237_v55 }
 0x424   : > { %v3748_v40 = vadd.f32 %v3747_v52, %v3746_v6  ;;  %v3767_v52 = vsel %vm1524_vm5, %v7271_v57, 0.0  ;;  %v3854_v6 = vsel %vm1524_vm5, %v3817_v0, 0.0  ;;  %v3820_v24 = vmul.f32 %v7235_v31, %v7235_v31 }
 0x425   : > { %v3849_v54 = vadd.f32 %v3848_v36, %v3847_v2  ;;  %v3821_v55 = vmul.f32 %v7249_v10, %v7249_v10  ;;  %v3858_v22 = vsel %vm1524_vm5, %v3819_v23, 0.0  ;;  %v3773_v39 = vsel %vm1524_vm5, %v7297_v53, 0.0 }
 0x426   : > { %v3750_v15 = vadd.f32 %v3749_v30, %v3748_v40  ;;  %v3822_v31 = vmul.f32 %v7247_v60, %v7247_v60  ;;  %v3823_v10 = vmul.f32 %v7261_v51, %v7261_v51  ;;  %v3824_v60 = vmul.f32 %v7259_v43, %v7259_v43 }
 0x427   : > { %v3851_v12 = vadd.f32 %v3850_v47, %v3849_v54  ;;  %v3862_v59 = vsel %vm1524_vm5, %v3821_v55, 0.0  ;;  %v3779_v7 = vsel %vm1524_vm5, %v7307_v20, 0.0  ;;  %v3825_v51 = vmul.f32 %v7273_v17, %v7273_v17 }
 0x428   : > { %v3752_v37 = vadd.f32 %v3751_v44, %v3750_v15  ;;  %v3769_v44 = vsel %vm1524_vm5, %v7285_v48, 0.0  ;;  %v3856_v15 = vsel %vm1524_vm5, %v3818_v11, 0.0  ;;  %v3864_v41 = vsel %vm1524_vm5, %v3822_v31, 0.0 }
 0x429   : > { %v3853_v40 = vadd.f32 %v3852_v8, %v3851_v12  ;;  %v3866_v36 = vsel %vm1524_vm5, %v3823_v10, 0.0  ;;  %v3826_v43 = vmul.f32 %v7271_v57, %v7271_v57  ;;  %v3868_v0 = vsel %vm1524_vm5, %v3824_v60, 0.0 }
 0x42a   : > { %v3754_v28 = vadd.f32 %v3753_v16, %v3752_v37  ;;  %v3783_v54 = vsel %vm1524_vm5, %v7319_v38, 0.0  ;;  %v3827_v17 = vmul.f32 %v7285_v48, %v7285_v48  ;;  %v3828_v57 = vmul.f32 %v7283_v56, %v7283_v56 }
 0x42b   : > { %v3855_v37 = vadd.f32 %v3854_v6, %v3853_v40  ;;  %v3872_v12 = vsel %vm1524_vm5, %v3826_v43, 0.0  ;;  %v3787_v6 = vsel %vm1524_vm5, %v7331_v4, 0.0  ;;  %v3829_v48 = vmul.f32 %v7297_v53, %v7297_v53 }
 0x42c   : > { %v3756_v63 = vadd.f32 %v3755_v50, %v3754_v28  ;;  %v3771_v50 = vsel %vm1524_vm5, %v7283_v56, 0.0  ;;  %v3830_v56 = vmul.f32 %v7295_v18, %v7295_v18  ;;  %v3831_v53 = vmul.f32 %v7309_v1, %v7309_v1 }
 0x42d   : > { %v3857_v28 = vadd.f32 %v3856_v15, %v3855_v37  ;;  %v3876_v15 = vsel %vm1524_vm5, %v3828_v57, 0.0  ;;  %v3878_v55 = vsel %vm1524_vm5, %v3829_v48, 0.0  ;;  %v3799_v60 = vsel %vm1524_vm5, %v7367_v42, 0.0 }
 0x42e   : > { %v3758_v32 = vadd.f32 %v3757_v34, %v3756_v63  ;;  %v3860_v34 = vsel %vm1524_vm5, %v3820_v24, 0.0  ;;  %v3789_v24 = vsel %vm1524_vm5, %v7345_v46, 0.0  ;;  %vm3808_vm14 = vcmask 57344  }
 0x42f   : > { %v3859_v63 = vadd.f32 %v3858_v22, %v3857_v28  ;;  %v3793_v28 = vsel %vm1524_vm5, %v7357_v61, 0.0 }
 0x430   : > { %v3760_v26 = vadd.f32 %v3759_v13, %v3758_v32  ;;  %v3775_v13 = vsel %vm1524_vm5, %v7295_v18, 0.0  ;;  %v3777_v32 = vsel %vm1524_vm5, %v7309_v1, 0.0  ;;  %v3832_v18 = vmul.f32 %v7307_v20, %v7307_v20 }
 0x431   : > { %v3861_v3 = vadd.f32 %v3860_v34, %v3859_v63  ;;  %v3833_v1 = vmul.f32 %v7321_v14, %v7321_v14  ;;  %v3882_v63 = vsel %vm1524_vm5, %v3831_v53, 0.0  ;;  %v3834_v20 = vmul.f32 %v7319_v38, %v7319_v38  ;;  %v3810_v53 = vld [vmem:[%s5080_s18 + $0x1] sm:$0x1] }
 0x432   : > { %v3762_v25 = vadd.f32 %v3761_v9, %v3760_v26 }
 0x433   : > { %v3863_v9 = vadd.f32 %v3862_v59, %v3861_v3  ;;  %v3797_v59 = vsel %vm1524_vm5, %v7369_v29, 0.0 }
 0x434   : > { %v3764_v19 = vadd.f32 %v3763_v33, %v3762_v25  ;;  %v3781_v33 = vsel %vm1524_vm5, %v7321_v14, 0.0  ;;  %v3835_v14 = vmul.f32 %v7333_v35, %v7333_v35 }
 0x435   : > { %v3865_v2 = vadd.f32 %v3864_v41, %v3863_v9  ;;  %v3886_v41 = vsel %vm1524_vm5, %v3833_v1, 0.0 }
 0x436   : > { %v3766_v30 = vadd.f32 %v3765_v49, %v3764_v19  ;;  %v3870_v49 = vsel %vm1524_vm5, %v3825_v51, 0.0  ;;  %v3785_v19 = vsel %vm1524_vm5, %v7333_v35, 0.0  ;;  %v3888_v51 = vsel %vm1524_vm5, %v3834_v20, 0.0 }
 0x437   : > { %v3867_v25 = vadd.f32 %v3866_v36, %v3865_v2  ;;  %v3890_v2 = vsel %vm1524_vm5, %v3835_v14, 0.0  ;;  %v3838_v35 = vmul.f32 %v7343_v5, %v7343_v5 }
 0x438   : > { %v3768_v16 = vadd.f32 %v3767_v52, %v3766_v30  ;;  %v3874_v30 = vsel %vm1524_vm5, %v3827_v17, 0.0 }
 0x439   : > { %v3869_v8 = vadd.f32 %v3868_v0, %v3867_v25 }
 0x43a   : > { %v3770_v27 = vadd.f32 %v3769_v44, %v3768_v16 }
 0x43b   : > { %v3871_v23 = vadd.f32 %v3870_v49, %v3869_v8 }
 0x43c   : > { %v3772_v62 = vadd.f32 %v3771_v50, %v3770_v27  ;;  %v3791_v50 = vsel %vm1524_vm5, %v7343_v5, 0.0 }
 0x43d   : > { %v3873_v44 = vadd.f32 %v3872_v12, %v3871_v23  ;;  %v3842_v23 = vmul.f32 %v7367_v42, %v7367_v42 }
 0x43e   : > { %v3774_v58 = vadd.f32 %v3773_v39, %v3772_v62  ;;  %v3880_v39 = vsel %vm1524_vm5, %v3830_v56, 0.0  ;;  %v3795_v62 = vsel %vm1524_vm5, %v7355_v21, 0.0 }
 0x43f   : > { %v3875_v37 = vadd.f32 %v3874_v30, %v3873_v44 }
 0x440   : > { %v3776_v45 = vadd.f32 %v3775_v13, %v3774_v58  ;;  %v3884_v58 = vsel %vm1524_vm5, %v3832_v18, 0.0 }
 0x441   : > { %v3877_v27 = vadd.f32 %v3876_v15, %v3875_v37 }
 0x442   : > { %v3778_v26 = vadd.f32 %v3777_v32, %v3776_v45 }
 0x443   : > { %v3879_v34 = vadd.f32 %v3878_v55, %v3877_v27 }
 0x444   : > { %v3780_v47 = vadd.f32 %v3779_v7, %v3778_v26  ;;  %v3836_v7 = vmul.f32 %v7331_v4, %v7331_v4  ;;  %v3837_v26 = vmul.f32 %v7345_v46, %v7345_v46  ;;  %v3839_v4 = vmul.f32 %v7357_v61, %v7357_v61  ;;  %v3737_v61 = vld [vmem:[%s5080_s18] sm:$0x1] }
 0x445   : > { %v3881_v10 = vadd.f32 %v3880_v39, %v3879_v34  ;;  %v3840_v46 = vmul.f32 %v7355_v21, %v7355_v21 }
 0x446   : > { %v3782_v11 = vadd.f32 %v3781_v33, %v3780_v47  ;;  %v3892_v0 = vsel %vm1524_vm5, %v3836_v7, 0.0  ;;  %v3898_v57 = vsel %vm1524_vm5, %v3839_v4, 0.0 }
 0x447   : > { %v3883_v32 = vadd.f32 %v3882_v63, %v3881_v10 }
 0x448   : > { %v3784_v52 = vadd.f32 %v3783_v54, %v3782_v11  ;;  %v3894_v54 = vsel %vm1524_vm5, %v3837_v26, 0.0  ;;  %v3896_v11 = vsel %vm1524_vm5, %v3838_v35, 0.0 }
 0x449   : > { %v3885_v9 = vadd.f32 %v3884_v58, %v3883_v32 }
 0x44a   : > { %v3786_v40 = vadd.f32 %v3785_v19, %v3784_v52  ;;  %v3841_v19 = vmul.f32 %v7369_v29, %v7369_v29  ;;  %v3904_v29 = vsel %vm1524_vm5, %v3842_v23, 0.0 }
 0x44b   : > { %v3887_v36 = vadd.f32 %v3886_v41, %v3885_v9 }
 0x44c   : > { %v3788_v16 = vadd.f32 %v3787_v6, %v3786_v40  ;;  %v3900_v6 = vsel %vm1524_vm5, %v3840_v46, 0.0  ;;  %v3902_v30 = vsel %vm1524_vm5, %v3841_v19, 0.0 }
 0x44d   : > { %v3889_v43 = vadd.f32 %v3888_v51, %v3887_v36 }
 0x44e   : > { %v3790_v22 = vadd.f32 %v3789_v24, %v3788_v16 }
 0x44f   : > { %v3891_v25 = vadd.f32 %v3890_v2, %v3889_v43 }
 0x450   : > { %v3792_v31 = vadd.f32 %v3791_v50, %v3790_v22 }
 0x451   : > { %v3893_v49 = vadd.f32 %v3892_v0, %v3891_v25 }
 0x452   : > { %v3794_v13 = vadd.f32 %v3793_v28, %v3792_v31 }
 0x453   : > { %v3895_v5 = vadd.f32 %v3894_v54, %v3893_v49 }
 0x454   : > { %v3796_v3 = vadd.f32 %v3795_v62, %v3794_v13 }
 0x455   : > { %v3897_v52 = vadd.f32 %v3896_v11, %v3895_v5 }
 0x456   : > { %v3798_v45 = vadd.f32 %v3797_v59, %v3796_v3 }
 0x457   : > { %v3899_v48 = vadd.f32 %v3898_v57, %v3897_v52 }
 0x458   : > { %v3800_v38 = vadd.f32 %v3799_v60, %v3798_v45 }
 0x459   : > { %v3901_v44 = vadd.f32 %v3900_v6, %v3899_v48 }
 0x45a   : > { %v3801_v33 = vrot.slane %v3800_v38, 4 }
 0x45b   : > { %v3903_v24 = vadd.f32 %v3902_v30, %v3901_v44 }
 0x45c   : > { %v3802_v47 = vadd.f32 %v3801_v33, %v3800_v38 }
 0x45d   : > { %v3905_v56 = vadd.f32 %v3904_v29, %v3903_v24 }
 0x45e   : > { %v3803_v17 = vrot.slane %v3802_v47, 2 }
 0x45f   : > { %v3906_v15 = vrot.slane %v3905_v56, 4 }
 0x460   : > { %v3804_v8 = vadd.f32 %v3803_v17, %v3802_v47 }
 0x461   : > { %v3907_v16 = vadd.f32 %v3906_v15, %v3905_v56 }
 0x462   : > { %v3805_v12 = vrot.slane %v3804_v8, 1 }
 0x463   : > { %v3908_v42 = vrot.slane %v3907_v16, 2 }
 0x464   : > { %v3806_v21 = vadd.f32 %v3805_v12, %v3804_v8 }
 0x465   : > { %v3909_v37 = vadd.f32 %v3908_v42, %v3907_v16 }
 0x466   : > { %v3807_v40 = vadd.f32 %v3806_v21, %v3737_v61 }
 0x467   : > { %v3910_v50 = vrot.slane %v3909_v37, 1 }
 0x468   : > { %3809 = vst.msk [vmem:[%s5080_s18] sm:$0x1] %vm3808_vm14, %v3807_v40 }
 0x469   : > { %v3911_v55 = vadd.f32 %v3910_v50, %v3909_v37 }
 0x46b   : > { %v3912_v22 = vadd.f32 %v3911_v55, %v3810_v53 }
 0x46d   : > { %3913 = vst.msk [vmem:[%s5080_s18 + $0x1] sm:$0x1] %vm3808_vm14, %v3912_v22 }
 0x46e PF: > { %s22_s26 = sadd.s32 1, %s4985_s26   ;;  %s7745_s23 = smov %s4977_s25 }
 0x46f   : > { %p19_p0 = scmp.ge.s32.totalorder %s22_s26, 10   ;;  %s7746_s24 = smov %s4981_s0 }
 0x470   : > { %s7747_s25 = smov %s7750_s27  ;;  %s7748_s0 = smov %s7754_s28 }
 0x471   :  { %21 = sbr.rel (!%p19_p0) target bundleno = 18 (0x12), region = 98 }

</bundles_post_ra>
